<compile_context>
chip_gen: v7x
topology: tpu7x:2x2x1
jax: 0.10.0
libtpu: 0.0.40
codegen_flags: <defaults>
</compile_context>

<pallas_src>
import functools

import jax
import jax.numpy as jnp
from jax.experimental import pallas as pl
from jax.experimental.pallas import tpu as pltpu

MAX_PAD = 6     # largest dilation/padding among the branches (conv4)
EPS = 1e-5      # BatchNorm eps
LANE = 128      # TPU lane width


def _round_up(x, m):
    return ((x + m - 1) // m) * m


def _prelu(x, a):
    return jnp.where(x >= 0, x, a * x)


def _aspp_kernel(alpha_ref,                        # SMEM (6,) PReLU slopes
                 xa_ref, xb_ref, xc_ref,           # 3 x (1, TH, Wp, Cp) row blocks
                 w1_ref,                           # (Cp, Cdp)
                 w2_ref, w3_ref, w4_ref,           # (9*Cp, Cdp) tap-major weights
                 wf_ref,                           # (4*Cdp, Cp) fuse weight
                 sc_ref, sh_ref,                   # (4, Cdp) folded BN scale/shift
                 sf_ref,                           # (1, Cp) fuse BN scale
                 bf_ref,                           # (1, 1, Cp) per-batch fuse shift
                 out_ref,                          # (1, TH, W, Cp)
                 *, TH, W, Cp, Cdp):
    HW = TH * W

    # Halo'd row window for this tile: padded rows [i*TH, i*TH + 3*TH).
    xwin = jnp.concatenate([xa_ref[0], xb_ref[0], xc_ref[0]], axis=0)  # (3TH, Wp, Cp)

    def tap(oy, ox):
        # Shifted view of the TH output rows, flattened to a (HW, Cp) matrix.
        return xwin[oy:oy + TH, ox:ox + W, :].reshape(HW, Cp)

    sc = sc_ref[...]            # (4, Cdp)
    sh = sh_ref[...]

    def bn_prelu(y, idx):
        return _prelu(y * sc[idx:idx + 1, :] + sh[idx:idx + 1, :], alpha_ref[idx])

    # ---- branch 1: 1x1 conv
    x_c = tap(MAX_PAD, MAX_PAD)
    y1 = bn_prelu(jnp.dot(x_c, w1_ref[...], preferred_element_type=jnp.float32), 0)

    # ---- branches 2..4: dilated 3x3 conv as ONE (HW, 9*Cp) @ (9*Cp, Cdp) matmul
    def branch_3x3(w_ref_b, d, idx):
        taps = jnp.concatenate(
            [tap(MAX_PAD + (ky - 1) * d, MAX_PAD + (kx - 1) * d)
             for ky in range(3) for kx in range(3)], axis=-1)           # (HW, 9*Cp)
        y = jnp.dot(taps, w_ref_b[...], preferred_element_type=jnp.float32)
        return bn_prelu(y, idx)

    y2 = branch_3x3(w2_ref, 2, 1)
    y3 = branch_3x3(w3_ref, 4, 2)
    y4 = branch_3x3(w4_ref, 6, 3)

    # ---- fuse: concat(y1..y4) @ wf[:4*Cd]; the pooled branch contribution
    # (y5 @ wf[4*Cd:]) * sf is pre-folded into bf_ref by the wrapper.
    cdt = xa_ref.dtype
    cat4 = jnp.concatenate([y1.astype(cdt), y2.astype(cdt),
                            y3.astype(cdt), y4.astype(cdt)], axis=-1)   # (HW, 4*Cdp)
    fuse = jnp.dot(cat4, wf_ref[...], preferred_element_type=jnp.float32)
    fuse = _prelu(fuse * sf_ref[...] + bf_ref[0], alpha_ref[5])
    out_ref[0] = fuse.reshape(TH, W, Cp).astype(out_ref.dtype)


@functools.partial(jax.jit, static_argnames=("compute_dtype", "tile_h"))
def aspp_forward(x_nchw, params, *, compute_dtype=jnp.bfloat16, tile_h=8):
    N, Cin, H, W = x_nchw.shape
    Cd = Cin // 2
    Cp = _round_up(Cin, LANE)                       # lane-padded channel dims
    Cdp = _round_up(Cd, LANE)
    TH = tile_h
    n_tiles = pl.cdiv(H, TH)
    H_t = n_tiles * TH
    Hp = TH * (n_tiles + 2)                         # top pad = MAX_PAD, bottom >= MAX_PAD
    Wp = _round_up(W + 2 * MAX_PAD, 8)              # sublane-aligned padded width

    x = jnp.transpose(x_nchw, (0, 2, 3, 1)).astype(jnp.float32)   # NHWC f32

    # ---- branch 5 (global average pool -> 1x1 conv -> BN -> PReLU -> broadcast)
    # computed in plain JAX and folded into the fuse shift (spatially constant).
    a = params['alpha']
    sc, sh = params['sc'], params['sh']
    pooled = jnp.mean(x, axis=(1, 2))                              # (N, Cin)
    y5 = _prelu(pooled @ params['w5'] * sc[4] + sh[4], a[4])       # (N, Cd)
    bf_eff = params['bf'] + (y5 @ params['wf'][4 * Cd:]) * params['sf']   # (N, Cin)

    # ---- pad the image: channels -> Cp (lane width), spatial halo -> (Hp, Wp)
    xpad = jnp.pad(x, ((0, 0),
                       (MAX_PAD, Hp - H - MAX_PAD),
                       (MAX_PAD, Wp - W - MAX_PAD),
                       (0, Cp - Cin))).astype(compute_dtype)
    # TODO(synk): at production channel counts (Cin % 128 == 0) the channel pad is a
    # no-op; the remaining spatial-halo pad copy could be removed with in-kernel
    # boundary masking if HBM traffic ever dominates.

    # ---- pad / reshape weights into lane-dense layouts (padded slots are zero,
    # so padded channels stay zero through BN/PReLU and the fuse matmul).
    w1p = jnp.zeros((Cp, Cdp), jnp.float32).at[:Cin, :Cd].set(params['w1'])

    def tap_weight(w):               # (3,3,Cin,Cd) -> (9*Cp, Cdp), ky-major tap order
        out = jnp.zeros((9 * Cp, Cdp), jnp.float32)
        for ky in range(3):
            for kx in range(3):
                r = (ky * 3 + kx) * Cp
                out = out.at[r:r + Cin, :Cd].set(w[ky, kx])
        return out

    w2p, w3p, w4p = (tap_weight(params[k]) for k in ('w2', 'w3', 'w4'))

    wf4 = jnp.zeros((4 * Cdp, Cp), jnp.float32)
    for b in range(4):
        wf4 = wf4.at[b * Cdp:b * Cdp + Cd, :Cin].set(params['wf'][b * Cd:(b + 1) * Cd])

    scp = jnp.zeros((4, Cdp), jnp.float32).at[:, :Cd].set(sc[:4])
    shp = jnp.zeros((4, Cdp), jnp.float32).at[:, :Cd].set(sh[:4])
    sfp = jnp.zeros((1, Cp), jnp.float32).at[:, :Cin].set(params['sf'])
    bfp = jnp.zeros((N, 1, Cp), jnp.float32).at[:, 0, :Cin].set(bf_eff)

    cdt = compute_dtype
    w1p, w2p, w3p, w4p, wf4 = (w.astype(cdt) for w in (w1p, w2p, w3p, w4p, wf4))

    kern = functools.partial(_aspp_kernel, TH=TH, W=W, Cp=Cp, Cdp=Cdp)

    def full_spec(arr):
        return pl.BlockSpec(arr.shape, lambda n, i, nd=arr.ndim: (0,) * nd)

    def x_spec(off):
        return pl.BlockSpec((1, TH, Wp, Cp),
                            lambda n, i, off=off: (n, i + off, 0, 0))

    # Explicit VMEM budget sized from the actual block footprint (+ headroom).
    isz = jnp.dtype(cdt).itemsize
    est = (2 * 3 * TH * Wp * Cp * isz                      # double-buffered input blocks
           + 2 * TH * W * Cp * 4                           # double-buffered output block
           + 2 * (28 * Cp * Cdp + 4 * Cdp * Cp) * isz      # conv/fuse weights
           + (3 * TH * Wp * Cp + 9 * Cp * TH * W) * isz    # window + largest tap matrix
           + 8 * TH * W * max(Cp, Cdp) * 4)                # f32 branch/fuse activations
    vmem_limit = int(min(max(2 * est, 32 * 2 ** 20), 60 * 2 ** 20))

    out = pl.pallas_call(
        kern,
        out_shape=jax.ShapeDtypeStruct((N, H_t, W, Cp), jnp.float32),
        grid=(N, n_tiles),
        in_specs=[
            pl.BlockSpec(memory_space=pltpu.MemorySpace.SMEM),    # PReLU slopes
            x_spec(0), x_spec(1), x_spec(2),                      # halo'd row window
            full_spec(w1p), full_spec(w2p), full_spec(w3p), full_spec(w4p),
            full_spec(wf4), full_spec(scp), full_spec(shp), full_spec(sfp),
            pl.BlockSpec((1, 1, Cp), lambda n, i: (n, 0, 0)),     # per-batch fuse shift
        ],
        out_specs=pl.BlockSpec((1, TH, W, Cp), lambda n, i: (n, i, 0, 0)),
        compiler_params=pltpu.CompilerParams(
            dimension_semantics=("parallel", "parallel"),
            vmem_limit_bytes=vmem_limit),
    )(a, xpad, xpad, xpad, w1p, w2p, w3p, w4p, wf4, scp, shp, sfp, bfp)

    out = out[:, :H, :, :Cin]                                     # drop row/lane padding
    return jnp.transpose(out, (0, 3, 1, 2)).astype(x_nchw.dtype)  # NCHW


def init_params(key, in_dim):
    """Deterministic synthetic parameters (shapes per _ASPP.__init__)."""
    down = in_dim // 2
    counter = [0]

    def rnd(shape, scale=0.2):
        counter[0] += 1
        k = jax.random.fold_in(key, counter[0])
        return scale * jax.random.normal(k, shape, dtype=jnp.float32)

    w1 = rnd((in_dim, down))
    w2 = rnd((3, 3, in_dim, down))
    w3 = rnd((3, 3, in_dim, down))
    w4 = rnd((3, 3, in_dim, down))
    w5 = rnd((in_dim, down))
    wf = rnd((5 * down, in_dim))

    def folded_bn(cout):
        conv_bias = rnd((cout,))
        gamma = 1.0 + rnd((cout,), 0.1)
        beta = rnd((cout,), 0.1)
        mean = rnd((cout,), 0.1)
        var = 1.0 + jnp.abs(rnd((cout,), 0.1))
        scale = gamma / jnp.sqrt(var + EPS)
        shift = beta + (conv_bias - mean) * scale
        return scale, shift

    branch_sc, branch_sh = [], []
    for _ in range(5):
        s, b = folded_bn(down)
        branch_sc.append(s)
        branch_sh.append(b)
    sf, bf = folded_bn(in_dim)

    return dict(
        w1=w1, w2=w2, w3=w3, w4=w4, w5=w5, wf=wf,
        sc=jnp.stack(branch_sc),            # (5, down)
        sh=jnp.stack(branch_sh),            # (5, down)
        sf=sf.reshape(1, in_dim),
        bf=bf.reshape(1, in_dim),
        alpha=jnp.full((6,), 0.25, jnp.float32),   # PReLU default slope per layer
    )


def ref_forward(x_nchw, p):
    """Pure-JAX reference for correctness checking."""
    x = jnp.transpose(x_nchw, (0, 2, 3, 1)).astype(jnp.float32)
    N, H, W, Cin = x.shape
    Cd = Cin // 2
    a, sc, sh = p['alpha'], p['sc'], p['sh']

    def prelu(v, al):
        return jnp.where(v >= 0, v, al * v)

    def bn_prelu(v, i):
        return prelu(v * sc[i] + sh[i], a[i])

    def dil(w, d):
        return jax.lax.conv_general_dilated(
            x, w, (1, 1), [(d, d), (d, d)], rhs_dilation=(d, d),
            dimension_numbers=('NHWC', 'HWIO', 'NHWC'))

    y1 = bn_prelu(jnp.einsum('nhwc,cd->nhwd', x, p['w1']), 0)
    y2 = bn_prelu(dil(p['w2'], 2), 1)
    y3 = bn_prelu(dil(p['w3'], 4), 2)
    y4 = bn_prelu(dil(p['w4'], 6), 3)
    pooled = jnp.mean(x, axis=(1, 2))                              # (N, Cin)
    y5 = prelu(pooled @ p['w5'] * sc[4] + sh[4], a[4])             # (N, Cd)
    y5 = jnp.broadcast_to(y5[:, None, None, :], (N, H, W, Cd))
    cat = jnp.concatenate([y1, y2, y3, y4, y5], axis=-1)
    fuse = jnp.einsum('nhwc,cd->nhwd', cat, p['wf'])
    fuse = prelu(fuse * p['sf'][0] + p['bf'][0], a[5])
    return jnp.transpose(fuse, (0, 3, 1, 2))


if __name__ == "__main__":
    key = jax.random.PRNGKey(0)
    kx, kp = jax.random.split(key)

    N, in_dim, H, W = 2, 8, 16, 16
    x = jax.random.normal(kx, (N, in_dim, H, W), dtype=jnp.float32)
    params = init_params(kp, in_dim)

    ref = jax.block_until_ready(ref_forward(x, params))

    # f32 matmul path: tight check of the kernel math (tap layout, folding, BN/PReLU).
    out32 = jax.block_until_ready(
        aspp_forward(x, params, compute_dtype=jnp.float32))
    assert out32.shape == (N, in_dim, H, W), out32.shape
    err32 = float(jnp.max(jnp.abs(out32 - ref)))
    assert err32 < 2e-2, err32

    # Default bf16-matmul path (perf configuration): looser tolerance for bf16 rounding.
    out16 = jax.block_until_ready(aspp_forward(x, params))
    assert out16.shape == (N, in_dim, H, W), out16.shape
    err16 = float(jnp.max(jnp.abs(out16 - ref)))
    assert err16 < 8e-2, err16

    print("KERNEL_OK")
</pallas_src>

<mosaic_0001>
module attributes {stable_mosaic.version = 11 : i64} {
  func.func @_aspp_kernel(%arg0: i32, %arg1: i32, %arg2: memref<6xf32, #tpu.memory_space<smem>>, %arg3: memref<1x8x32x128xf32, #tpu.memory_space<vmem>>, %arg4: memref<1x8x32x128xf32, #tpu.memory_space<vmem>>, %arg5: memref<1x8x32x128xf32, #tpu.memory_space<vmem>>, %arg6: memref<128x128xf32, #tpu.memory_space<vmem>>, %arg7: memref<1152x128xf32, #tpu.memory_space<vmem>>, %arg8: memref<1152x128xf32, #tpu.memory_space<vmem>>, %arg9: memref<1152x128xf32, #tpu.memory_space<vmem>>, %arg10: memref<512x128xf32, #tpu.memory_space<vmem>>, %arg11: memref<4x128xf32, #tpu.memory_space<vmem>>, %arg12: memref<4x128xf32, #tpu.memory_space<vmem>>, %arg13: memref<1x128xf32, #tpu.memory_space<vmem>>, %arg14: memref<1x1x128xf32, #tpu.memory_space<vmem>>, %arg15: memref<1x8x16x128xf32, #tpu.memory_space<vmem>>) attributes {dimension_semantics = [#tpu.dimension_semantics<parallel>, #tpu.dimension_semantics<parallel>], iteration_bounds = array<i64: 2, 2>, scalar_prefetch = 0 : i64, scratch_operands = 0 : i64, tpu.core_type = #tpu.core_type<tc>, window_params = [{transform_indices = @transform_0, window_bounds = array<i64: 6>}, {transform_indices = @transform_1, window_bounds = array<i64: 1, 8, 32, 128>}, {transform_indices = @transform_2, window_bounds = array<i64: 1, 8, 32, 128>}, {transform_indices = @transform_3, window_bounds = array<i64: 1, 8, 32, 128>}, {pipeline_mode = #tpu.pipeline_mode<synchronous>, transform_indices = @transform_4, window_bounds = array<i64: 128, 128>}, {pipeline_mode = #tpu.pipeline_mode<synchronous>, transform_indices = @transform_5, window_bounds = array<i64: 1152, 128>}, {pipeline_mode = #tpu.pipeline_mode<synchronous>, transform_indices = @transform_6, window_bounds = array<i64: 1152, 128>}, {pipeline_mode = #tpu.pipeline_mode<synchronous>, transform_indices = @transform_7, window_bounds = array<i64: 1152, 128>}, {pipeline_mode = #tpu.pipeline_mode<synchronous>, transform_indices = @transform_8, window_bounds = array<i64: 512, 128>}, {pipeline_mode = #tpu.pipeline_mode<synchronous>, transform_indices = @transform_9, window_bounds = array<i64: 4, 128>}, {pipeline_mode = #tpu.pipeline_mode<synchronous>, transform_indices = @transform_10, window_bounds = array<i64: 4, 128>}, {pipeline_mode = #tpu.pipeline_mode<synchronous>, transform_indices = @transform_11, window_bounds = array<i64: 1, 128>}, {transform_indices = @transform_12, window_bounds = array<i64: 1, 1, 128>}, {transform_indices = @transform_13, window_bounds = array<i64: 1, 8, 16, 128>}]} {
    %c0 = arith.constant 0 : index
    %c0_0 = arith.constant 0 : index
    %c0_1 = arith.constant 0 : index
    %c0_2 = arith.constant 0 : index
    %0 = vector.load %arg3[%c0, %c0_0, %c0_1, %c0_2] : memref<1x8x32x128xf32, #tpu.memory_space<vmem>>, vector<1x8x32x128xf32>
    %1 = vector.shape_cast %0 : vector<1x8x32x128xf32> to vector<8x32x128xf32>
    %c0_3 = arith.constant 0 : index
    %c0_4 = arith.constant 0 : index
    %c0_5 = arith.constant 0 : index
    %c0_6 = arith.constant 0 : index
    %2 = vector.load %arg4[%c0_3, %c0_4, %c0_5, %c0_6] : memref<1x8x32x128xf32, #tpu.memory_space<vmem>>, vector<1x8x32x128xf32>
    %3 = vector.shape_cast %2 : vector<1x8x32x128xf32> to vector<8x32x128xf32>
    %c0_7 = arith.constant 0 : index
    %c0_8 = arith.constant 0 : index
    %c0_9 = arith.constant 0 : index
    %c0_10 = arith.constant 0 : index
    %4 = vector.load %arg5[%c0_7, %c0_8, %c0_9, %c0_10] : memref<1x8x32x128xf32, #tpu.memory_space<vmem>>, vector<1x8x32x128xf32>
    %5 = vector.shape_cast %4 : vector<1x8x32x128xf32> to vector<8x32x128xf32>
    %6 = tpu.concatenate %1, %3, %5 in 0 : vector<8x32x128xf32>, vector<8x32x128xf32>, vector<8x32x128xf32> -> vector<24x32x128xf32>
    %c0_11 = arith.constant 0 : index
    %c0_12 = arith.constant 0 : index
    %7 = vector.load %arg11[%c0_11, %c0_12] : memref<4x128xf32, #tpu.memory_space<vmem>>, vector<4x128xf32>
    %c0_13 = arith.constant 0 : index
    %c0_14 = arith.constant 0 : index
    %8 = vector.load %arg12[%c0_13, %c0_14] : memref<4x128xf32, #tpu.memory_space<vmem>>, vector<4x128xf32>
    %9 = vector.extract_strided_slice %6 {offsets = [6, 6, 0], sizes = [8, 16, 128], strides = [1, 1, 1]} : vector<24x32x128xf32> to vector<8x16x128xf32>
    %10 = vector.shape_cast %9 : vector<8x16x128xf32> to vector<128x128xf32>
    %c0_15 = arith.constant 0 : index
    %c0_16 = arith.constant 0 : index
    %11 = vector.load %arg6[%c0_15, %c0_16] : memref<128x128xf32, #tpu.memory_space<vmem>>, vector<128x128xf32>
    %cst = arith.constant dense<0.000000e+00> : vector<128x128xf32>
    %12 = tpu.matmul %10, %11, %cst {dimension_numbers = #tpu.dot_dimension_numbers<[1], [0], [0], [1], [0, 0, 1, 1], [], []>} : vector<128x128xf32>, vector<128x128xf32>, vector<128x128xf32> -> vector<128x128xf32>
    %13 = vector.extract_strided_slice %7 {offsets = [0, 0], sizes = [1, 128], strides = [1, 1]} : vector<4x128xf32> to vector<1x128xf32>
    %14 = vector.broadcast %13 : vector<1x128xf32> to vector<128x128xf32>
    %15 = arith.mulf %12, %14 : vector<128x128xf32>
    %16 = vector.extract_strided_slice %8 {offsets = [0, 0], sizes = [1, 128], strides = [1, 1]} : vector<4x128xf32> to vector<1x128xf32>
    %17 = vector.broadcast %16 : vector<1x128xf32> to vector<128x128xf32>
    %18 = arith.addf %15, %17 : vector<128x128xf32>
    %c0_17 = arith.constant 0 : index
    %19 = memref.load %arg2[%c0_17] : memref<6xf32, #tpu.memory_space<smem>>
    %cst_18 = arith.constant 0.000000e+00 : f32
    %20 = vector.broadcast %cst_18 : f32 to vector<128x128xf32>
    %21 = arith.cmpf oge, %18, %20 : vector<128x128xf32>
    %22 = vector.broadcast %19 : f32 to vector<128x128xf32>
    %23 = arith.mulf %22, %18 : vector<128x128xf32>
    %24 = arith.select %21, %18, %23 : vector<128x128xi1>, vector<128x128xf32>
    %25 = vector.extract_strided_slice %6 {offsets = [4, 4, 0], sizes = [8, 16, 128], strides = [1, 1, 1]} : vector<24x32x128xf32> to vector<8x16x128xf32>
    %26 = vector.shape_cast %25 : vector<8x16x128xf32> to vector<128x128xf32>
    %27 = vector.extract_strided_slice %6 {offsets = [4, 6, 0], sizes = [8, 16, 128], strides = [1, 1, 1]} : vector<24x32x128xf32> to vector<8x16x128xf32>
    %28 = vector.shape_cast %27 : vector<8x16x128xf32> to vector<128x128xf32>
    %29 = vector.extract_strided_slice %6 {offsets = [4, 8, 0], sizes = [8, 16, 128], strides = [1, 1, 1]} : vector<24x32x128xf32> to vector<8x16x128xf32>
    %30 = vector.shape_cast %29 : vector<8x16x128xf32> to vector<128x128xf32>
    %31 = vector.extract_strided_slice %6 {offsets = [6, 4, 0], sizes = [8, 16, 128], strides = [1, 1, 1]} : vector<24x32x128xf32> to vector<8x16x128xf32>
    %32 = vector.shape_cast %31 : vector<8x16x128xf32> to vector<128x128xf32>
    %33 = vector.extract_strided_slice %6 {offsets = [6, 6, 0], sizes = [8, 16, 128], strides = [1, 1, 1]} : vector<24x32x128xf32> to vector<8x16x128xf32>
    %34 = vector.shape_cast %33 : vector<8x16x128xf32> to vector<128x128xf32>
    %35 = vector.extract_strided_slice %6 {offsets = [6, 8, 0], sizes = [8, 16, 128], strides = [1, 1, 1]} : vector<24x32x128xf32> to vector<8x16x128xf32>
    %36 = vector.shape_cast %35 : vector<8x16x128xf32> to vector<128x128xf32>
    %37 = vector.extract_strided_slice %6 {offsets = [8, 4, 0], sizes = [8, 16, 128], strides = [1, 1, 1]} : vector<24x32x128xf32> to vector<8x16x128xf32>
    %38 = vector.shape_cast %37 : vector<8x16x128xf32> to vector<128x128xf32>
    %39 = vector.extract_strided_slice %6 {offsets = [8, 6, 0], sizes = [8, 16, 128], strides = [1, 1, 1]} : vector<24x32x128xf32> to vector<8x16x128xf32>
    %40 = vector.shape_cast %39 : vector<8x16x128xf32> to vector<128x128xf32>
    %41 = vector.extract_strided_slice %6 {offsets = [8, 8, 0], sizes = [8, 16, 128], strides = [1, 1, 1]} : vector<24x32x128xf32> to vector<8x16x128xf32>
    %42 = vector.shape_cast %41 : vector<8x16x128xf32> to vector<128x128xf32>
    %43 = tpu.concatenate %26, %28, %30, %32, %34, %36, %38, %40, %42 in 1 : vector<128x128xf32>, vector<128x128xf32>, vector<128x128xf32>, vector<128x128xf32>, vector<128x128xf32>, vector<128x128xf32>, vector<128x128xf32>, vector<128x128xf32>, vector<128x128xf32> -> vector<128x1152xf32>
    %c0_19 = arith.constant 0 : index
    %c0_20 = arith.constant 0 : index
    %44 = vector.load %arg7[%c0_19, %c0_20] : memref<1152x128xf32, #tpu.memory_space<vmem>>, vector<1152x128xf32>
    %cst_21 = arith.constant dense<0.000000e+00> : vector<128x128xf32>
    %45 = tpu.matmul %43, %44, %cst_21 {dimension_numbers = #tpu.dot_dimension_numbers<[1], [0], [0], [1], [0, 0, 1, 1], [], []>} : vector<128x1152xf32>, vector<1152x128xf32>, vector<128x128xf32> -> vector<128x128xf32>
    %46 = vector.extract_strided_slice %7 {offsets = [1, 0], sizes = [1, 128], strides = [1, 1]} : vector<4x128xf32> to vector<1x128xf32>
    %47 = vector.broadcast %46 : vector<1x128xf32> to vector<128x128xf32>
    %48 = arith.mulf %45, %47 : vector<128x128xf32>
    %49 = vector.extract_strided_slice %8 {offsets = [1, 0], sizes = [1, 128], strides = [1, 1]} : vector<4x128xf32> to vector<1x128xf32>
    %50 = vector.broadcast %49 : vector<1x128xf32> to vector<128x128xf32>
    %51 = arith.addf %48, %50 : vector<128x128xf32>
    %c1 = arith.constant 1 : index
    %52 = memref.load %arg2[%c1] : memref<6xf32, #tpu.memory_space<smem>>
    %cst_22 = arith.constant 0.000000e+00 : f32
    %53 = vector.broadcast %cst_22 : f32 to vector<128x128xf32>
    %54 = arith.cmpf oge, %51, %53 : vector<128x128xf32>
    %55 = vector.broadcast %52 : f32 to vector<128x128xf32>
    %56 = arith.mulf %55, %51 : vector<128x128xf32>
    %57 = arith.select %54, %51, %56 : vector<128x128xi1>, vector<128x128xf32>
    %58 = vector.extract_strided_slice %6 {offsets = [2, 2, 0], sizes = [8, 16, 128], strides = [1, 1, 1]} : vector<24x32x128xf32> to vector<8x16x128xf32>
    %59 = vector.shape_cast %58 : vector<8x16x128xf32> to vector<128x128xf32>
    %60 = vector.extract_strided_slice %6 {offsets = [2, 6, 0], sizes = [8, 16, 128], strides = [1, 1, 1]} : vector<24x32x128xf32> to vector<8x16x128xf32>
    %61 = vector.shape_cast %60 : vector<8x16x128xf32> to vector<128x128xf32>
    %62 = vector.extract_strided_slice %6 {offsets = [2, 10, 0], sizes = [8, 16, 128], strides = [1, 1, 1]} : vector<24x32x128xf32> to vector<8x16x128xf32>
    %63 = vector.shape_cast %62 : vector<8x16x128xf32> to vector<128x128xf32>
    %64 = vector.extract_strided_slice %6 {offsets = [6, 2, 0], sizes = [8, 16, 128], strides = [1, 1, 1]} : vector<24x32x128xf32> to vector<8x16x128xf32>
    %65 = vector.shape_cast %64 : vector<8x16x128xf32> to vector<128x128xf32>
    %66 = vector.extract_strided_slice %6 {offsets = [6, 6, 0], sizes = [8, 16, 128], strides = [1, 1, 1]} : vector<24x32x128xf32> to vector<8x16x128xf32>
    %67 = vector.shape_cast %66 : vector<8x16x128xf32> to vector<128x128xf32>
    %68 = vector.extract_strided_slice %6 {offsets = [6, 10, 0], sizes = [8, 16, 128], strides = [1, 1, 1]} : vector<24x32x128xf32> to vector<8x16x128xf32>
    %69 = vector.shape_cast %68 : vector<8x16x128xf32> to vector<128x128xf32>
    %70 = vector.extract_strided_slice %6 {offsets = [10, 2, 0], sizes = [8, 16, 128], strides = [1, 1, 1]} : vector<24x32x128xf32> to vector<8x16x128xf32>
    %71 = vector.shape_cast %70 : vector<8x16x128xf32> to vector<128x128xf32>
    %72 = vector.extract_strided_slice %6 {offsets = [10, 6, 0], sizes = [8, 16, 128], strides = [1, 1, 1]} : vector<24x32x128xf32> to vector<8x16x128xf32>
    %73 = vector.shape_cast %72 : vector<8x16x128xf32> to vector<128x128xf32>
    %74 = vector.extract_strided_slice %6 {offsets = [10, 10, 0], sizes = [8, 16, 128], strides = [1, 1, 1]} : vector<24x32x128xf32> to vector<8x16x128xf32>
    %75 = vector.shape_cast %74 : vector<8x16x128xf32> to vector<128x128xf32>
    %76 = tpu.concatenate %59, %61, %63, %65, %67, %69, %71, %73, %75 in 1 : vector<128x128xf32>, vector<128x128xf32>, vector<128x128xf32>, vector<128x128xf32>, vector<128x128xf32>, vector<128x128xf32>, vector<128x128xf32>, vector<128x128xf32>, vector<128x128xf32> -> vector<128x1152xf32>
    %c0_23 = arith.constant 0 : index
    %c0_24 = arith.constant 0 : index
    %77 = vector.load %arg8[%c0_23, %c0_24] : memref<1152x128xf32, #tpu.memory_space<vmem>>, vector<1152x128xf32>
    %cst_25 = arith.constant dense<0.000000e+00> : vector<128x128xf32>
    %78 = tpu.matmul %76, %77, %cst_25 {dimension_numbers = #tpu.dot_dimension_numbers<[1], [0], [0], [1], [0, 0, 1, 1], [], []>} : vector<128x1152xf32>, vector<1152x128xf32>, vector<128x128xf32> -> vector<128x128xf32>
    %79 = vector.extract_strided_slice %7 {offsets = [2, 0], sizes = [1, 128], strides = [1, 1]} : vector<4x128xf32> to vector<1x128xf32>
    %80 = vector.broadcast %79 : vector<1x128xf32> to vector<128x128xf32>
    %81 = arith.mulf %78, %80 : vector<128x128xf32>
    %82 = vector.extract_strided_slice %8 {offsets = [2, 0], sizes = [1, 128], strides = [1, 1]} : vector<4x128xf32> to vector<1x128xf32>
    %83 = vector.broadcast %82 : vector<1x128xf32> to vector<128x128xf32>
    %84 = arith.addf %81, %83 : vector<128x128xf32>
    %c2 = arith.constant 2 : index
    %85 = memref.load %arg2[%c2] : memref<6xf32, #tpu.memory_space<smem>>
    %cst_26 = arith.constant 0.000000e+00 : f32
    %86 = vector.broadcast %cst_26 : f32 to vector<128x128xf32>
    %87 = arith.cmpf oge, %84, %86 : vector<128x128xf32>
    %88 = vector.broadcast %85 : f32 to vector<128x128xf32>
    %89 = arith.mulf %88, %84 : vector<128x128xf32>
    %90 = arith.select %87, %84, %89 : vector<128x128xi1>, vector<128x128xf32>
    %91 = vector.extract_strided_slice %6 {offsets = [0, 0, 0], sizes = [8, 16, 128], strides = [1, 1, 1]} : vector<24x32x128xf32> to vector<8x16x128xf32>
    %92 = vector.shape_cast %91 : vector<8x16x128xf32> to vector<128x128xf32>
    %93 = vector.extract_strided_slice %6 {offsets = [0, 6, 0], sizes = [8, 16, 128], strides = [1, 1, 1]} : vector<24x32x128xf32> to vector<8x16x128xf32>
    %94 = vector.shape_cast %93 : vector<8x16x128xf32> to vector<128x128xf32>
    %95 = vector.extract_strided_slice %6 {offsets = [0, 12, 0], sizes = [8, 16, 128], strides = [1, 1, 1]} : vector<24x32x128xf32> to vector<8x16x128xf32>
    %96 = vector.shape_cast %95 : vector<8x16x128xf32> to vector<128x128xf32>
    %97 = vector.extract_strided_slice %6 {offsets = [6, 0, 0], sizes = [8, 16, 128], strides = [1, 1, 1]} : vector<24x32x128xf32> to vector<8x16x128xf32>
    %98 = vector.shape_cast %97 : vector<8x16x128xf32> to vector<128x128xf32>
    %99 = vector.extract_strided_slice %6 {offsets = [6, 6, 0], sizes = [8, 16, 128], strides = [1, 1, 1]} : vector<24x32x128xf32> to vector<8x16x128xf32>
    %100 = vector.shape_cast %99 : vector<8x16x128xf32> to vector<128x128xf32>
    %101 = vector.extract_strided_slice %6 {offsets = [6, 12, 0], sizes = [8, 16, 128], strides = [1, 1, 1]} : vector<24x32x128xf32> to vector<8x16x128xf32>
    %102 = vector.shape_cast %101 : vector<8x16x128xf32> to vector<128x128xf32>
    %103 = vector.extract_strided_slice %6 {offsets = [12, 0, 0], sizes = [8, 16, 128], strides = [1, 1, 1]} : vector<24x32x128xf32> to vector<8x16x128xf32>
    %104 = vector.shape_cast %103 : vector<8x16x128xf32> to vector<128x128xf32>
    %105 = vector.extract_strided_slice %6 {offsets = [12, 6, 0], sizes = [8, 16, 128], strides = [1, 1, 1]} : vector<24x32x128xf32> to vector<8x16x128xf32>
    %106 = vector.shape_cast %105 : vector<8x16x128xf32> to vector<128x128xf32>
    %107 = vector.extract_strided_slice %6 {offsets = [12, 12, 0], sizes = [8, 16, 128], strides = [1, 1, 1]} : vector<24x32x128xf32> to vector<8x16x128xf32>
    %108 = vector.shape_cast %107 : vector<8x16x128xf32> to vector<128x128xf32>
    %109 = tpu.concatenate %92, %94, %96, %98, %100, %102, %104, %106, %108 in 1 : vector<128x128xf32>, vector<128x128xf32>, vector<128x128xf32>, vector<128x128xf32>, vector<128x128xf32>, vector<128x128xf32>, vector<128x128xf32>, vector<128x128xf32>, vector<128x128xf32> -> vector<128x1152xf32>
    %c0_27 = arith.constant 0 : index
    %c0_28 = arith.constant 0 : index
    %110 = vector.load %arg9[%c0_27, %c0_28] : memref<1152x128xf32, #tpu.memory_space<vmem>>, vector<1152x128xf32>
    %cst_29 = arith.constant dense<0.000000e+00> : vector<128x128xf32>
    %111 = tpu.matmul %109, %110, %cst_29 {dimension_numbers = #tpu.dot_dimension_numbers<[1], [0], [0], [1], [0, 0, 1, 1], [], []>} : vector<128x1152xf32>, vector<1152x128xf32>, vector<128x128xf32> -> vector<128x128xf32>
    %112 = vector.extract_strided_slice %7 {offsets = [3, 0], sizes = [1, 128], strides = [1, 1]} : vector<4x128xf32> to vector<1x128xf32>
    %113 = vector.broadcast %112 : vector<1x128xf32> to vector<128x128xf32>
    %114 = arith.mulf %111, %113 : vector<128x128xf32>
    %115 = vector.extract_strided_slice %8 {offsets = [3, 0], sizes = [1, 128], strides = [1, 1]} : vector<4x128xf32> to vector<1x128xf32>
    %116 = vector.broadcast %115 : vector<1x128xf32> to vector<128x128xf32>
    %117 = arith.addf %114, %116 : vector<128x128xf32>
    %c3 = arith.constant 3 : index
    %118 = memref.load %arg2[%c3] : memref<6xf32, #tpu.memory_space<smem>>
    %cst_30 = arith.constant 0.000000e+00 : f32
    %119 = vector.broadcast %cst_30 : f32 to vector<128x128xf32>
    %120 = arith.cmpf oge, %117, %119 : vector<128x128xf32>
    %121 = vector.broadcast %118 : f32 to vector<128x128xf32>
    %122 = arith.mulf %121, %117 : vector<128x128xf32>
    %123 = arith.select %120, %117, %122 : vector<128x128xi1>, vector<128x128xf32>
    %124 = tpu.concatenate %24, %57, %90, %123 in 1 : vector<128x128xf32>, vector<128x128xf32>, vector<128x128xf32>, vector<128x128xf32> -> vector<128x512xf32>
    %c0_31 = arith.constant 0 : index
    %c0_32 = arith.constant 0 : index
    %125 = vector.load %arg10[%c0_31, %c0_32] : memref<512x128xf32, #tpu.memory_space<vmem>>, vector<512x128xf32>
    %cst_33 = arith.constant dense<0.000000e+00> : vector<128x128xf32>
    %126 = tpu.matmul %124, %125, %cst_33 {dimension_numbers = #tpu.dot_dimension_numbers<[1], [0], [0], [1], [0, 0, 1, 1], [], []>} : vector<128x512xf32>, vector<512x128xf32>, vector<128x128xf32> -> vector<128x128xf32>
    %c0_34 = arith.constant 0 : index
    %c0_35 = arith.constant 0 : index
    %127 = vector.load %arg13[%c0_34, %c0_35] : memref<1x128xf32, #tpu.memory_space<vmem>>, vector<1x128xf32>
    %128 = vector.broadcast %127 : vector<1x128xf32> to vector<128x128xf32>
    %129 = arith.mulf %126, %128 : vector<128x128xf32>
    %c0_36 = arith.constant 0 : index
    %c0_37 = arith.constant 0 : index
    %c0_38 = arith.constant 0 : index
    %130 = vector.load %arg14[%c0_36, %c0_37, %c0_38] : memref<1x1x128xf32, #tpu.memory_space<vmem>>, vector<1x1x128xf32>
    %131 = vector.shape_cast %130 : vector<1x1x128xf32> to vector<1x128xf32>
    %132 = vector.broadcast %131 : vector<1x128xf32> to vector<128x128xf32>
    %133 = arith.addf %129, %132 : vector<128x128xf32>
    %c5 = arith.constant 5 : index
    %134 = memref.load %arg2[%c5] : memref<6xf32, #tpu.memory_space<smem>>
    %cst_39 = arith.constant 0.000000e+00 : f32
    %135 = vector.broadcast %cst_39 : f32 to vector<128x128xf32>
    %136 = arith.cmpf oge, %133, %135 : vector<128x128xf32>
    %137 = vector.broadcast %134 : f32 to vector<128x128xf32>
    %138 = arith.mulf %137, %133 : vector<128x128xf32>
    %139 = arith.select %136, %133, %138 : vector<128x128xi1>, vector<128x128xf32>
    %140 = vector.shape_cast %139 : vector<128x128xf32> to vector<8x16x128xf32>
    %c0_40 = arith.constant 0 : index
    %c0_41 = arith.constant 0 : index
    %c0_42 = arith.constant 0 : index
    %c0_43 = arith.constant 0 : index
    %141 = vector.load %arg15[%c0_40, %c0_41, %c0_42, %c0_43] : memref<1x8x16x128xf32, #tpu.memory_space<vmem>>, vector<1x8x16x128xf32>
    %142 = vector.shape_cast %141 : vector<1x8x16x128xf32> to vector<8x16x128xf32>
    %143 = vector.shape_cast %140 : vector<8x16x128xf32> to vector<1x8x16x128xf32>
    tpu.vector_store %arg15[%c0_40, %c0_41, %c0_42, %c0_43], %143 {strides = array<i32>} : memref<1x8x16x128xf32, #tpu.memory_space<vmem>>, vector<1x8x16x128xf32>,
    return
  }
  func.func @transform_0(%arg0: i32, %arg1: i32) -> i32 {
    %c0_i32 = arith.constant 0 : i32
    %c0_i32_0 = arith.constant 0 : i32
    return %c0_i32 : i32
  }
  func.func @transform_1(%arg0: i32, %arg1: i32) -> (i32, i32, i32, i32) {
    %c0_i32 = arith.constant 0 : i32
    %0 = arith.addi %arg1, %c0_i32 : i32
    %c0_i32_0 = arith.constant 0 : i32
    %c0_i32_1 = arith.constant 0 : i32
    %c0_i32_2 = arith.constant 0 : i32
    return %arg0, %0, %c0_i32_0, %c0_i32_1 : i32, i32, i32, i32
  }
  func.func @transform_2(%arg0: i32, %arg1: i32) -> (i32, i32, i32, i32) {
    %c1_i32 = arith.constant 1 : i32
    %0 = arith.addi %arg1, %c1_i32 : i32
    %c0_i32 = arith.constant 0 : i32
    %c0_i32_0 = arith.constant 0 : i32
    %c0_i32_1 = arith.constant 0 : i32
    return %arg0, %0, %c0_i32, %c0_i32_0 : i32, i32, i32, i32
  }
  func.func @transform_3(%arg0: i32, %arg1: i32) -> (i32, i32, i32, i32) {
    %c2_i32 = arith.constant 2 : i32
    %0 = arith.addi %arg1, %c2_i32 : i32
    %c0_i32 = arith.constant 0 : i32
    %c0_i32_0 = arith.constant 0 : i32
    %c0_i32_1 = arith.constant 0 : i32
    return %arg0, %0, %c0_i32, %c0_i32_0 : i32, i32, i32, i32
  }
  func.func @transform_4(%arg0: i32, %arg1: i32) -> (i32, i32) {
    %c0_i32 = arith.constant 0 : i32
    %c0_i32_0 = arith.constant 0 : i32
    %c0_i32_1 = arith.constant 0 : i32
    return %c0_i32, %c0_i32_0 : i32, i32
  }
  func.func @transform_5(%arg0: i32, %arg1: i32) -> (i32, i32) {
    %c0_i32 = arith.constant 0 : i32
    %c0_i32_0 = arith.constant 0 : i32
    %c0_i32_1 = arith.constant 0 : i32
    return %c0_i32, %c0_i32_0 : i32, i32
  }
  func.func @transform_6(%arg0: i32, %arg1: i32) -> (i32, i32) {
    %c0_i32 = arith.constant 0 : i32
    %c0_i32_0 = arith.constant 0 : i32
    %c0_i32_1 = arith.constant 0 : i32
    return %c0_i32, %c0_i32_0 : i32, i32
  }
  func.func @transform_7(%arg0: i32, %arg1: i32) -> (i32, i32) {
    %c0_i32 = arith.constant 0 : i32
    %c0_i32_0 = arith.constant 0 : i32
    %c0_i32_1 = arith.constant 0 : i32
    return %c0_i32, %c0_i32_0 : i32, i32
  }
  func.func @transform_8(%arg0: i32, %arg1: i32) -> (i32, i32) {
    %c0_i32 = arith.constant 0 : i32
    %c0_i32_0 = arith.constant 0 : i32
    %c0_i32_1 = arith.constant 0 : i32
    return %c0_i32, %c0_i32_0 : i32, i32
  }
  func.func @transform_9(%arg0: i32, %arg1: i32) -> (i32, i32) {
    %c0_i32 = arith.constant 0 : i32
    %c0_i32_0 = arith.constant 0 : i32
    %c0_i32_1 = arith.constant 0 : i32
    return %c0_i32, %c0_i32_0 : i32, i32
  }
  func.func @transform_10(%arg0: i32, %arg1: i32) -> (i32, i32) {
    %c0_i32 = arith.constant 0 : i32
    %c0_i32_0 = arith.constant 0 : i32
    %c0_i32_1 = arith.constant 0 : i32
    return %c0_i32, %c0_i32_0 : i32, i32
  }
  func.func @transform_11(%arg0: i32, %arg1: i32) -> (i32, i32) {
    %c0_i32 = arith.constant 0 : i32
    %c0_i32_0 = arith.constant 0 : i32
    %c0_i32_1 = arith.constant 0 : i32
    return %c0_i32, %c0_i32_0 : i32, i32
  }
  func.func @transform_12(%arg0: i32, %arg1: i32) -> (i32, i32, i32) {
    %c0_i32 = arith.constant 0 : i32
    %c0_i32_0 = arith.constant 0 : i32
    %c0_i32_1 = arith.constant 0 : i32
    return %arg0, %c0_i32, %c0_i32_0 : i32, i32, i32
  }
  func.func @transform_13(%arg0: i32, %arg1: i32) -> (i32, i32, i32, i32) {
    %c0_i32 = arith.constant 0 : i32
    %c0_i32_0 = arith.constant 0 : i32
    %c0_i32_1 = arith.constant 0 : i32
    return %arg0, %arg1, %c0_i32, %c0_i32_0 : i32, i32, i32, i32
  }
}

</mosaic_0001>

<bundles_post_ra>
// kernel: aspp_forward.1
= control target key start
LH: loop header
LB: loop body
LE: loop exit
PB: predicated region body
PF: predicated region fallthrough
CT: control target
= control target key end

     0   :  { %s11219_s0 = inlined_call_operand.vmem [shape: f32[6], index: 0, kind: input, shape index: {}]   ;;  %s11220_s1 = inlined_call_operand.vmem [shape: f32[2,32,32,128], index: 1, kind: input, shape index: {}, may-alias: {1,2,3}]   ;;  %s11221_s2 = inlined_call_operand.vmem [shape: f32[2,32,32,128], index: 2, kind: input, shape index: {}, may-alias: {1,2,3}]   ;;  %s11222_s3 = inlined_call_operand.vmem [shape: f32[2,32,32,128], index: 3, kind: input, shape index: {}, may-alias: {1,2,3}]   ;;  %s11223_s4 = inlined_call_operand.vmem [shape: f32[128,128], index: 4, kind: input, shape index: {}]   ;;  %s11224_s5 = inlined_call_operand.vmem [shape: f32[1152,128], index: 5, kind: input, shape index: {}]   ;;  %s11225_s6 = inlined_call_operand.vmem [shape: f32[1152,128], index: 6, kind: input, shape index: {}]   ;;  %s11226_s7 = inlined_call_operand.vmem [shape: f32[1152,128], index: 7, kind: input, shape index: {}]   ;;  %s11227_s8 = inlined_call_operand.vmem [shape: f32[512,128], index: 8, kind: input, shape index: {}]   ;;  %s11228_s9 = inlined_call_operand.vmem [shape: f32[4,128], index: 9, kind: input, shape index: {}]   ;;  %s11229_s10 = inlined_call_operand.vmem [shape: f32[4,128], index: 10, kind: input, shape index: {}]   ;;  %s11230_s11 = inlined_call_operand.vmem [shape: f32[1,128], index: 11, kind: input, shape index: {}]   ;;  %s11231_s12 = inlined_call_operand.vmem [shape: f32[2,1,128], index: 12, kind: input, shape index: {}]   ;;  %s11232_s13 = inlined_call_operand.vmem [shape: f32[2,16,16,128], index: 13, kind: output, shape index: {}]  }
   0x1   :  { %11324 = sst [smem:[#allocation77_spill]] %s11219_s0 }
   0x2   :  { %18 = vsyncpa [#allocation3], 0  ;;  %s7356_s25 = smov 0   ;;  %s7358_s26 = smov 0  }
   0x3   :  { %s7360_s27 = smov 0   ;;  %s7362_s28 = smov 0  }
   0x4   :  { %s7364_s29 = smov 0  }
   0x5 LB: > { %11325 = sst [smem:[#allocation5_spill]] %s7279_s28  ;;  %s5002_s30 = sadd.s32 4294967295, %s7283_s29   ;;  %s7283_s29 = sphi %s7364_s29, %s24_s29   ;;  %s7279_s28 = sphi %s7362_s28, %s11509_s28   ;;  %s7275_s27 = sphi %s7360_s27, %s11511_s27   ;;  %s7271_s26 = sphi %s7358_s26, %s11507_s26   ;;  %s7267_s25 = sphi %s7356_s25, %s11510_s25  }
   0x6   : > { %s33_s14 = sadd.s32 1, %s7275_s27  ;;  %s36_s15 = sadd.s32 1, %s7279_s28 }
   0x7   : > { %p34_p0 = scmp.ge.s32.totalorder %s33_s14, 2  ;;  %p5004_p1 = scmp.ge.s32.totalorder %s7283_s29, 1 }
   0x8   : > { %p372_p2 = scmp.lt.s32.totalorder %s7283_s29, 5  ;;  %p7393_p5 = scmp.eq.s32.totalorder %s5002_s30, 0 }
   0x9   : > { %s11513_s14 = smov (%p34_p0, %s33_s14), 0  ;;  %s11515_s15 = smov (!%p34_p0, %s36_s15), %s7279_s28 }
   0xa   : > { %11326 = sst [smem:[#allocation6_spill]] %s11513_s14  ;;  %p7389_p3 = pnand %p5004_p1, %p372_p2 }
   0xb   : > { %p38_p4 = scmp.ge.s32.totalorder %s11515_s15, 2  ;;  %s11329_s0 = sld [smem:[#allocation77_spill]] }
   0xc   : > { %p7089_p6 = pneg %p7389_p3 }
   0xd   : > { %s11517_s15 = smov (%p38_p4, %s11515_s15), 0 }
   0xe   : > { %11330 = sst [smem:[#allocation7_spill]] %s11517_s15  ;;  %p7090_p7 = pnand %p7393_p5, %p7089_p6 }
  0x10   : > { %p7228_p9 = pneg %p7090_p7 }
  0x11   : > { %s385_s20 = sshll.u32 %s11329_s0, 4  ;;  %s386_s20 = int_to_ptr.vmem [resolvable:$true] %s385_s20 }
  0x12   : > { %s7226_s21 = scalar_lea.vmem %s386_s20, 16  ;;  %p7234_p12 = scmp.lt.s32.totalorder %s386_s20, %s386_s20 }
  0x13   : > { %p7227_p8 = scmp.ne.s32.totalorder %s386_s20, %s7226_s21  ;;  %p7235_p13 = scmp.lt.s32.totalorder %s7226_s21, %s7226_s21 }
  0x15   : > { %p7229_p10 = pnand %p7228_p9, %p7227_p8  ;;  %p7236_p0 = por %p7235_p13, %p7234_p12 }
  0x17   : > { %p7230_p11 = pneg %p7229_p10 }
  0x19   : > { %p7237_p1 = pnand %p7236_p0, %p7230_p11 }
  0x1b   : > { %7240 = shalt.err (!%p7237_p1)
}
  0x1c   : > { %s7285_s22 = smov [#allocation2]   ;;  %474 = sbr.rel (%p7389_p3) target bundleno = 998 (0x3e6), region = 72 }
  0x1d   : > { %7092 = dma.vmem_to_smem (!%p7090_p7), %s386_s20, 16, %s7285_s22, [#allocation3]  }
  0x23   : > { %7262 = dma.done.wait (%p7393_p5), [#allocation3], 16  }
  0x24   : > { %7264 = vsyncadd (%p7393_p5), [#allocation3], 4294967280 }
  0x25   : > { %480 = sfence }
  0x26   : > { %v768_v0 = vld [vmem:[%s11223_s4] sm:$0xff]  ;;  %v769_v1 = vld [vmem:[%s11223_s4 + $0x8] sm:$0xff]  ;;  %s7422_s20 = sshll.u32 %s7267_s25, 3  ;;  %p555_p2 = scmp.lt.s32.totalorder %s7271_s26, 1  ;;  %v770_v9 = vld [vmem:[%s11223_s4 + $0x10] sm:$0xff]  ;;  %vm711_vm0 = vcmask 1041408  }
  0x27   : > { %v1160_v2 = vld [vmem:[%s11224_s5 + $0x80] sm:$0xff]  ;;  %v6509_v3 = vpack.c.bf16 %v769_v1, %v768_v0  ;;  %v1161_v4 = vld [vmem:[%s11224_s5 + $0x88] sm:$0xff]  ;;  %p557_p3 = scmp.lt.s32.totalorder %s7422_s20, 31  ;;  %v771_v10 = vld [vmem:[%s11223_s4 + $0x18] sm:$0xff]  ;;  %s5034_s28 = sadd.s32 8, %s7422_s20  ;;  %vm1025_vm1 = vcmask 1043456  }
  0x28   : > { %v1144_v5 = vld [vmem:[%s11224_s5] sm:$0xff]  ;;  %v1145_v6 = vld [vmem:[%s11224_s5 + $0x8] sm:$0xff]  ;;  %v6541_v7 = vpack.c.bf16 %v1161_v4, %v1160_v2  ;;  %v1162_v11 = vld [vmem:[%s11224_s5 + $0x90] sm:$0xff]  ;;  %s11519_s26 = smov (!%p555_p2, %s7271_s26), 1  ;;  %v6513_v12 = vpack.c.bf16 %v771_v10, %v770_v9  ;;  %p7504_p4 = scmp.lt.s32.totalorder %s5034_s28, 31  ;;  %vm2109_vm2 = vcmask 1045504  }
  0x29   : > { %v6543_v8 = vpack.c.bf16 %v1145_v6, %v1144_v5  ;;  %6510 = vmatprep.subr.bf16.mxu0 %v6509_v3  ;;  %v1163_v13 = vld [vmem:[%s11224_s5 + $0x98] sm:$0xff]  ;;  %v1146_v14 = vld [vmem:[%s11224_s5 + $0x10] sm:$0xff]  ;;  %s558_s16 = scalar_select %p557_p3, %s7422_s20, 31  ;;  %v772_v17 = vld [vmem:[%s11223_s4 + $0x20] sm:$0xff] }
  0x2a   : > { %v1147_v15 = vld [vmem:[%s11224_s5 + $0x18] sm:$0xff]  ;;  %6542 = vmatprep.subr.bf16.mxu1 %v6541_v7  ;;  %6512 = vmatpush3.bf16.msra.mxu0 %v6509_v3  ;;  %v6545_v16 = vpack.c.bf16 %v1163_v13, %v1162_v11  ;;  %v773_v18 = vld [vmem:[%s11223_s4 + $0x28] sm:$0xff]  ;;  %v1164_v19 = vld [vmem:[%s11224_s5 + $0xa0] sm:$0xff]  ;;  %s7467_s24 = sshll.u32 %s11519_s26, 7  ;;  %s11521_s28 = smov (!%p7504_p4, %s5034_s28), 31 }
  0x2b   : > { %6544 = vmatpush3.bf16.msra.mxu1 %v6543_v8  ;;  %6514 = vmatprep.subr.bf16.mxu0 %v6513_v12  ;;  %v6547_v20 = vpack.c.bf16 %v1147_v15, %v1146_v14  ;;  %v6517_v21 = vpack.c.bf16 %v773_v18, %v772_v17  ;;  %v1165_v22 = vld [vmem:[%s11224_s5 + $0xa8] sm:$0xff]  ;;  %v1148_v23 = vld [vmem:[%s11224_s5 + $0x20] sm:$0xff]  ;;  %s5010_s0 = sshll.u32 %s558_s16, 2  ;;  %v774_v26 = vld [vmem:[%s11223_s4 + $0x30] sm:$0xff]  ;;  %s5036_s21 = sadd.s32 16, %s7422_s20 }
  0x2c   : > { %6546 = vmatprep.subr.bf16.mxu1 %v6545_v16  ;;  %v6549_v24 = vpack.c.bf16 %v1165_v22, %v1164_v19  ;;  %v1149_v25 = vld [vmem:[%s11224_s5 + $0x28] sm:$0xff]  ;;  %v775_v27 = vld [vmem:[%s11223_s4 + $0x38] sm:$0xff]  ;;  %v1166_v28 = vld [vmem:[%s11224_s5 + $0xb0] sm:$0xff]  ;;  %s561_s19 = sadd.s32 %s7467_s24, %s5010_s0  ;;  %p9243_p5 = scmp.lt.s32.totalorder %s5036_s21, 31 }
  0x2d   : > { %v1167_v29 = vld [vmem:[%s11224_s5 + $0xb8] sm:$0xff]  ;;  %v6551_v30 = vpack.c.bf16 %v1149_v25, %v1148_v23  ;;  %v6521_v31 = vpack.c.bf16 %v775_v27, %v774_v26  ;;  %v1150_v32 = vld [vmem:[%s11224_s5 + $0x30] sm:$0xff]  ;;  %v776_v35 = vld [vmem:[%s11223_s4 + $0x40] sm:$0xff]  ;;  %s5012_s25 = sshll.u32 %s561_s19, 3  ;;  %s10408_s0 = sld [smem:[#allocation2]] }
  0x2e   : > { %6516 = vmatpush3.bf16.msra.mxu0 %v6513_v12  ;;  %v6553_v33 = vpack.c.bf16 %v1167_v29, %v1166_v28  ;;  %v1151_v34 = vld [vmem:[%s11224_s5 + $0x38] sm:$0xff]  ;;  %v777_v36 = vld [vmem:[%s11223_s4 + $0x48] sm:$0xff]  ;;  %v1168_v37 = vld [vmem:[%s11224_s5 + $0xc0] sm:$0xff]  ;;  %s7523_s16 = scalar_lea.vmem %s11220_s1, %s5012_s25  ;;  %s5014_s25 = sshll.u32 %s11521_s28, 2 }
  0x2f   : > { %6548 = vmatpush3.bf16.msra.mxu1 %v6547_v20  ;;  %6518 = vmatprep.subr.bf16.mxu0 %v6517_v21  ;;  %v1169_v38 = vld [vmem:[%s11224_s5 + $0xc8] sm:$0xff]  ;;  %v6555_v39 = vpack.c.bf16 %v1151_v34, %v1150_v32  ;;  %v6525_v40 = vpack.c.bf16 %v777_v36, %v776_v35  ;;  %v1152_v41 = vld [vmem:[%s11224_s5 + $0x40] sm:$0xff]  ;;  %v778_v44 = vld [vmem:[%s11223_s4 + $0x50] sm:$0xff]  ;;  %s573_s17 = sadd.s32 %s5014_s25, %s7467_s24  ;;  %s11523_s21 = smov (!%p9243_p5, %s5036_s21), 31 }
  0x30   : > { %6550 = vmatprep.subr.bf16.mxu1 %v6549_v24  ;;  %v1153_v42 = vld [vmem:[%s11224_s5 + $0x48] sm:$0xff]  ;;  %v6557_v43 = vpack.c.bf16 %v1169_v38, %v1168_v37  ;;  %v779_v45 = vld [vmem:[%s11223_s4 + $0x58] sm:$0xff]  ;;  %v1170_v46 = vld [vmem:[%s11224_s5 + $0xd0] sm:$0xff]  ;;  %s5016_s30 = sshll.u32 %s573_s17, 3  ;;  %s5027_s25 = sld [smem:[#allocation2 + $0x3]] }
  0x31   : > { %v1171_v47 = vld [vmem:[%s11224_s5 + $0xd8] sm:$0xff]  ;;  %v6559_v48 = vpack.c.bf16 %v1153_v42, %v1152_v41  ;;  %v7542_v49 = vld [vmem:[%s7523_s16 + $0xc0] sm:$0xff]  ;;  %v7545_v50 = vld [vmem:[%s7523_s16 + $0xc8] sm:$0xff]  ;;  %v6529_v52 = vpack.c.bf16 %v779_v45, %v778_v44  ;;  %s7637_s19 = scalar_lea.vmem %s11221_s2, %s5016_s30  ;;  %s5018_s30 = sshll.u32 %s11523_s21, 2 }
  0x32   : > { %6520 = vmatpush3.bf16.msra.mxu0 %v6517_v21  ;;  %v7548_v51 = vld [vmem:[%s7523_s16 + $0x80] sm:$0xff]  ;;  %v1154_v53 = vld [vmem:[%s11224_s5 + $0x50] sm:$0xff]  ;;  %v712_v54 = vrot.slane %v7542_v49, 6  ;;  %v713_v55 = vrot.slane %v7545_v50, 6  ;;  %v7556_v56 = vld [vmem:[%s7523_s16 + $0x88] sm:$0xff]  ;;  %v6561_v58 = vpack.c.bf16 %v1171_v47, %v1170_v46  ;;  %s9329_s22 = sadd.s32 %s5018_s30, %s7467_s24  ;;  %s10391_s30 = sld [smem:[#allocation2 + $0x1]] }
  0x33   : > { %6552 = vmatpush3.bf16.msra.mxu1 %v6551_v30  ;;  %6522 = vmatprep.subr.bf16.mxu0 %v6521_v31  ;;  %v1082_v57 = vrot.slane %v7548_v51, 6  ;;  %v1155_v59 = vld [vmem:[%s11224_s5 + $0x58] sm:$0xff]  ;;  %v780_v60 = vld [vmem:[%s11223_s4 + $0x60] sm:$0xff]  ;;  %v781_v61 = vld [vmem:[%s11223_s4 + $0x68] sm:$0xff]  ;;  %v1083_v62 = vrot.slane %v7556_v56, 6  ;;  %v1026_v29 = vrot.slane %v7548_v51, 4  ;;  %s593_s15 = scalar_lea.vmem %s11231_s12, %s11519_s26 }
  0x34   : > { %6554 = vmatprep.subr.bf16.mxu1 %v6553_v33  ;;  %v1172_v63 = vld [vmem:[%s11224_s5 + $0xe0] sm:$0xff]  ;;  %v1173_v0 = vld [vmem:[%s11224_s5 + $0xe8] sm:$0xff]  ;;  %v7579_v1 = vsel %vm711_vm0, %v712_v54, %v713_v55  ;;  %v6563_v3 = vpack.c.bf16 %v1155_v59, %v1154_v53  ;;  %v6533_v4 = vpack.c.bf16 %v781_v61, %v780_v60  ;;  %v782_v8 = vld [vmem:[%s11223_s4 + $0x70] sm:$0xff]  ;;  %v1027_v30 = vrot.slane %v7556_v56, 4  ;;  %s5020_s24 = sshll.u32 %s9329_s22, 3  ;;  %p597_p6 = scmp.lt.s32.totalorder %s7422_s20, 15 }
  0x35   : > { %11332 = vst [vmem:[#allocation8_spill] sm:$0xff] %v7579_v1  ;;  %6317 = vmatprep.mubr.f32.mxu0 %v7579_v1  ;;  %v7585_v2 = vsel %vm711_vm0, %v1082_v57, %v1083_v62  ;;  %v1156_v5 = vld [vmem:[%s11224_s5 + $0x60] sm:$0xff]  ;;  %v6565_v6 = vpack.c.bf16 %v1173_v0, %v1172_v63  ;;  %v1157_v7 = vld [vmem:[%s11224_s5 + $0x68] sm:$0xff]  ;;  %v783_v9 = vld [vmem:[%s11223_s4 + $0x78] sm:$0xff]  ;;  %s9362_s23 = scalar_lea.vmem %s11222_s3, %s5020_s24  ;;  %s5023_s28 = sshll.u32 %s11519_s26, 5 }
  0x36   : > { %6524 = vmatpush3.bf16.msra.mxu0 %v6521_v31  ;;  %11333 = vst [vmem:[#allocation9_spill] sm:$0xff] %v7585_v2  ;;  %1352 = vmatprep.mubr.f32.mxu1 %v7585_v2  ;;  %v1174_v10 = vld [vmem:[%s11224_s5 + $0xf0] sm:$0xff]  ;;  %v1175_v11 = vld [vmem:[%s11224_s5 + $0xf8] sm:$0xff]  ;;  %v6567_v12 = vpack.c.bf16 %v1157_v7, %v1156_v5  ;;  %v6537_v13 = vpack.c.bf16 %v783_v9, %v782_v8  ;;  %v1192_v18 = vld [vmem:[%s11224_s5 + $0x180] sm:$0xff]  ;;  %s11525_s20 = smov (!%p597_p6, %s7422_s20), 15 }
  0x37   : > { %6556 = vmatpush3.bf16.msra.mxu1 %v6555_v39  ;;  %6526 = vmatprep.subr.bf16.mxu0 %v6525_v40  ;;  %v1158_v14 = vld [vmem:[%s11224_s5 + $0x70] sm:$0xff]  ;;  %v1159_v15 = vld [vmem:[%s11224_s5 + $0x78] sm:$0xff]  ;;  %v6569_v17 = vpack.c.bf16 %v1175_v11, %v1174_v10  ;;  %v1193_v19 = vld [vmem:[%s11224_s5 + $0x188] sm:$0xff]  ;;  %v1028_v54 = vsel %vm1025_vm1, %v1026_v29, %v1027_v30  ;;  %s5022_s21 = sshll.u32 %s11525_s20, 1 }
  0x38   : > { %6558 = vmatprep.subr.bf16.mxu1 %v6557_v43  ;;  %v7614_v16 = vld [vmem:[%s7523_s16 + $0xd0] sm:$0xff]  ;;  %v1224_v20 = vld [vmem:[%s11224_s5 + $0x280] sm:$0xff]  ;;  %v1225_v21 = vld [vmem:[%s11224_s5 + $0x288] sm:$0xff]  ;;  %v6571_v28 = vpack.c.bf16 %v1159_v15, %v1158_v14  ;;  %v6573_v31 = vpack.c.bf16 %v1193_v19, %v1192_v18 }
  0x39   : > { %11334 = vst [vmem:[#allocation10_spill] sm:$0xff] %v7614_v16  ;;  %v7629_v22 = vld [vmem:[%s7523_s16 + $0xe0] sm:$0xff]  ;;  %v7632_v23 = vld [vmem:[%s7523_s16 + $0xe8] sm:$0xff]  ;;  %v715_v24 = vrot.slane %v7614_v16, 6  ;;  %v7644_v26 = vld [vmem:[%s7523_s16 + $0x90] sm:$0xff]  ;;  %v6605_v35 = vpack.c.bf16 %v1225_v21, %v1224_v20 }
  0x3a   : > { %6528 = vmatpush3.bf16.msra.mxu0 %v6525_v40  ;;  %v1176_v25 = vld [vmem:[%s11224_s5 + $0x100] sm:$0xff]  ;;  %11335 = vst [vmem:[#allocation11_spill] sm:$0xff] %v7644_v26  ;;  %v7647_v27 = vld [vmem:[%s7523_s16 + $0xf0] sm:$0xff]  ;;  %v1177_v32 = vld [vmem:[%s11224_s5 + $0x108] sm:$0xff]  ;;  %v717_v36 = vrot.slane %v7629_v22, 6  ;;  %v718_v37 = vrot.slane %v7632_v23, 6 }
  0x3b   : > { %6560 = vmatpush3.bf16.msra.mxu1 %v6559_v48  ;;  %6530 = vmatprep.subr.bf16.mxu0 %v6529_v52  ;;  %11336 = vst [vmem:[#allocation12_spill] sm:$0xff] %v7647_v27  ;;  %v1208_v33 = vld [vmem:[%s11224_s5 + $0x200] sm:$0xff]  ;;  %v1209_v34 = vld [vmem:[%s11224_s5 + $0x208] sm:$0xff]  ;;  %v1194_v38 = vld [vmem:[%s11224_s5 + $0x190] sm:$0xff]  ;;  %v1085_v41 = vrot.slane %v7644_v26, 6  ;;  %v720_v42 = vrot.slane %v7647_v27, 6  ;;  %v7685_v46 = vsel %vm711_vm0, %v713_v55, %v715_v24  ;;  %v6575_v47 = vpack.c.bf16 %v1177_v32, %v1176_v25 }
  0x3c   : > { %6562 = vmatprep.subr.bf16.mxu1 %v6561_v58  ;;  %v7666_v39 = vld [vmem:[%s7637_s19] sm:$0xff]  ;;  %v7669_v40 = vld [vmem:[%s7637_s19 + $0x8] sm:$0xff]  ;;  %v1195_v43 = vld [vmem:[%s11224_s5 + $0x198] sm:$0xff]  ;;  %11337 = vst [vmem:[#allocation13_spill] sm:$0xff] %v7685_v46  ;;  %v11235_v48 = vrot.slane %v7644_v26, 4  ;;  %v6607_v55 = vpack.c.bf16 %v1209_v34, %v1208_v33  ;;  %v7712_v63 = vsel %vm711_vm0, %v717_v36, %v718_v37 }
  0x3d   : > { %v7677_v44 = vld [vmem:[%s7523_s16 + $0xa0] sm:$0xff]  ;;  %v7680_v45 = vld [vmem:[%s7523_s16 + $0xa8] sm:$0xff]  ;;  %v1178_v51 = vld [vmem:[%s11224_s5 + $0x110] sm:$0xff]  ;;  %v722_v58 = vrot.slane %v7666_v39, 6  ;;  %v723_v59 = vrot.slane %v7669_v40, 6  ;;  %11339 = vst [vmem:[#allocation15_spill] sm:$0xff] %v7712_v63  ;;  %v6577_v0 = vpack.c.bf16 %v1195_v43, %v1194_v38  ;;  %v7729_v8 = vsel %vm711_vm0, %v1083_v62, %v1085_v41 }
  0x3e   : > { %6532 = vmatpush3.bf16.msra.mxu0 %v6529_v52  ;;  %v1226_v52 = vld [vmem:[%s11224_s5 + $0x290] sm:$0xff]  ;;  %v1227_v53 = vld [vmem:[%s11224_s5 + $0x298] sm:$0xff]  ;;  %v7709_v61 = vld [vmem:[%s11224_s5 + $0x1a0] sm:$0xff]  ;;  %11340 = vst [vmem:[#allocation16_spill] sm:$0xff] %v7729_v8  ;;  %v7732_v9 = vsel %vm711_vm0, %v718_v37, %v720_v42  ;;  %v7746_v62 = vsel %vm1025_vm1, %v1027_v30, %v11235_v48  ;;  %v1032_v21 = vrot.slane %v7680_v45, 4 }
  0x3f   : > { %6564 = vmatpush3.bf16.msra.mxu1 %v6563_v3  ;;  %6534 = vmatprep.subr.bf16.mxu0 %v6533_v4  ;;  %v1179_v57 = vld [vmem:[%s11224_s5 + $0x118] sm:$0xff]  ;;  %v7704_v60 = vld [vmem:[%s7637_s19 + $0x10] sm:$0xff]  ;;  %v1087_v3 = vrot.slane %v7677_v44, 6  ;;  %v1197_v5 = vld [vmem:[%s11224_s5 + $0x1a8] sm:$0xff]  ;;  %11341 = vst [vmem:[#allocation17_spill] sm:$0xff] %v7732_v9  ;;  %v6609_v10 = vpack.c.bf16 %v1227_v53, %v1226_v52  ;;  %v7758_v20 = vsel %vm711_vm0, %v722_v58, %v723_v59 }
  0x40   : > { %6566 = vmatprep.subr.bf16.mxu1 %v6565_v6  ;;  %11338 = vst [vmem:[#allocation14_spill] sm:$0xff] %v7704_v60  ;;  %v7720_v6 = vld [vmem:[%s7637_s19 + $0x20] sm:$0xff]  ;;  %v7723_v7 = vld [vmem:[%s7637_s19 + $0x28] sm:$0xff]  ;;  %v1210_v11 = vld [vmem:[%s11224_s5 + $0x210] sm:$0xff]  ;;  %v6579_v14 = vpack.c.bf16 %v1179_v57, %v1178_v51  ;;  %v725_v15 = vrot.slane %v7704_v60, 6  ;;  %v6581_v32 = vpack.c.bf16 %v1197_v5, %v7709_v61 }
  0x41   : > { %11343 = vst [vmem:[#allocation19_spill] sm:$0xff] %v7746_v62  ;;  %v1228_v18 = vld [vmem:[%s11224_s5 + $0x2a0] sm:$0xff]  ;;  %v1229_v19 = vld [vmem:[%s11224_s5 + $0x2a8] sm:$0xff]  ;;  %11344 = vst [vmem:[#allocation20_spill] sm:$0xff] %v7758_v20  ;;  %v728_v29 = vrot.slane %v7723_v7, 6 }
  0x42   : > { %6536 = vmatpush3.bf16.msra.mxu0 %v6533_v4  ;;  %v1088_v4 = vrot.slane %v7680_v45, 6  ;;  %v1180_v24 = vld [vmem:[%s11224_s5 + $0x120] sm:$0xff]  ;;  %v1181_v25 = vld [vmem:[%s11224_s5 + $0x128] sm:$0xff]  ;;  %v7770_v30 = vld [vmem:[%s7637_s19 + $0x30] sm:$0xff]  ;;  %v6613_v41 = vpack.c.bf16 %v1229_v19, %v1228_v18 }
  0x43   : > { %6568 = vmatpush3.bf16.msra.mxu1 %v6567_v12  ;;  %6538 = vmatprep.subr.bf16.mxu0 %v6537_v13  ;;  %v1211_v12 = vld [vmem:[%s11224_s5 + $0x218] sm:$0xff]  ;;  %11345 = vst [vmem:[#allocation21_spill] sm:$0xff] %v7770_v30  ;;  %v7785_v37 = vld [vmem:[%s7637_s19 + $0x40] sm:$0xff]  ;;  %v7789_v38 = vld [vmem:[%s7637_s19 + $0x48] sm:$0xff]  ;;  %v730_v51 = vrot.slane %v7770_v30, 6 }
  0x44   : > { %6570 = vmatprep.subr.bf16.mxu1 %v6569_v17  ;;  %v1031_v17 = vrot.slane %v7677_v44, 4  ;;  %v6611_v33 = vpack.c.bf16 %v1211_v12, %v1210_v11  ;;  %v1199_v36 = vld [vmem:[%s11224_s5 + $0x1b8] sm:$0xff]  ;;  %v1212_v42 = vld [vmem:[%s11224_s5 + $0x220] sm:$0xff]  ;;  %v1213_v43 = vld [vmem:[%s11224_s5 + $0x228] sm:$0xff]  ;;  %v7799_v44 = vsel %vm711_vm0, %v723_v59, %v725_v15  ;;  %v732_v5 = vrot.slane %v7785_v37, 6 }
  0x45   : > { %11347 = vst [vmem:[#allocation23_spill] sm:$0xff] %v7799_v44  ;;  %v1230_v52 = vld [vmem:[%s11224_s5 + $0x2b0] sm:$0xff]  ;;  %v1231_v53 = vld [vmem:[%s11224_s5 + $0x2b8] sm:$0xff]  ;;  %v1200_v11 = vld [vmem:[%s11224_s5 + $0x1c0] sm:$0xff] }
  0x46   : > { %6540 = vmatpush3.bf16.msra.mxu0 %v6537_v13  ;;  %v7741_v13 = vld [vmem:[%s7523_s16 + $0xb0] sm:$0xff]  ;;  %v1183_v61 = vld [vmem:[%s11224_s5 + $0x138] sm:$0xff]  ;;  %v1201_v12 = vld [vmem:[%s11224_s5 + $0x1c8] sm:$0xff] }
  0x47   : > { %6572 = vmatpush3.bf16.msra.mxu1 %v6571_v28  ;;  %6574 = vmatprep.subr.bf16.mxu0 %v6573_v31  ;;  %11342 = vst [vmem:[#allocation18_spill] sm:$0xff] %v7741_v13  ;;  %v727_v28 = vrot.slane %v7720_v6, 6  ;;  %v7774_v31 = vsel %vm711_vm0, %v1087_v3, %v1088_v4  ;;  %v1090_v34 = vrot.slane %v7741_v13, 6  ;;  %v11234_v57 = vrot.slane %v7741_v13, 4  ;;  %v1182_v59 = vld [vmem:[%s11224_s5 + $0x130] sm:$0xff]  ;;  %v7836_v15 = vld [vmem:[%s7637_s19 + $0x60] sm:$0xff] }
  0x48   : > { %6606 = vmatprep.subr.bf16.mxu1 %v6605_v35  ;;  %11346 = vst [vmem:[#allocation22_spill] sm:$0xff] %v7774_v31  ;;  %v1198_v35 = vld [vmem:[%s11224_s5 + $0x1b0] sm:$0xff]  ;;  %v1215_v19 = vld [vmem:[%s11224_s5 + $0x238] sm:$0xff] }
  0x49   : > { %6318 = vmatmul.mubr.f32.vlgmr.msra.gmra.mrb[0].mxu0 %v7685_v46  ;;  %v6585_v58 = vpack.c.bf16 %v1199_v36, %v1198_v35  ;;  %v7825_v3 = vsel %vm711_vm0, %v1088_v4, %v1090_v34  ;;  %v7840_v4 = vld [vmem:[%s7637_s19 + $0x68] sm:$0xff]  ;;  %v1214_v18 = vld [vmem:[%s11224_s5 + $0x230] sm:$0xff]  ;;  %v1036_v34 = vrot.slane %v7542_v49, 4  ;;  %v1037_v35 = vrot.slane %v7545_v50, 4 }
  0x4a   : > { %1353 = vmatmul.mubr.f32.vlgmr.msra.gmra.mrb[0].mxu1 %v1028_v54  ;;  %6576 = vmatpush3.bf16.msra.mxu0 %v6575_v47  ;;  %v6583_v47 = vpack.c.bf16 %v1181_v25, %v1180_v24  ;;  %v1033_v54 = vsel %vm1025_vm1, %v1031_v17, %v1032_v21  ;;  %11350 = vst [vmem:[#allocation26_spill] sm:$0xff] %v7825_v3  ;;  %v737_v49 = vrot.slane %v7836_v15, 6 }
  0x4b   : > { %6608 = vmatpush3.bf16.msra.mxu1 %v6607_v55  ;;  %6320 = vmatprep.mubr.f32.mxu0 %v7712_v63  ;;  %v7812_v55 = vsel %vm711_vm0, %v727_v28, %v728_v29  ;;  %v6617_v17 = vpack.c.bf16 %v1231_v53, %v1230_v52  ;;  %v7849_v24 = vsel %vm711_vm0, %v728_v29, %v730_v51  ;;  %v1202_v51 = vld [vmem:[%s11224_s5 + $0x1d0] sm:$0xff]  ;;  %v1203_v52 = vld [vmem:[%s11224_s5 + $0x1d8] sm:$0xff]  ;;  %v7888_v53 = vld [vmem:[%s7637_s19 + $0x80] sm:$0xff] }
  0x4c   : > { %1357 = vmatprep.mubr.f32.mxu1 %v7729_v8  ;;  %6578 = vmatprep.subr.bf16.mxu0 %v6577_v0  ;;  %11348 = vst [vmem:[#allocation24_spill] sm:$0xff] %v7812_v55  ;;  %v7822_v0 = vld [vmem:[%s7637_s19 + $0x50] sm:$0xff]  ;;  %11351 = vst [vmem:[#allocation27_spill] sm:$0xff] %v7849_v24  ;;  %v6587_v25 = vpack.c.bf16 %v1183_v61, %v1182_v59  ;;  %v7863_v29 = vsel %vm1025_vm1, %v1032_v21, %v11234_v57  ;;  %v1216_v61 = vld [vmem:[%s11224_s5 + $0x240] sm:$0xff] }
  0x4d   : > { %6321 = vmatmul.mubr.f32.gmra.mrb[2].mxu0 %v7732_v9  ;;  %6610 = vmatprep.subr.bf16.mxu1 %v6609_v10  ;;  %11349 = vst [vmem:[#allocation25_spill] sm:$0xff] %v7822_v0  ;;  %v733_v10 = vrot.slane %v7789_v38, 6  ;;  %v735_v28 = vrot.slane %v7822_v0, 6  ;;  %11352 = vst [vmem:[#allocation28_spill] sm:$0xff] %v7863_v29  ;;  %v6589_v36 = vpack.c.bf16 %v1201_v12, %v1200_v11  ;;  %v7938_v57 = vld [vmem:[%s7637_s19 + $0xa0] sm:$0xff]  ;;  %v1221_v8 = vld [vmem:[%s11224_s5 + $0x268] sm:$0xff] }
  0x4e   : > { %1358 = vmatmul.mubr.f32.gmra.mrb[2].mxu1 %v7746_v62  ;;  %6580 = vmatpush3.bf16.msra.mxu0 %v6579_v14  ;;  %v6615_v14 = vpack.c.bf16 %v1213_v43, %v1212_v42  ;;  %v1185_v42 = vld [vmem:[%s11224_s5 + $0x148] sm:$0xff]  ;;  %v7874_v43 = vld [vmem:[%s7637_s19 + $0x70] sm:$0xff] }
  0x4f   : > { %6323 = vmatprep.mubr.f32.mxu0 %v7758_v20  ;;  %1362 = vmatprep.mubr.f32.mxu1 %v7774_v31  ;;  %11353 = vst [vmem:[#allocation29_spill] sm:$0xff] %v7874_v43  ;;  %v7877_v21 = vsel %vm711_vm0, %v732_v5, %v733_v10  ;;  %v1217_v5 = vld [vmem:[%s11224_s5 + $0x248] sm:$0xff]  ;;  %v7902_v11 = vsel %vm711_vm0, %v733_v10, %v735_v28  ;;  %v1186_v28 = vld [vmem:[%s11224_s5 + $0x150] sm:$0xff] }
  0x50   : > { %6582 = vmatprep.subr.bf16.mxu0 %v6581_v32  ;;  %6612 = vmatpush3.bf16.msra.mxu1 %v6611_v33  ;;  %v1232_v32 = vld [vmem:[%s11224_s5 + $0x2c0] sm:$0xff]  ;;  %v1233_v33 = vld [vmem:[%s11224_s5 + $0x2c8] sm:$0xff]  ;;  %11354 = vst [vmem:[#allocation30_spill] sm:$0xff] %v7877_v21  ;;  %11355 = vst [vmem:[#allocation31_spill] sm:$0xff] %v7902_v11  ;;  %v6623_v48 = vpack.c.bf16 %v1217_v5, %v1216_v61 }
  0x51   : > { %6324 = vmatmul.mubr.f32.gmra.mrb[4].mxu0 %v7799_v44  ;;  %6614 = vmatprep.subr.bf16.mxu1 %v6613_v41  ;;  %v1184_v41 = vld [vmem:[%s11224_s5 + $0x140] sm:$0xff]  ;;  %v6621_v59 = vpack.c.bf16 %v1233_v33, %v1232_v32  ;;  %v1187_v32 = vld [vmem:[%s11224_s5 + $0x158] sm:$0xff]  ;;  %v7924_v33 = vld [vmem:[%s7637_s19 + $0x90] sm:$0xff] }
  0x52   : > { %1363 = vmatmul.mubr.f32.gmra.mrb[4].mxu1 %v1033_v54  ;;  %6584 = vmatpush3.bf16.msra.mxu0 %v6583_v47  ;;  %v738_v47 = vrot.slane %v7840_v4, 6  ;;  %v6619_v54 = vpack.c.bf16 %v1215_v19, %v1214_v18  ;;  %v6591_v12 = vpack.c.bf16 %v1185_v42, %v1184_v41  ;;  %v1235_v18 = vld [vmem:[%s11224_s5 + $0x2d8] sm:$0xff]  ;;  %v7914_v19 = vsel %vm1025_vm1, %v1036_v34, %v1037_v35  ;;  %v1218_v10 = vld [vmem:[%s11224_s5 + $0x250] sm:$0xff]  ;;  %v1189_v62 = vld [vmem:[%s11224_s5 + $0x168] sm:$0xff] }
  0x53   : > { %6326 = vmatprep.mubr.f32.mxu0 %v7812_v55  ;;  %1367 = vmatprep.mubr.f32.mxu1 %v7825_v3  ;;  %11356 = vst [vmem:[#allocation32_spill] sm:$0xff] %v7924_v33  ;;  %v742_v34 = vrot.slane %v7888_v53, 6  ;;  %v6595_v61 = vpack.c.bf16 %v1187_v32, %v1186_v28  ;;  %v745_v5 = vrot.slane %v7924_v33, 6  ;;  %v1188_v32 = vld [vmem:[%s11224_s5 + $0x160] sm:$0xff]  ;;  %v7977_v3 = vld [vmem:[%s7637_s19 + $0xb0] sm:$0xff] }
  0x54   : > { %6586 = vmatprep.subr.bf16.mxu0 %v6585_v58  ;;  %6616 = vmatpush3.bf16.msra.mxu1 %v6615_v14  ;;  %v7892_v58 = vld [vmem:[%s7637_s19 + $0x88] sm:$0xff]  ;;  %v740_v14 = vrot.slane %v7874_v43, 6  ;;  %v7927_v41 = vsel %vm711_vm0, %v737_v49, %v738_v47  ;;  %11361 = vst [vmem:[#allocation36_spill] sm:$0xff] %v7977_v3 }
  0x55   : > { %6327 = vmatmul.mubr.f32.gmra.mrb[6].mxu0 %v7849_v24  ;;  %6618 = vmatprep.subr.bf16.mxu1 %v6617_v17  ;;  %v1234_v17 = vld [vmem:[%s11224_s5 + $0x2d0] sm:$0xff]  ;;  %11357 = vst [vmem:[#allocation33_spill] sm:$0xff] %v7927_v41  ;;  %v743_v42 = vrot.slane %v7892_v58, 6 }
  0x56   : > { %1368 = vmatmul.mubr.f32.gmra.mrb[6].mxu1 %v7863_v29  ;;  %6588 = vmatpush3.bf16.msra.mxu0 %v6587_v25  ;;  %v6593_v25 = vpack.c.bf16 %v1203_v52, %v1202_v51  ;;  %v1204_v51 = vld [vmem:[%s11224_s5 + $0x1e0] sm:$0xff]  ;;  %v1205_v52 = vld [vmem:[%s11224_s5 + $0x1e8] sm:$0xff]  ;;  %v6625_v49 = vpack.c.bf16 %v1235_v18, %v1234_v17  ;;  %v1219_v29 = vld [vmem:[%s11224_s5 + $0x258] sm:$0xff]  ;;  %v1042_v18 = vrot.slane %v7632_v23, 4 }
  0x57   : > { %6329 = vmatprep.mubr.f32.mxu0 %v7877_v21  ;;  %1372 = vmatprep.mubr.f32.mxu1 %v7579_v1  ;;  %v1237_v17 = vld [vmem:[%s11224_s5 + $0x2e8] sm:$0xff]  ;;  %v6597_v28 = vpack.c.bf16 %v1205_v52, %v1204_v51  ;;  %v7980_v31 = vsel %vm711_vm0, %v742_v34, %v743_v42  ;;  %v1206_v51 = vld [vmem:[%s11224_s5 + $0x1f0] sm:$0xff]  ;;  %v6627_v52 = vpack.c.bf16 %v1219_v29, %v1218_v10  ;;  %v1220_v34 = vld [vmem:[%s11224_s5 + $0x260] sm:$0xff]  ;;  %v750_v10 = vrot.slane %v7977_v3, 6 }
  0x58   : > { %6590 = vmatprep.subr.bf16.mxu0 %v6589_v36  ;;  %6620 = vmatpush3.bf16.msra.mxu1 %v6619_v54  ;;  %v7942_v36 = vld [vmem:[%s7637_s19 + $0xa8] sm:$0xff]  ;;  %v7952_v54 = vsel %vm711_vm0, %v738_v47, %v740_v14  ;;  %v1041_v14 = vrot.slane %v7629_v22, 4  ;;  %11362 = vst [vmem:[#allocation37_spill] sm:$0xff] %v7980_v31  ;;  %v6599_v29 = vpack.c.bf16 %v1189_v62, %v1188_v32  ;;  %v1190_v62 = vld [vmem:[%s11224_s5 + $0x170] sm:$0xff] }
  0x59   : > { %6330 = vmatmul.mubr.f32.gmra.mrb[8].mxu0 %v7902_v11  ;;  %6622 = vmatprep.subr.bf16.mxu1 %v6621_v59  ;;  %11358 = vst [vmem:[#allocation34_spill] sm:$0xff] %v7952_v54  ;;  %v1236_v59 = vld [vmem:[%s11224_s5 + $0x2e0] sm:$0xff]  ;;  %v748_v22 = vrot.slane %v7942_v36, 6  ;;  %v6631_v2 = vpack.c.bf16 %v1221_v8, %v1220_v34  ;;  %v1257_v8 = vld [vmem:[%s11224_s5 + $0x388] sm:$0xff] }
  0x5a   : > { %1373 = vmatmul.mubr.f32.gmra.mrb[8].mxu1 %v7914_v19  ;;  %6592 = vmatpush3.bf16.msra.mxu0 %v6591_v12  ;;  %v11359_v12 = vrot.slane %v7614_v16, 4 }
  0x5b   : > { %6332 = vmatprep.mubr.f32.mxu0 %v7927_v41  ;;  %1377 = vmatprep.mubr.f32.mxu1 %v7685_v46 }
  0x5c   : > { %v7966_v47 = vsel %vm1025_vm1, %v1037_v35, %v11359_v12  ;;  %6594 = vmatprep.subr.bf16.mxu0 %v6593_v25  ;;  %v747_v35 = vrot.slane %v7938_v57, 6  ;;  %6624 = vmatpush3.bf16.msra.mxu1 %v6623_v48  ;;  %v1207_v12 = vld [vmem:[%s11224_s5 + $0x1f8] sm:$0xff]  ;;  %v6629_v25 = vpack.c.bf16 %v1237_v17, %v1236_v59  ;;  %v7999_v48 = vsel %vm711_vm0, %v743_v42, %v745_v5 }
  0x5d   : > { %11360 = vst [vmem:[#allocation35_spill] sm:$0xff] %v7966_v47  ;;  %6333 = vmatmul.mubr.f32.gmra.mrb[10].mxu0 %v7952_v54  ;;  %6626 = vmatprep.subr.bf16.mxu1 %v6625_v49  ;;  %11363 = vst [vmem:[#allocation38_spill] sm:$0xff] %v7999_v48  ;;  %v1238_v49 = vld [vmem:[%s11224_s5 + $0x2f0] sm:$0xff]  ;;  %v1239_v59 = vld [vmem:[%s11224_s5 + $0x2f8] sm:$0xff]  ;;  %v6601_v32 = vpack.c.bf16 %v1207_v12, %v1206_v51 }
  0x5e   : > { %1378 = vmatmul.mubr.f32.gmra.mrb[10].mxu1 %v7966_v47  ;;  %6596 = vmatpush3.bf16.msra.mxu0 %v6595_v61  ;;  %v8011_v61 = vsel %vm1025_vm1, %v1041_v14, %v1042_v18  ;;  %v1191_v5 = vld [vmem:[%s11224_s5 + $0x178] sm:$0xff]  ;;  %v8021_v17 = vsel %vm711_vm0, %v747_v35, %v748_v22  ;;  %v1222_v14 = vld [vmem:[%s11224_s5 + $0x270] sm:$0xff]  ;;  %v6633_v42 = vpack.c.bf16 %v1239_v59, %v1238_v49  ;;  %v1273_v12 = vld [vmem:[%s11224_s5 + $0x408] sm:$0xff] }
  0x5f   : > { %6335 = vmatprep.mubr.f32.mxu0 %v7980_v31  ;;  %1382 = vmatprep.mubr.f32.mxu1 %v7712_v63  ;;  %11364 = vst [vmem:[#allocation39_spill] sm:$0xff] %v8021_v17  ;;  %v1223_v31 = vld [vmem:[%s11224_s5 + $0x278] sm:$0xff]  ;;  %v8038_v35 = vsel %vm711_vm0, %v748_v22, %v750_v10  ;;  %v6603_v51 = vpack.c.bf16 %v1191_v5, %v1190_v62  ;;  %v1046_v22 = vrot.slane %v7666_v39, 4  ;;  %v1240_v59 = vld [vmem:[%s11224_s5 + $0x300] sm:$0xff]  ;;  %v1241_v62 = vld [vmem:[%s11224_s5 + $0x308] sm:$0xff] }
  0x60   : > { %6598 = vmatprep.subr.bf16.mxu0 %v6597_v28  ;;  %6628 = vmatpush3.bf16.msra.mxu1 %v6627_v52  ;;  %v1256_v28 = vld [vmem:[%s11224_s5 + $0x380] sm:$0xff]  ;;  %11365 = vst [vmem:[#allocation40_spill] sm:$0xff] %v8038_v35  ;;  %v6635_v10 = vpack.c.bf16 %v1223_v31, %v1222_v14  ;;  %v1258_v39 = vld [vmem:[%s11224_s5 + $0x390] sm:$0xff]  ;;  %v6639_v5 = vpack.c.bf16 %v1241_v62, %v1240_v59  ;;  %v11252_v59 = vrot.slane %v7770_v30, 4 }
  0x61   : > { %6336 = vmatmul.mubr.f32.gmra.mrb[12].mxu0 %v7999_v48  ;;  %6630 = vmatprep.subr.bf16.mxu1 %v6629_v25  ;;  %v1272_v52 = vld [vmem:[%s11224_s5 + $0x400] sm:$0xff]  ;;  %v11366_v25 = vrot.slane %v7647_v27, 4  ;;  %v6637_v49 = vpack.c.bf16 %v1257_v8, %v1256_v28  ;;  %v1242_v14 = vld [vmem:[%s11224_s5 + $0x310] sm:$0xff]  ;;  %v1243_v28 = vld [vmem:[%s11224_s5 + $0x318] sm:$0xff] }
  0x62   : > { %1383 = vmatmul.mubr.f32.gmra.mrb[12].mxu1 %v8011_v61  ;;  %6600 = vmatpush3.bf16.msra.mxu0 %v6599_v29  ;;  %v1047_v29 = vrot.slane %v7669_v40, 4  ;;  %v1261_v8 = vld [vmem:[%s11224_s5 + $0x3a8] sm:$0xff] }
  0x63   : > { %6338 = vmatprep.mubr.f32.mxu0 %v8021_v17  ;;  %1387 = vmatprep.mubr.f32.mxu1 %v7732_v9  ;;  %v8051_v34 = vsel %vm1025_vm1, %v1042_v18, %v11366_v25  ;;  %v8062_v18 = vpack.c.bf16 %v1273_v12, %v1272_v52  ;;  %v1052_v52 = vrot.slane %v7723_v7, 4  ;;  %v6643_v12 = vpack.c.bf16 %v1243_v28, %v1242_v14 }
  0x64   : > { %11367 = vst [vmem:[#allocation41_spill] sm:$0xff] %v8051_v34  ;;  %6602 = vmatprep.subr.bf16.mxu0 %v6601_v32  ;;  %6632 = vmatpush3.bf16.msra.mxu1 %v6631_v2  ;;  %v1259_v2 = vld [vmem:[%s11224_s5 + $0x398] sm:$0xff]  ;;  %v8074_v31 = vsel %vm1025_vm1, %v1046_v22, %v1047_v29  ;;  %v1244_v22 = vld [vmem:[%s11224_s5 + $0x320] sm:$0xff]  ;;  %v1057_v28 = vrot.slane %v7789_v38, 4 }
  0x65   : > { %6339 = vmatmul.mubr.f32.gmra.mrb[14].mxu0 %v8038_v35  ;;  %6634 = vmatprep.subr.bf16.mxu1 %v6633_v42  ;;  %v11254_v42 = vrot.slane %v7704_v60, 4  ;;  %v6641_v32 = vpack.c.bf16 %v1259_v2, %v1258_v39  ;;  %v1246_v2 = vld [vmem:[%s11224_s5 + $0x330] sm:$0xff]  ;;  %v8140_v14 = vsel %vm1025_vm1, %v1052_v52, %v11252_v59 }
  0x66   : > { %1388 = vmatmul.mubr.f32.gmra.mrb[14].mxu1 %v8051_v34  ;;  %6604 = vmatpush3.bf16.msra.mxu0 %v6603_v51  ;;  %v1051_v51 = vrot.slane %v7720_v6, 4  ;;  %v1262_v6 = vld [vmem:[%s11224_s5 + $0x3b0] sm:$0xff]  ;;  %11369 = vst [vmem:[#allocation43_spill] sm:$0xff] %v8140_v14 }
  0x67   : > { %1392 = vmatprep.mubr.f32.mxu1 %v7758_v20  ;;  %1497 = vmatprep.mubr.f32.mxu0 %v7914_v19  ;;  %v1260_v19 = vld [vmem:[%s11224_s5 + $0x3a0] sm:$0xff] }
  0x68   : > { %6636 = vmatpush3.bf16.msra.mxu1 %v6635_v10  ;;  %6638 = vmatprep.subr.bf16.mxu0 %v6637_v49  ;;  %v6645_v25 = vpack.c.bf16 %v1261_v8, %v1260_v19  ;;  %v1245_v10 = vld [vmem:[%s11224_s5 + $0x328] sm:$0xff]  ;;  %v8118_v49 = vsel %vm1025_vm1, %v1051_v51, %v1052_v52  ;;  %v1248_v51 = vld [vmem:[%s11224_s5 + $0x340] sm:$0xff]  ;;  %v1267_v52 = vld [vmem:[%s11224_s5 + $0x3d8] sm:$0xff] }
  0x69   : > { %1498 = vmatmul.mubr.f32.vlgmr.msra.gmra.mrb[16].mxu0 %v7556_v56  ;;  %6670 = vmatprep.subr.bf16.mxu1 %v8062_v18  ;;  %v8097_v56 = vsel %vm1025_vm1, %v1047_v29, %v11254_v42  ;;  %v1263_v29 = vld [vmem:[%s11224_s5 + $0x3b8] sm:$0xff]  ;;  %v6647_v62 = vpack.c.bf16 %v1245_v10, %v1244_v22  ;;  %v11251_v22 = vrot.slane %v7822_v0, 4 }
  0x6a   : > { %1393 = vmatmul.mubr.f32.gmra.mrb[16].mxu1 %v8074_v31  ;;  %1502 = vmatprep.mubr.f32.mxu0 %v7966_v47  ;;  %11368 = vst [vmem:[#allocation42_spill] sm:$0xff] %v8097_v56  ;;  %v6649_v39 = vpack.c.bf16 %v1263_v29, %v1262_v6  ;;  %v1250_v29 = vld [vmem:[%s11224_s5 + $0x350] sm:$0xff]  ;;  %v2428_v47 = vld [vmem:[%s11225_s6 + $0x360] sm:$0xff] }
  0x6b   : > { %1397 = vmatprep.mubr.f32.mxu1 %v7799_v44  ;;  %6640 = vmatpush3.bf16.msra.mxu0 %v6639_v5  ;;  %v1247_v5 = vld [vmem:[%s11224_s5 + $0x338] sm:$0xff] }
  0x6c   : > { %6642 = vmatprep.subr.bf16.mxu0 %v6641_v32  ;;  %v1265_v32 = vld [vmem:[%s11224_s5 + $0x3c8] sm:$0xff]  ;;  %v6651_v19 = vpack.c.bf16 %v1247_v5, %v1246_v2  ;;  %v8183_v5 = vsel %vm1025_vm1, %v1057_v28, %v11251_v22  ;;  %v2362_v22 = vld [vmem:[%s11225_s6 + $0x150] sm:$0xff] }
  0x6d   : > { %1503 = vmatmul.mubr.f32.gmra.mrb[18].mxu0 %v7644_v26  ;;  %v1269_v2 = vld [vmem:[%s11224_s5 + $0x3e8] sm:$0xff]  ;;  %11370 = vst [vmem:[#allocation44_spill] sm:$0xff] %v8183_v5 }
  0x6e   : > { %1398 = vmatmul.mubr.f32.gmra.mrb[18].mxu1 %v8097_v56  ;;  %1507 = vmatprep.mubr.f32.mxu0 %v8011_v61  ;;  %v1264_v61 = vld [vmem:[%s11224_s5 + $0x3c0] sm:$0xff] }
  0x6f   : > { %1402 = vmatprep.mubr.f32.mxu1 %v7812_v55  ;;  %6644 = vmatpush3.bf16.msra.mxu0 %v6643_v12  ;;  %v6653_v8 = vpack.c.bf16 %v1265_v32, %v1264_v61  ;;  %v1249_v12 = vld [vmem:[%s11224_s5 + $0x348] sm:$0xff]  ;;  %v1061_v61 = vrot.slane %v7836_v15, 4  ;;  %v1062_v32 = vrot.slane %v7840_v4, 4  ;;  %v1270_v15 = vld [vmem:[%s11224_s5 + $0x3f0] sm:$0xff] }
  0x70   : > { %6646 = vmatprep.subr.bf16.mxu0 %v6645_v25  ;;  %v6655_v10 = vpack.c.bf16 %v1249_v12, %v1248_v51  ;;  %v1253_v51 = vld [vmem:[%s11224_s5 + $0x368] sm:$0xff] }
  0x71   : > { %1508 = vmatmul.mubr.f32.gmra.mrb[20].mxu0 %v7680_v45  ;;  %v1056_v45 = vrot.slane %v7785_v37, 4  ;;  %v1266_v37 = vld [vmem:[%s11224_s5 + $0x3d0] sm:$0xff]  ;;  %v8204_v12 = vsel %vm1025_vm1, %v1061_v61, %v1062_v32 }
  0x72   : > { %1403 = vmatmul.mubr.f32.gmra.mrb[20].mxu1 %v8118_v49  ;;  %1512 = vmatprep.mubr.f32.mxu0 %v8051_v34  ;;  %v6657_v6 = vpack.c.bf16 %v1267_v52, %v1266_v37  ;;  %v11250_v37 = vrot.slane %v7874_v43, 4 }
  0x73   : > { %1407 = vmatprep.mubr.f32.mxu1 %v7849_v24  ;;  %6648 = vmatpush3.bf16.msra.mxu0 %v6647_v62  ;;  %v8161_v25 = vsel %vm1025_vm1, %v1056_v45, %v1057_v28  ;;  %v1251_v62 = vld [vmem:[%s11224_s5 + $0x358] sm:$0xff] }
  0x74   : > { %6650 = vmatprep.subr.bf16.mxu0 %v6649_v39  ;;  %v1268_v39 = vld [vmem:[%s11224_s5 + $0x3e0] sm:$0xff]  ;;  %v6659_v45 = vpack.c.bf16 %v1251_v62, %v1250_v29  ;;  %v1271_v28 = vld [vmem:[%s11224_s5 + $0x3f8] sm:$0xff] }
  0x75   : > { %1513 = vmatmul.mubr.f32.gmra.mrb[22].mxu0 %v7741_v13  ;;  %v1255_v29 = vld [vmem:[%s11224_s5 + $0x378] sm:$0xff]  ;;  %v2336_v62 = vld [vmem:[%s11225_s6 + $0x80] sm:$0xff]  ;;  %v2422_v13 = vld [vmem:[%s11225_s6 + $0x330] sm:$0xff] }
  0x76   : > { %1408 = vmatmul.mubr.f32.gmra.mrb[22].mxu1 %v8140_v14  ;;  %1517 = vmatprep.mubr.f32.mxu0 %v8074_v31 }
  0x77   : > { %1412 = vmatprep.mubr.f32.mxu1 %v7877_v21  ;;  %6652 = vmatpush3.bf16.msra.mxu0 %v6651_v19  ;;  %v6661_v19 = vpack.c.bf16 %v1269_v2, %v1268_v39  ;;  %v2337_v39 = vld [vmem:[%s11225_s6 + $0x88] sm:$0xff]  ;;  %v8226_v2 = vsel %vm1025_vm1, %v1062_v32, %v11250_v37 }
  0x78   : > { %6654 = vmatprep.subr.bf16.mxu0 %v6653_v8  ;;  %v1252_v8 = vld [vmem:[%s11224_s5 + $0x360] sm:$0xff]  ;;  %11371 = vst [vmem:[#allocation45_spill] sm:$0xff] %v8226_v2 }
  0x79   : > { %1518 = vmatmul.mubr.f32.gmra.mrb[24].mxu0 %v7545_v50  ;;  %v6663_v52 = vpack.c.bf16 %v1253_v51, %v1252_v8  ;;  %v1275_v8 = vld [vmem:[%s11224_s5 + $0x418] sm:$0xff]  ;;  %v1276_v51 = vld [vmem:[%s11224_s5 + $0x420] sm:$0xff] }
  0x7a   : > { %1413 = vmatmul.mubr.f32.gmra.mrb[24].mxu1 %v8161_v25  ;;  %1522 = vmatprep.mubr.f32.mxu0 %v8097_v56 }
  0x7b   : > { %1417 = vmatprep.mubr.f32.mxu1 %v7902_v11  ;;  %6656 = vmatpush3.bf16.msra.mxu0 %v6655_v10  ;;  %v6665_v10 = vpack.c.bf16 %v1271_v28, %v1270_v15  ;;  %v1277_v15 = vld [vmem:[%s11224_s5 + $0x428] sm:$0xff]  ;;  %v1278_v28 = vld [vmem:[%s11224_s5 + $0x430] sm:$0xff] }
  0x7c   : > { %6658 = vmatprep.subr.bf16.mxu0 %v6657_v6  ;;  %v1254_v6 = vld [vmem:[%s11224_s5 + $0x370] sm:$0xff] }
  0x7d   : > { %1523 = vmatmul.mubr.f32.gmra.mrb[26].mxu0 %v7614_v16  ;;  %v6667_v61 = vpack.c.bf16 %v1255_v29, %v1254_v6  ;;  %v1280_v29 = vld [vmem:[%s11224_s5 + $0x440] sm:$0xff] }
  0x7e   : > { %1418 = vmatmul.mubr.f32.gmra.mrb[26].mxu1 %v8183_v5  ;;  %1527 = vmatprep.mubr.f32.mxu0 %v8118_v49 }
  0x7f   : > { %1422 = vmatprep.mubr.f32.mxu1 %v7927_v41  ;;  %6660 = vmatpush3.bf16.msra.mxu0 %v6659_v45  ;;  %v6701_v45 = vpack.c.bf16 %v2337_v39, %v2336_v62  ;;  %v1281_v62 = vld [vmem:[%s11224_s5 + $0x448] sm:$0xff] }
  0x80   : > { %6662 = vmatprep.subr.bf16.mxu0 %v6661_v19  ;;  %v1274_v19 = vld [vmem:[%s11224_s5 + $0x410] sm:$0xff]  ;;  %v6685_v39 = vpack.c.bf16 %v1281_v62, %v1280_v29  ;;  %v2368_v29 = vld [vmem:[%s11225_s6 + $0x180] sm:$0xff]  ;;  %v2369_v62 = vld [vmem:[%s11225_s6 + $0x188] sm:$0xff] }
  0x81   : > { %1528 = vmatmul.mubr.f32.gmra.mrb[28].mxu0 %v7632_v23  ;;  %v6673_v32 = vpack.c.bf16 %v1275_v8, %v1274_v19  ;;  %v1101_v8 = vrot.slane %v7938_v57, 4 }
  0x82   : > { %1423 = vmatmul.mubr.f32.gmra.mrb[28].mxu1 %v8204_v12  ;;  %1532 = vmatprep.mubr.f32.mxu0 %v8140_v14 }
  0x83   : > { %1427 = vmatprep.mubr.f32.mxu1 %v7952_v54  ;;  %6664 = vmatpush3.bf16.msra.mxu0 %v6663_v52  ;;  %v1279_v52 = vld [vmem:[%s11224_s5 + $0x438] sm:$0xff] }
  0x84   : > { %6666 = vmatprep.subr.bf16.mxu0 %v6665_v10  ;;  %v1097_v10 = vrot.slane %v7892_v58, 4  ;;  %v6681_v6 = vpack.c.bf16 %v1279_v52, %v1278_v28  ;;  %v1286_v52 = vld [vmem:[%s11224_s5 + $0x470] sm:$0xff] }
  0x85   : > { %1533 = vmatmul.mubr.f32.gmra.mrb[30].mxu0 %v7647_v27 }
  0x86   : > { %1428 = vmatmul.mubr.f32.gmra.mrb[30].mxu1 %v8226_v2  ;;  %1537 = vmatprep.mubr.f32.mxu0 %v8161_v25 }
  0x87   : > { %1642 = vmatprep.mubr.f32.mxu1 %v7545_v50  ;;  %6668 = vmatpush3.bf16.msra.mxu0 %v6667_v61  ;;  %v6677_v50 = vpack.c.bf16 %v1277_v15, %v1276_v51  ;;  %v1282_v61 = vld [vmem:[%s11224_s5 + $0x450] sm:$0xff]  ;;  %v1284_v15 = vld [vmem:[%s11224_s5 + $0x460] sm:$0xff] }
  0x88   : > { %6702 = vmatprep.subr.bf16.mxu0 %v6701_v45  ;;  %v1283_v45 = vld [vmem:[%s11224_s5 + $0x458] sm:$0xff] }
  0x89   : > { %1538 = vmatmul.mubr.f32.gmra.mrb[32].mxu0 %v7669_v40  ;;  %v6689_v51 = vpack.c.bf16 %v1283_v45, %v1282_v61  ;;  %v6733_v61 = vpack.c.bf16 %v2369_v62, %v2368_v29  ;;  %v2338_v45 = vld [vmem:[%s11225_s6 + $0x90] sm:$0xff]  ;;  %v2325_v29 = vld [vmem:[%s11225_s6 + $0x28] sm:$0xff] }
  0x8a   : > { %1643 = vmatmul.mubr.f32.vlgmr.msra.gmra.mrb[32].mxu1 %v7579_v1  ;;  %1542 = vmatprep.mubr.f32.mxu0 %v8183_v5  ;;  %v2342_v62 = vld [vmem:[%s11225_s6 + $0xb0] sm:$0xff] }
  0x8b   : > { %6672 = vmatpush3.bf16.msra.mxu1 %v8062_v18  ;;  %1647 = vmatprep.mubr.f32.mxu1 %v7614_v16  ;;  %v1096_v18 = vrot.slane %v7888_v53, 4  ;;  %v11249_v53 = vrot.slane %v7924_v33, 4 }
  0x8c   : > { %6674 = vmatprep.subr.bf16.mxu1 %v6673_v32 }
  0x8d   : > { %1543 = vmatmul.mubr.f32.gmra.mrb[34].mxu0 %v7704_v60  ;;  %v8288_v19 = vsel %vm1025_vm1, %v1097_v10, %v11249_v53 }
  0x8e   : > { %1648 = vmatmul.mubr.f32.gmra.mrb[34].mxu1 %v7685_v46  ;;  %1547 = vmatprep.mubr.f32.mxu0 %v8204_v12  ;;  %11372 = vst [vmem:[#allocation46_spill] sm:$0xff] %v8288_v19 }
  0x8f   : > { %1652 = vmatprep.mubr.f32.mxu1 %v7632_v23  ;;  %6676 = vmatpush3.bf16.msra.mxu1 %v6673_v32  ;;  %v8272_v23 = vsel %vm1025_vm1, %v1096_v18, %v1097_v10  ;;  %v1102_v32 = vrot.slane %v7942_v36, 4  ;;  %v1287_v18 = vld [vmem:[%s11224_s5 + $0x478] sm:$0xff] }
  0x90   : > { %6678 = vmatprep.subr.bf16.mxu1 %v6677_v50 }
  0x91   : > { %1548 = vmatmul.mubr.f32.gmra.mrb[36].mxu0 %v7723_v7  ;;  %v8303_v57 = vsel %vm1025_vm1, %v1101_v8, %v1102_v32  ;;  %v2339_v8 = vld [vmem:[%s11225_s6 + $0x98] sm:$0xff] }
  0x92   : > { %1653 = vmatmul.mubr.f32.gmra.mrb[36].mxu1 %v7712_v63  ;;  %1552 = vmatprep.mubr.f32.mxu0 %v8226_v2 }
  0x93   : > { %1657 = vmatprep.mubr.f32.mxu1 %v7647_v27  ;;  %6680 = vmatpush3.bf16.msra.mxu1 %v6677_v50  ;;  %v11248_v50 = vrot.slane %v7977_v3, 4  ;;  %v2424_v27 = vld [vmem:[%s11225_s6 + $0x340] sm:$0xff] }
  0x94   : > { %6682 = vmatprep.subr.bf16.mxu1 %v6681_v6 }
  0x95   : > { %1553 = vmatmul.mubr.f32.gmra.mrb[38].mxu0 %v7770_v30  ;;  %v8319_v10 = vsel %vm1025_vm1, %v1102_v32, %v11248_v50  ;;  %v665_v50 = vld [vmem:[%s7637_s19 + $0xe0] sm:$0xff] }
  0x96   : > { %1658 = vmatmul.mubr.f32.gmra.mrb[38].mxu1 %v7732_v9  ;;  %1557 = vmatprep.mubr.f32.mxu0 %v8272_v23  ;;  %11373 = vst [vmem:[#allocation47_spill] sm:$0xff] %v8319_v10 }
  0x97   : > { %1662 = vmatprep.mubr.f32.mxu1 %v7669_v40  ;;  %6684 = vmatpush3.bf16.msra.mxu1 %v6681_v6  ;;  %v1285_v40 = vld [vmem:[%s11224_s5 + $0x468] sm:$0xff]  ;;  %v6697_v6 = vpack.c.bf16 %v1287_v18, %v1286_v52 }
  0x98   : > { %6686 = vmatprep.subr.bf16.mxu1 %v6685_v39  ;;  %v6693_v28 = vpack.c.bf16 %v1285_v40, %v1284_v15  ;;  %v2322_v15 = vld [vmem:[%s11225_s6 + $0x10] sm:$0xff]  ;;  %v2323_v40 = vld [vmem:[%s11225_s6 + $0x18] sm:$0xff]  ;;  %v2341_v52 = vld [vmem:[%s11225_s6 + $0xa8] sm:$0xff] }
  0x99   : > { %1558 = vmatmul.mubr.f32.gmra.mrb[40].mxu0 %v7789_v38  ;;  %v6707_v18 = vpack.c.bf16 %v2323_v40, %v2322_v15 }
  0x9a   : > { %1663 = vmatmul.mubr.f32.gmra.mrb[40].mxu1 %v7758_v20  ;;  %1562 = vmatprep.mubr.f32.mxu0 %v8288_v19 }
  0x9b   : > { %1667 = vmatprep.mubr.f32.mxu1 %v7704_v60  ;;  %6688 = vmatpush3.bf16.msra.mxu1 %v6685_v39  ;;  %v2321_v39 = vld [vmem:[%s11225_s6 + $0x8] sm:$0xff] }
  0x9c   : > { %6690 = vmatprep.subr.bf16.mxu1 %v6689_v51 }
  0x9d   : > { %1563 = vmatmul.mubr.f32.gmra.mrb[42].mxu0 %v7822_v0 }
  0x9e   : > { %1668 = vmatmul.mubr.f32.gmra.mrb[42].mxu1 %v7799_v44  ;;  %1567 = vmatprep.mubr.f32.mxu0 %v8303_v57 }
  0x9f   : > { %1672 = vmatprep.mubr.f32.mxu1 %v7723_v7  ;;  %6692 = vmatpush3.bf16.msra.mxu1 %v6689_v51  ;;  %v2320_v7 = vld [vmem:[%s11225_s6] sm:$0xff]  ;;  %v6705_v51 = vpack.c.bf16 %v2339_v8, %v2338_v45  ;;  %v2326_v45 = vld [vmem:[%s11225_s6 + $0x30] sm:$0xff]  ;;  %v2327_v8 = vld [vmem:[%s11225_s6 + $0x38] sm:$0xff] }
  0xa0   : > { %6694 = vmatprep.subr.bf16.mxu1 %v6693_v28  ;;  %v6703_v32 = vpack.c.bf16 %v2321_v39, %v2320_v7  ;;  %v2343_v7 = vld [vmem:[%s11225_s6 + $0xb8] sm:$0xff]  ;;  %v6715_v15 = vpack.c.bf16 %v2327_v8, %v2326_v45 }
  0xa1   : > { %1568 = vmatmul.mubr.f32.gmra.mrb[44].mxu0 %v7840_v4 }
  0xa2   : > { %1673 = vmatmul.mubr.f32.gmra.mrb[44].mxu1 %v7812_v55  ;;  %1572 = vmatprep.mubr.f32.mxu0 %v8319_v10 }
  0xa3   : > { %1677 = vmatprep.mubr.f32.mxu1 %v7770_v30  ;;  %6696 = vmatpush3.bf16.msra.mxu1 %v6693_v28  ;;  %v2340_v28 = vld [vmem:[%s11225_s6 + $0xa0] sm:$0xff] }
  0xa4   : > { %6698 = vmatprep.subr.bf16.mxu1 %v6697_v6 }
  0xa5   : > { %1573 = vmatmul.mubr.f32.gmra.mrb[46].mxu0 %v7874_v43 }
  0xa6   : > { %1678 = vmatmul.mubr.f32.gmra.mrb[46].mxu1 %v7849_v24  ;;  %1787 = vmatprep.mubr.f32.mxu0 %v7758_v20 }
  0xa7   : > { %1682 = vmatprep.mubr.f32.mxu1 %v7789_v38  ;;  %6700 = vmatpush3.bf16.msra.mxu1 %v6697_v6  ;;  %v6709_v6 = vpack.c.bf16 %v2341_v52, %v2340_v28  ;;  %v2329_v28 = vld [vmem:[%s11225_s6 + $0x48] sm:$0xff]  ;;  %v2346_v52 = vld [vmem:[%s11225_s6 + $0xd0] sm:$0xff] }
  0xa8   : > { %6734 = vmatprep.subr.bf16.mxu1 %v6733_v61  ;;  %v6713_v61 = vpack.c.bf16 %v2343_v7, %v2342_v62  ;;  %v2331_v62 = vld [vmem:[%s11225_s6 + $0x58] sm:$0xff]  ;;  %v2348_v7 = vld [vmem:[%s11225_s6 + $0xe0] sm:$0xff] }
  0xa9   : > { %1788 = vmatmul.mubr.f32.vlgmr.msra.gmra.mrb[48].mxu0 %v8074_v31  ;;  %v2324_v31 = vld [vmem:[%s11225_s6 + $0x20] sm:$0xff] }
  0xaa   : > { %1683 = vmatmul.mubr.f32.gmra.mrb[48].mxu1 %v7877_v21  ;;  %1792 = vmatprep.mubr.f32.mxu0 %v7799_v44  ;;  %v6711_v39 = vpack.c.bf16 %v2325_v29, %v2324_v31  ;;  %v2330_v29 = vld [vmem:[%s11225_s6 + $0x50] sm:$0xff] }
  0xab   : > { %1687 = vmatprep.mubr.f32.mxu1 %v7822_v0  ;;  %6704 = vmatpush3.bf16.msra.mxu0 %v6703_v32  ;;  %v2344_v32 = vld [vmem:[%s11225_s6 + $0xc0] sm:$0xff]  ;;  %v6723_v45 = vpack.c.bf16 %v2331_v62, %v2330_v29  ;;  %v2353_v29 = vld [vmem:[%s11225_s6 + $0x108] sm:$0xff] }
  0xac   : > { %6706 = vmatprep.subr.bf16.mxu0 %v6705_v51  ;;  %v2345_v51 = vld [vmem:[%s11225_s6 + $0xc8] sm:$0xff] }
  0xad   : > { %1793 = vmatmul.mubr.f32.gmra.mrb[50].mxu0 %v8097_v56  ;;  %v6717_v40 = vpack.c.bf16 %v2345_v51, %v2344_v32  ;;  %v2333_v32 = vld [vmem:[%s11225_s6 + $0x68] sm:$0xff]  ;;  %v2350_v51 = vld [vmem:[%s11225_s6 + $0xf0] sm:$0xff] }
  0xae   : > { %1688 = vmatmul.mubr.f32.gmra.mrb[50].mxu1 %v7902_v11  ;;  %1797 = vmatprep.mubr.f32.mxu0 %v7812_v55 }
  0xaf   : > { %1692 = vmatprep.mubr.f32.mxu1 %v7840_v4  ;;  %6708 = vmatpush3.bf16.msra.mxu0 %v6707_v18  ;;  %v2347_v18 = vld [vmem:[%s11225_s6 + $0xd8] sm:$0xff] }
  0xb0   : > { %6710 = vmatprep.subr.bf16.mxu0 %v6709_v6  ;;  %v6721_v31 = vpack.c.bf16 %v2347_v18, %v2346_v52  ;;  %v2335_v52 = vld [vmem:[%s11225_s6 + $0x78] sm:$0xff]  ;;  %v2400_v18 = vld [vmem:[%s11225_s6 + $0x280] sm:$0xff] }
  0xb1   : > { %1798 = vmatmul.mubr.f32.gmra.mrb[52].mxu0 %v8118_v49  ;;  %v2328_v49 = vld [vmem:[%s11225_s6 + $0x40] sm:$0xff] }
  0xb2   : > { %1693 = vmatmul.mubr.f32.gmra.mrb[52].mxu1 %v7927_v41  ;;  %1802 = vmatprep.mubr.f32.mxu0 %v7849_v24  ;;  %v6719_v6 = vpack.c.bf16 %v2329_v28, %v2328_v49  ;;  %v2334_v28 = vld [vmem:[%s11225_s6 + $0x70] sm:$0xff] }
  0xb3   : > { %1697 = vmatprep.mubr.f32.mxu1 %v7874_v43  ;;  %6712 = vmatpush3.bf16.msra.mxu0 %v6711_v39  ;;  %v2349_v39 = vld [vmem:[%s11225_s6 + $0xe8] sm:$0xff] }
  0xb4   : > { %6714 = vmatprep.subr.bf16.mxu0 %v6713_v61  ;;  %v11374_v61 = vld [vmem:[#allocation37_spill] sm:$0xff]  ;;  %v6725_v8 = vpack.c.bf16 %v2349_v39, %v2348_v7  ;;  %v2370_v7 = vld [vmem:[%s11225_s6 + $0x190] sm:$0xff]  ;;  %v2371_v39 = vld [vmem:[%s11225_s6 + $0x198] sm:$0xff] }
  0xb5   : > { %1803 = vmatmul.mubr.f32.gmra.mrb[54].mxu0 %v8140_v14 }
  0xb6   : > { %1698 = vmatmul.mubr.f32.gmra.mrb[54].mxu1 %v7952_v54  ;;  %1807 = vmatprep.mubr.f32.mxu0 %v7877_v21 }
  0xb7   : > { %1702 = vmatprep.mubr.f32.mxu1 %v7892_v58  ;;  %6716 = vmatpush3.bf16.msra.mxu0 %v6715_v15  ;;  %v2351_v15 = vld [vmem:[%s11225_s6 + $0xf8] sm:$0xff] }
  0xb8   : > { %6718 = vmatprep.subr.bf16.mxu0 %v6717_v40  ;;  %v6729_v49 = vpack.c.bf16 %v2351_v15, %v2350_v51  ;;  %v2355_v51 = vld [vmem:[%s11225_s6 + $0x118] sm:$0xff]  ;;  %v2372_v15 = vld [vmem:[%s11225_s6 + $0x1a0] sm:$0xff] }
  0xb9   : > { %1808 = vmatmul.mubr.f32.gmra.mrb[56].mxu0 %v8161_v25  ;;  %v2332_v25 = vld [vmem:[%s11225_s6 + $0x60] sm:$0xff] }
  0xba   : > { %1703 = vmatmul.mubr.f32.gmra.mrb[56].mxu1 %v11374_v61  ;;  %1812 = vmatprep.mubr.f32.mxu0 %v7902_v11  ;;  %v6727_v40 = vpack.c.bf16 %v2333_v32, %v2332_v25  ;;  %v6737_v25 = vpack.c.bf16 %v2371_v39, %v2370_v7  ;;  %v2354_v32 = vld [vmem:[%s11225_s6 + $0x110] sm:$0xff] }
  0xbb   : > { %1707 = vmatprep.mubr.f32.mxu1 %v7924_v33  ;;  %6720 = vmatpush3.bf16.msra.mxu0 %v6719_v6  ;;  %v2401_v6 = vld [vmem:[%s11225_s6 + $0x288] sm:$0xff] }
  0xbc   : > { %6722 = vmatprep.subr.bf16.mxu0 %v6721_v31  ;;  %v6731_v31 = vpack.c.bf16 %v2335_v52, %v2334_v28  ;;  %v6765_v62 = vpack.c.bf16 %v2401_v6, %v2400_v18  ;;  %v8497_v28 = vld [vmem:[%s7637_s19 + $0x28] sm:$0xff]  ;;  %v2356_v52 = vld [vmem:[%s11225_s6 + $0x120] sm:$0xff] }
  0xbd   : > { %1813 = vmatmul.mubr.f32.gmra.mrb[58].mxu0 %v8183_v5  ;;  %v2357_v6 = vld [vmem:[%s11225_s6 + $0x128] sm:$0xff] }
  0xbe   : > { %1708 = vmatmul.mubr.f32.gmra.mrb[58].mxu1 %v7999_v48  ;;  %1817 = vmatprep.mubr.f32.mxu0 %v7927_v41  ;;  %v6743_v7 = vpack.c.bf16 %v2357_v6, %v2356_v52  ;;  %v2360_v6 = vld [vmem:[%s11225_s6 + $0x140] sm:$0xff] }
  0xbf   : > { %1712 = vmatprep.mubr.f32.mxu1 %v7942_v36  ;;  %6724 = vmatpush3.bf16.msra.mxu0 %v6723_v45  ;;  %v8475_v45 = vld [vmem:[%s7637_s19 + $0x8] sm:$0xff] }
  0xc0   : > { %6726 = vmatprep.subr.bf16.mxu0 %v6725_v8 }
  0xc1   : > { %1818 = vmatmul.mubr.f32.gmra.mrb[60].mxu0 %v8204_v12  ;;  %v2352_v12 = vld [vmem:[%s11225_s6 + $0x100] sm:$0xff] }
  0xc2   : > { %1713 = vmatmul.mubr.f32.gmra.mrb[60].mxu1 %v8021_v17  ;;  %1822 = vmatprep.mubr.f32.mxu0 %v7952_v54  ;;  %v6735_v8 = vpack.c.bf16 %v2353_v29, %v2352_v12  ;;  %v8508_v12 = vld [vmem:[%s7637_s19 + $0xc8] sm:$0xff]  ;;  %v2374_v29 = vld [vmem:[%s11225_s6 + $0x1b0] sm:$0xff] }
  0xc3   : > { %1717 = vmatprep.mubr.f32.mxu1 %v7977_v3  ;;  %6728 = vmatpush3.bf16.msra.mxu0 %v6727_v40  ;;  %v2373_v40 = vld [vmem:[%s11225_s6 + $0x1a8] sm:$0xff]  ;;  %v1117_v52 = vrot.slane %v8508_v12, 4 }
  0xc4   : > { %6730 = vmatprep.subr.bf16.mxu0 %v6729_v49  ;;  %v8492_v49 = vld [vmem:[%s7637_s19 + $0x10] sm:$0xff]  ;;  %v6741_v18 = vpack.c.bf16 %v2373_v40, %v2372_v15  ;;  %v2377_v40 = vld [vmem:[%s11225_s6 + $0x1c8] sm:$0xff] }
  0xc5   : > { %1823 = vmatmul.mubr.f32.gmra.mrb[62].mxu0 %v8226_v2  ;;  %v8528_v15 = vld [vmem:[%s7637_s19 + $0xd0] sm:$0xff]  ;;  %v7143_v2 = vld [vmem:[%s7523_s16 + $0xe8] sm:$0xff] }
  0xc6   : > { %1718 = vmatmul.mubr.f32.gmra.mrb[62].mxu1 %v8038_v35  ;;  %1827 = vmatprep.mubr.f32.mxu0 %v11374_v61  ;;  %11375 = vst [vmem:[#allocation48_spill] sm:$0xff] %v8528_v15 }
  0xc7   : > { %6373 = vmatprep.mubr.f32.mxu1 %v8475_v45  ;;  %6732 = vmatpush3.bf16.msra.mxu0 %v6731_v31  ;;  %v661_v31 = vld [vmem:[%s7637_s19 + $0xc0] sm:$0xff] }
  0xc8   : > { %6766 = vmatprep.subr.bf16.mxu0 %v6765_v62  ;;  %v2375_v62 = vld [vmem:[%s11225_s6 + $0x1b8] sm:$0xff]  ;;  %v1130_v39 = vrot.slane %v661_v31, 6 }
  0xc9   : > { %1828 = vmatmul.mubr.f32.gmra.mrb[64].mxu0 %v8272_v23  ;;  %v6739_v23 = vpack.c.bf16 %v2355_v51, %v2354_v32  ;;  %v2358_v32 = vld [vmem:[%s11225_s6 + $0x130] sm:$0xff]  ;;  %v2359_v51 = vld [vmem:[%s11225_s6 + $0x138] sm:$0xff] }
  0xca   : > { %6374 = vmatmul.mubr.f32.vlgmr.msra.gmra.mrb[64].mxu1 %v8492_v49  ;;  %1832 = vmatprep.mubr.f32.mxu0 %v7999_v48 }
  0xcb   : > { %6736 = vmatpush3.bf16.msra.mxu1 %v6735_v8  ;;  %6376 = vmatprep.mubr.f32.mxu1 %v8497_v28  ;;  %v1131_v8 = vrot.slane %v8508_v12, 6 }
  0xcc   : > { %6738 = vmatprep.subr.bf16.mxu1 %v6737_v25  ;;  %v6745_v25 = vpack.c.bf16 %v2375_v62, %v2374_v29  ;;  %v1133_v29 = vrot.slane %v8528_v15, 6 }
  0xcd   : > { %1833 = vmatmul.mubr.f32.gmra.mrb[66].mxu0 %v8288_v19  ;;  %v2402_v19 = vld [vmem:[%s11225_s6 + $0x290] sm:$0xff] }
  0xce   : > { %6377 = vmatmul.mubr.f32.gmra.mrb[66].mxu1 %v7770_v30  ;;  %1837 = vmatprep.mubr.f32.mxu0 %v8021_v17  ;;  %v2405_v30 = vld [vmem:[%s11225_s6 + $0x2a8] sm:$0xff] }
  0xcf   : > { %6740 = vmatpush3.bf16.msra.mxu1 %v6739_v23  ;;  %6379 = vmatprep.mubr.f32.mxu1 %v7789_v38  ;;  %v2376_v38 = vld [vmem:[%s11225_s6 + $0x1c0] sm:$0xff]  ;;  %v1116_v23 = vrot.slane %v661_v31, 4  ;;  %v2361_v31 = vld [vmem:[%s11225_s6 + $0x148] sm:$0xff] }
  0xd0   : > { %6742 = vmatprep.subr.bf16.mxu1 %v6741_v18  ;;  %v8542_v18 = vsel %vm711_vm0, %v1130_v39, %v1131_v8  ;;  %v6749_v62 = vpack.c.bf16 %v2377_v40, %v2376_v38  ;;  %v2379_v39 = vld [vmem:[%s11225_s6 + $0x1d8] sm:$0xff]  ;;  %v8568_v38 = vsel %vm711_vm0, %v1131_v8, %v1133_v29  ;;  %v1135_v40 = vrot.slane %v665_v50, 6  ;;  %v2381_v8 = vld [vmem:[%s11225_s6 + $0x1e8] sm:$0xff] }
  0xd1   : > { %1838 = vmatmul.mubr.f32.gmra.mrb[68].mxu0 %v8303_v57  ;;  %v6747_v57 = vpack.c.bf16 %v2359_v51, %v2358_v32  ;;  %11376 = vst [vmem:[#allocation49_spill] sm:$0xff] %v8542_v18  ;;  %v11253_v32 = vrot.slane %v8528_v15, 4  ;;  %v6751_v51 = vpack.c.bf16 %v2361_v31, %v2360_v6  ;;  %11377 = vst [vmem:[#allocation50_spill] sm:$0xff] %v8568_v38  ;;  %v1121_v29 = vrot.slane %v665_v50, 4  ;;  %v2365_v50 = vld [vmem:[%s11225_s6 + $0x168] sm:$0xff] }
  0xd2   : > { %6380 = vmatmul.mubr.f32.gmra.mrb[68].mxu1 %v7822_v0  ;;  %1842 = vmatprep.mubr.f32.mxu0 %v8038_v35  ;;  %v2136_v0 = vrot.slane %v7143_v2, 2  ;;  %v2437_v2 = vld [vmem:[%s11225_s6 + $0x3a8] sm:$0xff] }
  0xd3   : > { %6744 = vmatpush3.bf16.msra.mxu1 %v6743_v7  ;;  %6382 = vmatprep.mubr.f32.mxu1 %v7840_v4  ;;  %v8553_v7 = vld [vmem:[%s7637_s19 + $0xe8] sm:$0xff]  ;;  %v2378_v4 = vld [vmem:[%s11225_s6 + $0x1d0] sm:$0xff]  ;;  %v8591_v6 = vsel %vm1025_vm1, %v1117_v52, %v11253_v32 }
  0xd4   : > { %6746 = vmatprep.subr.bf16.mxu1 %v6745_v25  ;;  %v1118_v25 = vsel %vm1025_vm1, %v1116_v23, %v1117_v52  ;;  %v1136_v53 = vrot.slane %v8553_v7, 6  ;;  %v6753_v37 = vpack.c.bf16 %v2379_v39, %v2378_v4  ;;  %v2363_v23 = vld [vmem:[%s11225_s6 + $0x158] sm:$0xff]  ;;  %11379 = vst [vmem:[#allocation52_spill] sm:$0xff] %v8591_v6  ;;  %v2364_v39 = vld [vmem:[%s11225_s6 + $0x160] sm:$0xff] }
  0xd5   : > { %1843 = vmatmul.mubr.f32.gmra.mrb[70].mxu0 %v8319_v10  ;;  %v6755_v31 = vpack.c.bf16 %v2363_v23, %v2362_v22  ;;  %v613_v52 = vld [vmem:[%s7523_s16 + $0x40] sm:$0xff]  ;;  %v2383_v22 = vld [vmem:[%s11225_s6 + $0x1f8] sm:$0xff]  ;;  %v6759_v23 = vpack.c.bf16 %v2365_v50, %v2364_v39  ;;  %v7140_v39 = vld [vmem:[%s7523_s16 + $0xc8] sm:$0xff] }
  0xd6   : > { %6383 = vmatmul.mubr.f32.gmra.mrb[70].mxu1 %v7874_v43  ;;  %1847 = vmatprep.mubr.f32.mxu0 %v8542_v18  ;;  %v8596_v4 = vsel %vm711_vm0, %v1135_v40, %v1136_v53  ;;  %v2131_v50 = vrot.slane %v7140_v39, 2 }
  0xd7   : > { %6748 = vmatpush3.bf16.msra.mxu1 %v6747_v57  ;;  %6385 = vmatprep.mubr.f32.mxu1 %v7892_v58  ;;  %v8578_v57 = vld [vmem:[%s7637_s19 + $0xf0] sm:$0xff]  ;;  %v2380_v58 = vld [vmem:[%s11225_s6 + $0x1e0] sm:$0xff]  ;;  %11380 = vst [vmem:[#allocation53_spill] sm:$0xff] %v8596_v4 }
  0xd8   : > { %6750 = vmatprep.subr.bf16.mxu1 %v6749_v62  ;;  %11378 = vst [vmem:[#allocation51_spill] sm:$0xff] %v8578_v57  ;;  %v1122_v62 = vrot.slane %v8553_v7, 4  ;;  %v6757_v59 = vpack.c.bf16 %v2381_v8, %v2380_v58  ;;  %v11260_v40 = vrot.slane %v8578_v57, 4  ;;  %v2166_v8 = vrot.slane %v613_v52, 6 }
  0xd9   : > { %1848 = vmatmul.mubr.f32.gmra.mrb[72].mxu0 %v1118_v25  ;;  %v1138_v25 = vrot.slane %v8578_v57, 6 }
  0xda   : > { %6386 = vmatmul.mubr.f32.gmra.mrb[72].mxu1 %v7924_v33  ;;  %1852 = vmatprep.mubr.f32.mxu0 %v8568_v38 }
  0xdb   : > { %6752 = vmatpush3.bf16.msra.mxu1 %v6751_v51  ;;  %6388 = vmatprep.mubr.f32.mxu1 %v7942_v36  ;;  %v8607_v51 = vld [vmem:[%s7523_s16 + $0x48] sm:$0xff]  ;;  %v2382_v36 = vld [vmem:[%s11225_s6 + $0x1f0] sm:$0xff]  ;;  %v8622_v58 = vsel %vm711_vm0, %v1136_v53, %v1138_v25 }
  0xdc   : > { %6754 = vmatprep.subr.bf16.mxu1 %v6753_v37  ;;  %v1123_v37 = vsel %vm1025_vm1, %v1121_v29, %v1122_v62  ;;  %11381 = vst [vmem:[#allocation54_spill] sm:$0xff] %v8622_v58  ;;  %v2167_v32 = vrot.slane %v8607_v51, 6  ;;  %v6761_v42 = vpack.c.bf16 %v2383_v22, %v2382_v36  ;;  %v2367_v29 = vld [vmem:[%s11225_s6 + $0x178] sm:$0xff]  ;;  %v8634_v53 = vld [vmem:[%s7523_s16 + $0x50] sm:$0xff]  ;;  %v2433_v25 = vld [vmem:[%s11225_s6 + $0x388] sm:$0xff]  ;;  %v8647_v36 = vsel %vm1025_vm1, %v1122_v62, %v11260_v40 }
  0xdd   : > { %1853 = vmatmul.mubr.f32.gmra.mrb[74].mxu0 %v8591_v6  ;;  %v2366_v6 = vld [vmem:[%s11225_s6 + $0x170] sm:$0xff]  ;;  %11382 = vst [vmem:[#allocation55_spill] sm:$0xff] %v8647_v36  ;;  %v2110_v22 = vrot.slane %v613_v52, 2  ;;  %v2113_v10 = vrot.slane %v8634_v53, 2  ;;  %v2416_v62 = vld [vmem:[%s11225_s6 + $0x300] sm:$0xff]  ;;  %v2417_v52 = vld [vmem:[%s11225_s6 + $0x308] sm:$0xff] }
  0xde   : > { %6389 = vmatmul.mubr.f32.gmra.mrb[74].mxu1 %v7977_v3  ;;  %1857 = vmatprep.mubr.f32.mxu0 %v8596_v4  ;;  %v8656_v3 = vsel %vm711_vm0, %v2166_v8, %v2167_v32  ;;  %v616_v40 = vld [vmem:[%s7523_s16 + $0x58] sm:$0xff]  ;;  %v8674_v8 = vld [vmem:[%s7523_s16 + $0x68] sm:$0xff] }
  0xdf   : > { %6756 = vmatpush3.bf16.msra.mxu1 %v6755_v31  ;;  %6391 = vmatprep.mubr.f32.mxu1 %v8508_v12  ;;  %v7139_v31 = vld [vmem:[%s7523_s16 + $0xc0] sm:$0xff]  ;;  %v2188_v33 = vrot.slane %v616_v40, 2  ;;  %v2172_v40 = vrot.slane %v8674_v8, 6 }
  0xe0   : > { %6758 = vmatprep.subr.bf16.mxu1 %v6757_v59  ;;  %v2130_v12 = vrot.slane %v7139_v31, 2  ;;  %v2432_v59 = vld [vmem:[%s11225_s6 + $0x380] sm:$0xff]  ;;  %v8651_v31 = vld [vmem:[%s7523_s16 + $0xd0] sm:$0xff] }
  0xe1   : > { %1858 = vmatmul.mubr.f32.gmra.mrb[76].mxu0 %v1123_v37  ;;  %v2111_v37 = vrot.slane %v8607_v51, 2  ;;  %v11266_v39 = vrot.slane %v8651_v31, 2  ;;  %v2169_v51 = vrot.slane %v8634_v53, 6  ;;  %v2435_v53 = vld [vmem:[%s11225_s6 + $0x398] sm:$0xff] }
  0xe2   : > { %6392 = vmatmul.mubr.f32.gmra.mrb[76].mxu1 %v8528_v15  ;;  %1862 = vmatprep.mubr.f32.mxu0 %v8622_v58  ;;  %v6763_v15 = vpack.c.bf16 %v2367_v29, %v2366_v6  ;;  %v6797_v6 = vpack.c.bf16 %v2433_v25, %v2432_v59  ;;  %v2434_v29 = vld [vmem:[%s11225_s6 + $0x390] sm:$0xff]  ;;  %v6799_v25 = vpack.c.bf16 %v2417_v52, %v2416_v62 }
  0xe3   : > { %6760 = vmatpush3.bf16.msra.mxu1 %v6759_v23  ;;  %6394 = vmatprep.mubr.f32.mxu1 %v8553_v7  ;;  %v8668_v7 = vsel %vm2109_vm2, %v2130_v12, %v2131_v50  ;;  %v8671_v23 = vld [vmem:[%s7523_s16 + $0x60] sm:$0xff]  ;;  %v2385_v12 = vld [vmem:[%s11225_s6 + $0x208] sm:$0xff]  ;;  %v2112_v59 = vsel %vm2109_vm2, %v2110_v22, %v2111_v37  ;;  %v2114_v22 = vsel %vm2109_vm2, %v2111_v37, %v2113_v10  ;;  %v8711_v52 = vld [vmem:[%s7523_s16 + $0x70] sm:$0xff] }
  0xe4   : > { %6762 = vmatprep.subr.bf16.mxu1 %v6761_v42  ;;  %v2384_v42 = vld [vmem:[%s11225_s6 + $0x200] sm:$0xff]  ;;  %v8706_v62 = vsel %vm711_vm0, %v2167_v32, %v2169_v51  ;;  %v2418_v37 = vld [vmem:[%s11225_s6 + $0x310] sm:$0xff]  ;;  %v2419_v32 = vld [vmem:[%s11225_s6 + $0x318] sm:$0xff] }
  0xe5   : > { %1863 = vmatmul.mubr.f32.gmra.mrb[78].mxu0 %v8647_v36  ;;  %v8695_v36 = vsel %vm2109_vm2, %v2131_v50, %v11266_v39  ;;  %v2171_v50 = vrot.slane %v8671_v23, 6  ;;  %v7142_v39 = vld [vmem:[%s7523_s16 + $0xe0] sm:$0xff]  ;;  %v6767_v5 = vpack.c.bf16 %v2385_v12, %v2384_v42  ;;  %v2115_v42 = vrot.slane %v8671_v23, 2 }
  0xe6   : > { %6395 = vmatmul.mubr.f32.gmra.mrb[78].mxu1 %v8578_v57  ;;  %2528 = vmatprep.mubr.f32.mxu0 %v8656_v3  ;;  %v2403_v57 = vld [vmem:[%s11225_s6 + $0x298] sm:$0xff]  ;;  %v2135_v43 = vrot.slane %v7142_v39, 2  ;;  %v2436_v51 = vld [vmem:[%s11225_s6 + $0x3a0] sm:$0xff]  ;;  %v2116_v12 = vrot.slane %v8674_v8, 2  ;;  %v6803_v23 = vpack.c.bf16 %v2419_v32, %v2418_v37  ;;  %v2174_v8 = vrot.slane %v8711_v52, 6  ;;  %v2438_v37 = vld [vmem:[%s11225_s6 + $0x3b0] sm:$0xff] }
  0xe7   : > { %6764 = vmatpush3.bf16.msra.mxu1 %v6763_v15  ;;  %2673 = vmatprep.mubr.f32.mxu1 %v8668_v7  ;;  %v6801_v15 = vpack.c.bf16 %v2435_v53, %v2434_v29  ;;  %v6769_v39 = vpack.c.bf16 %v2403_v57, %v2402_v19  ;;  %v2387_v29 = vld [vmem:[%s11225_s6 + $0x218] sm:$0xff]  ;;  %v2189_v53 = vsel %vm2109_vm2, %v2113_v10, %v2188_v33  ;;  %v2404_v57 = vld [vmem:[%s11225_s6 + $0x2a0] sm:$0xff]  ;;  %v2118_v10 = vrot.slane %v8711_v52, 2 }
  0xe8   : > { %6798 = vmatprep.subr.bf16.mxu1 %v6797_v6  ;;  %v2386_v6 = vld [vmem:[%s11225_s6 + $0x210] sm:$0xff]  ;;  %v8749_v33 = vsel %vm711_vm0, %v2171_v50, %v2172_v40  ;;  %v620_v19 = vld [vmem:[%s7523_s16 + $0x78] sm:$0xff]  ;;  %v8755_v14 = vsel %vm2109_vm2, %v2135_v43, %v2136_v0  ;;  %v6805_v60 = vpack.c.bf16 %v2437_v2, %v2436_v51  ;;  %v2421_v50 = vld [vmem:[%s11225_s6 + $0x328] sm:$0xff] }
  0xe9   : > { %2529 = vmatmul.mubr.f32.vlgmr.msra.gmra.mrb[80].mxu0 %v2112_v59  ;;  %v8738_v59 = vld [vmem:[%s7523_s16 + $0xf0] sm:$0xff]  ;;  %v6771_v52 = vpack.c.bf16 %v2387_v29, %v2386_v6  ;;  %v2439_v43 = vld [vmem:[%s11225_s6 + $0x3b8] sm:$0xff]  ;;  %v2388_v32 = vld [vmem:[%s11225_s6 + $0x220] sm:$0xff]  ;;  %v2119_v6 = vsel %vm2109_vm2, %v2116_v12, %v2118_v10  ;;  %v8791_v29 = vsel %vm711_vm0, %v2172_v40, %v2174_v8 }
  0xea   : > { %2674 = vmatmul.mubr.f32.vlgmr.msra.gmra.mrb[80].mxu1 %v2114_v22  ;;  %2533 = vmatprep.mubr.f32.mxu0 %v8706_v62  ;;  %v2389_v51 = vld [vmem:[%s11225_s6 + $0x228] sm:$0xff]  ;;  %v6809_v56 = vpack.c.bf16 %v2439_v43, %v2438_v37  ;;  %v2440_v40 = vld [vmem:[%s11225_s6 + $0x3c0] sm:$0xff]  ;;  %v2391_v8 = vld [vmem:[%s11225_s6 + $0x238] sm:$0xff] }
  0xeb   : > { %6800 = vmatpush3.bf16.msra.mxu1 %v6799_v25  ;;  %2678 = vmatprep.mubr.f32.mxu1 %v8695_v36  ;;  %v2420_v25 = vld [vmem:[%s11225_s6 + $0x320] sm:$0xff]  ;;  %v7147_v37 = vld [vmem:[%s7523_s16 + $0x88] sm:$0xff] }
  0xec   : > { %6802 = vmatprep.subr.bf16.mxu1 %v6801_v15  ;;  %6768 = vmatpush3.bf16.msra.mxu0 %v6767_v5  ;;  %v6773_v15 = vpack.c.bf16 %v2405_v30, %v2404_v57  ;;  %v2117_v5 = vsel %vm2109_vm2, %v2115_v42, %v2116_v12  ;;  %v2406_v30 = vld [vmem:[%s11225_s6 + $0x2b0] sm:$0xff]  ;;  %v6807_v42 = vpack.c.bf16 %v2421_v50, %v2420_v25  ;;  %v2423_v12 = vld [vmem:[%s11225_s6 + $0x338] sm:$0xff]  ;;  %v7146_v25 = vld [vmem:[%s7523_s16 + $0x80] sm:$0xff] }
  0xed   : > { %2534 = vmatmul.mubr.f32.gmra.mrb[82].mxu0 %v2114_v22  ;;  %6770 = vmatprep.subr.bf16.mxu0 %v6769_v39  ;;  %v11383_v22 = vrot.slane %v8738_v59, 2  ;;  %v2407_v39 = vld [vmem:[%s11225_s6 + $0x2b8] sm:$0xff]  ;;  %v2120_v50 = vrot.slane %v7146_v25, 2  ;;  %v2408_v43 = vld [vmem:[%s11225_s6 + $0x2c0] sm:$0xff] }
  0xee   : > { %2679 = vmatmul.mubr.f32.gmra.mrb[82].mxu1 %v2189_v53  ;;  %2538 = vmatprep.mubr.f32.mxu0 %v8749_v33  ;;  %v2190_v53 = vrot.slane %v620_v19, 2  ;;  %v6775_v19 = vpack.c.bf16 %v2389_v51, %v2388_v32  ;;  %v7148_v51 = vld [vmem:[%s7523_s16 + $0x90] sm:$0xff] }
  0xef   : > { %v8780_v2 = vsel %vm2109_vm2, %v2136_v0, %v11383_v22  ;;  %2683 = vmatprep.mubr.f32.mxu1 %v8755_v14  ;;  %6804 = vmatpush3.bf16.msra.mxu1 %v6803_v23  ;;  %v7145_v0 = vld [vmem:[%s7637_s19] sm:$0xff]  ;;  %v2141_v22 = vrot.slane %v8475_v45, 2  ;;  %v6777_v45 = vpack.c.bf16 %v2407_v39, %v2406_v30  ;;  %v2390_v23 = vld [vmem:[%s11225_s6 + $0x230] sm:$0xff]  ;;  %v11277_v30 = vrot.slane %v8492_v49, 2  ;;  %v624_v39 = vld [vmem:[%s7523_s16 + $0x98] sm:$0xff] }
  0xf0   : > { %v2140_v57 = vrot.slane %v7145_v0, 2  ;;  %6806 = vmatprep.subr.bf16.mxu1 %v6805_v60  ;;  %6772 = vmatpush3.bf16.msra.mxu0 %v6771_v52  ;;  %v2441_v60 = vld [vmem:[%s11225_s6 + $0x3c8] sm:$0xff]  ;;  %v2121_v52 = vrot.slane %v7147_v37, 2  ;;  %v2191_v32 = vsel %vm2109_vm2, %v2118_v10, %v2190_v53  ;;  %v6811_v0 = vpack.c.bf16 %v2423_v12, %v2422_v13  ;;  %v2442_v53 = vld [vmem:[%s11225_s6 + $0x3d0] sm:$0xff]  ;;  %v2443_v13 = vld [vmem:[%s11225_s6 + $0x3d8] sm:$0xff] }
  0xf1   : > { %2539 = vmatmul.mubr.f32.gmra.mrb[84].mxu0 %v2117_v5  ;;  %6774 = vmatprep.subr.bf16.mxu0 %v6773_v15  ;;  %v2409_v15 = vld [vmem:[%s11225_s6 + $0x2c8] sm:$0xff]  ;;  %v2123_v5 = vrot.slane %v7148_v51, 2  ;;  %v6813_v37 = vpack.c.bf16 %v2441_v60, %v2440_v40  ;;  %v2411_v60 = vld [vmem:[%s11225_s6 + $0x2d8] sm:$0xff]  ;;  %v6817_v51 = vpack.c.bf16 %v2443_v13, %v2442_v53  ;;  %v11385_v53 = vld [vmem:[#allocation16_spill] sm:$0xff] }
  0xf2   : > { %2684 = vmatmul.mubr.f32.gmra.mrb[84].mxu1 %v2119_v6  ;;  %2543 = vmatprep.mubr.f32.mxu0 %v8791_v29  ;;  %v8828_v25 = vsel %vm2109_vm2, %v2140_v57, %v2141_v22  ;;  %v2425_v10 = vld [vmem:[%s11225_s6 + $0x348] sm:$0xff]  ;;  %v2392_v57 = vld [vmem:[%s11225_s6 + $0x240] sm:$0xff] }
  0xf3   : > { %2688 = vmatprep.mubr.f32.mxu1 %v8780_v2  ;;  %6808 = vmatpush3.bf16.msra.mxu1 %v6807_v42  ;;  %v6779_v42 = vpack.c.bf16 %v2391_v8, %v2390_v23  ;;  %v2393_v12 = vld [vmem:[%s11225_s6 + $0x248] sm:$0xff]  ;;  %v8861_v23 = vsel %vm2109_vm2, %v2141_v22, %v11277_v30  ;;  %v2192_v8 = vrot.slane %v624_v39, 2  ;;  %v2427_v22 = vld [vmem:[%s11225_s6 + $0x358] sm:$0xff] }
  0xf4   : > { %6810 = vmatprep.subr.bf16.mxu1 %v6809_v56  ;;  %6776 = vmatpush3.bf16.msra.mxu0 %v6775_v19  ;;  %v6781_v56 = vpack.c.bf16 %v2409_v15, %v2408_v43  ;;  %v11384_v40 = vld [vmem:[#allocation9_spill] sm:$0xff]  ;;  %v2410_v19 = vld [vmem:[%s11225_s6 + $0x2d0] sm:$0xff]  ;;  %v7149_v43 = vld [vmem:[%s7637_s19 + $0x20] sm:$0xff]  ;;  %v6783_v39 = vpack.c.bf16 %v2393_v12, %v2392_v57 }
  0xf5   : > { %2544 = vmatmul.mubr.f32.gmra.mrb[86].mxu0 %v2119_v6  ;;  %6778 = vmatprep.subr.bf16.mxu0 %v6777_v45  ;;  %v2122_v6 = vsel %vm2109_vm2, %v2120_v50, %v2121_v52  ;;  %v2124_v45 = vsel %vm2109_vm2, %v2121_v52, %v2123_v5  ;;  %v6815_v50 = vpack.c.bf16 %v2425_v10, %v2424_v27  ;;  %v2145_v15 = vrot.slane %v7149_v43, 2  ;;  %v2426_v52 = vld [vmem:[%s11225_s6 + $0x350] sm:$0xff]  ;;  %v2444_v27 = vld [vmem:[%s11225_s6 + $0x3e0] sm:$0xff]  ;;  %v2395_v10 = vld [vmem:[%s11225_s6 + $0x258] sm:$0xff] }
  0xf6   : > { %2689 = vmatmul.mubr.f32.gmra.mrb[86].mxu1 %v2191_v32  ;;  %2548 = vmatprep.mubr.f32.mxu0 %v11384_v40  ;;  %v2146_v32 = vrot.slane %v8497_v28, 2  ;;  %v2445_v28 = vld [vmem:[%s11225_s6 + $0x3e8] sm:$0xff]  ;;  %v2412_v12 = vld [vmem:[%s11225_s6 + $0x2e0] sm:$0xff]  ;;  %v628_v30 = vld [vmem:[%s7523_s16 + $0xb8] sm:$0xff]  ;;  %v6819_v34 = vpack.c.bf16 %v2427_v22, %v2426_v52 }
  0xf7   : > { %2693 = vmatprep.mubr.f32.mxu1 %v8828_v25  ;;  %6812 = vmatpush3.bf16.msra.mxu1 %v6811_v0  ;;  %v6785_v0 = vpack.c.bf16 %v2411_v60, %v2410_v19  ;;  %v2193_v19 = vsel %vm2109_vm2, %v2123_v5, %v2192_v8  ;;  %v7152_v60 = vld [vmem:[%s7523_s16 + $0xb0] sm:$0xff]  ;;  %v6821_v16 = vpack.c.bf16 %v2445_v28, %v2444_v27  ;;  %v2429_v5 = vld [vmem:[%s11225_s6 + $0x368] sm:$0xff]  ;;  %v2447_v52 = vld [vmem:[%s11225_s6 + $0x3f8] sm:$0xff] }
  0xf8   : > { %6814 = vmatprep.subr.bf16.mxu1 %v6813_v37  ;;  %6780 = vmatpush3.bf16.msra.mxu0 %v6779_v42  ;;  %v2394_v37 = vld [vmem:[%s11225_s6 + $0x250] sm:$0xff]  ;;  %v7150_v42 = vld [vmem:[%s7523_s16 + $0xa0] sm:$0xff]  ;;  %v2128_v43 = vrot.slane %v7152_v60, 2  ;;  %v2397_v22 = vld [vmem:[%s11225_s6 + $0x268] sm:$0xff] }
  0xf9   : > { %2549 = vmatmul.mubr.f32.gmra.mrb[88].mxu0 %v2122_v6  ;;  %6782 = vmatprep.subr.bf16.mxu0 %v6781_v56  ;;  %v2125_v13 = vrot.slane %v7150_v42, 2  ;;  %v7151_v56 = vld [vmem:[%s7523_s16 + $0xa8] sm:$0xff]  ;;  %v8897_v42 = vsel %vm2109_vm2, %v2145_v15, %v2146_v32  ;;  %v6787_v8 = vpack.c.bf16 %v2395_v10, %v2394_v37  ;;  %v11386_v27 = vld [vmem:[#allocation22_spill] sm:$0xff]  ;;  %v2415_v28 = vld [vmem:[%s11225_s6 + $0x2f8] sm:$0xff]  ;;  %v2194_v37 = vrot.slane %v628_v30, 2 }
  0xfa   : > { %2694 = vmatmul.mubr.f32.gmra.mrb[88].mxu1 %v2124_v45  ;;  %2553 = vmatprep.mubr.f32.mxu0 %v11385_v53  ;;  %v2126_v57 = vrot.slane %v7151_v56, 2  ;;  %v2413_v6 = vld [vmem:[%s11225_s6 + $0x2e8] sm:$0xff]  ;;  %v8900_v56 = vld [vmem:[%s7637_s19 + $0x30] sm:$0xff]  ;;  %v7154_v10 = vld [vmem:[%s7637_s19 + $0x40] sm:$0xff] }
  0xfb   : > { %2698 = vmatprep.mubr.f32.mxu1 %v8861_v23  ;;  %6816 = vmatpush3.bf16.msra.mxu1 %v6815_v50  ;;  %v11284_v26 = vrot.slane %v8900_v56, 2  ;;  %v2396_v50 = vld [vmem:[%s11225_s6 + $0x260] sm:$0xff]  ;;  %v6789_v15 = vpack.c.bf16 %v2413_v6, %v2412_v12  ;;  %v2212_v12 = vrot.slane %v7154_v10, 2  ;;  %v6823_v6 = vpack.c.bf16 %v2429_v5, %v2428_v47  ;;  %v2398_v47 = vld [vmem:[%s11225_s6 + $0x270] sm:$0xff]  ;;  %v2399_v30 = vld [vmem:[%s11225_s6 + $0x278] sm:$0xff] }
  0xfc   : > { %6818 = vmatprep.subr.bf16.mxu1 %v6817_v51  ;;  %6784 = vmatpush3.bf16.msra.mxu0 %v6783_v39  ;;  %v2446_v51 = vld [vmem:[%s11225_s6 + $0x3f0] sm:$0xff]  ;;  %v6791_v53 = vpack.c.bf16 %v2397_v22, %v2396_v50  ;;  %v3432_v5 = vld [vmem:[%s11226_s7 + $0x88] sm:$0xff]  ;;  %v2448_v50 = vld [vmem:[%s11225_s6 + $0x400] sm:$0xff]  ;;  %v6795_v10 = vpack.c.bf16 %v2399_v30, %v2398_v47 }
  0xfd   : > { %2554 = vmatmul.mubr.f32.gmra.mrb[90].mxu0 %v2124_v45  ;;  %6786 = vmatprep.subr.bf16.mxu0 %v6785_v0  ;;  %v2127_v45 = vsel %vm2109_vm2, %v2125_v13, %v2126_v57  ;;  %v2414_v39 = vld [vmem:[%s11225_s6 + $0x2f0] sm:$0xff]  ;;  %v2129_v0 = vsel %vm2109_vm2, %v2126_v57, %v2128_v43  ;;  %v8935_v13 = vsel %vm2109_vm2, %v2146_v32, %v11284_v26  ;;  %v3431_v32 = vld [vmem:[%s11226_s7 + $0x80] sm:$0xff]  ;;  %v636_v47 = vld [vmem:[%s7523_s16 + $0xf8] sm:$0xff] }
  0xfe   : > { %2699 = vmatmul.mubr.f32.gmra.mrb[90].mxu1 %v2193_v19  ;;  %2558 = vmatprep.mubr.f32.mxu0 %v11386_v27  ;;  %v7155_v19 = vld [vmem:[%s7637_s19 + $0x48] sm:$0xff]  ;;  %v6825_v27 = vpack.c.bf16 %v2447_v52, %v2446_v51  ;;  %v2430_v57 = vld [vmem:[%s11225_s6 + $0x370] sm:$0xff]  ;;  %v2195_v51 = vsel %vm2109_vm2, %v2128_v43, %v2194_v37  ;;  %v7160_v30 = vld [vmem:[%s7637_s19 + $0x80] sm:$0xff] }
  0xff   : > { %2703 = vmatprep.mubr.f32.mxu1 %v8897_v42  ;;  %6820 = vmatpush3.bf16.msra.mxu1 %v6819_v34  ;;  %v2213_v60 = vrot.slane %v7155_v19, 2  ;;  %v2431_v34 = vld [vmem:[%s11225_s6 + $0x378] sm:$0xff]  ;;  %v6861_v19 = vpack.c.bf16 %v3432_v5, %v3431_v32  ;;  %v2222_v32 = vrot.slane %v7160_v30, 2  ;;  %v7161_v5 = vld [vmem:[%s7637_s19 + $0x88] sm:$0xff] }
 0x100   : > { %6822 = vmatprep.subr.bf16.mxu1 %v6821_v16  ;;  %6788 = vmatpush3.bf16.msra.mxu0 %v6787_v8  ;;  %v6793_v16 = vpack.c.bf16 %v2415_v28, %v2414_v39  ;;  %v11387_v8 = vld [vmem:[#allocation26_spill] sm:$0xff]  ;;  %v6827_v52 = vpack.c.bf16 %v2431_v34, %v2430_v57  ;;  %v632_v28 = vld [vmem:[%s7523_s16 + $0xd8] sm:$0xff] }
 0x101   : > { %2559 = vmatmul.mubr.f32.gmra.mrb[92].mxu0 %v2127_v45  ;;  %6790 = vmatprep.subr.bf16.mxu0 %v6789_v15  ;;  %v2449_v15 = vld [vmem:[%s11225_s6 + $0x408] sm:$0xff]  ;;  %v8966_v22 = vsel %vm2109_vm2, %v2212_v12, %v2213_v60  ;;  %v8969_v45 = vld [vmem:[%s7637_s19 + $0x50] sm:$0xff]  ;;  %v2196_v43 = vrot.slane %v632_v28, 2 }
 0x102   : > { %2704 = vmatmul.mubr.f32.gmra.mrb[92].mxu1 %v2129_v0  ;;  %2563 = vmatprep.mubr.f32.mxu0 %v11387_v8  ;;  %v11288_v39 = vrot.slane %v8969_v45, 2  ;;  %v8973_v26 = vpack.c.bf16 %v2449_v15, %v2448_v50  ;;  %v8998_v34 = vld [vmem:[%s7637_s19 + $0x70] sm:$0xff]  ;;  %v2223_v50 = vrot.slane %v7161_v5, 2  ;;  %v11389_v15 = vrot.slane %v8738_v59, 2  ;;  %v3482_v8 = vld [vmem:[%s11226_s7 + $0x218] sm:$0xff] }
 0x103   : > { %2708 = vmatprep.mubr.f32.mxu1 %v8935_v13  ;;  %6824 = vmatpush3.bf16.msra.mxu1 %v6823_v6  ;;  %v11388_v6 = vrot.slane %v8651_v31, 2  ;;  %v2198_v31 = vrot.slane %v636_v47, 2  ;;  %v9026_v28 = vld [vmem:[%s7637_s19 + $0x90] sm:$0xff] }
 0x104   : > { %6826 = vmatprep.subr.bf16.mxu1 %v6825_v27  ;;  %6792 = vmatpush3.bf16.msra.mxu0 %v6791_v53  ;;  %v8980_v37 = vsel %vm2109_vm2, %v2213_v60, %v11288_v39  ;;  %v7157_v53 = vld [vmem:[%s7637_s19 + $0x60] sm:$0xff] }
 0x105   : > { %2564 = vmatmul.mubr.f32.gmra.mrb[94].mxu0 %v2129_v0  ;;  %6794 = vmatprep.subr.bf16.mxu0 %v6793_v16  ;;  %v2217_v27 = vrot.slane %v7157_v53, 2  ;;  %v7158_v0 = vld [vmem:[%s7637_s19 + $0x68] sm:$0xff]  ;;  %v8992_v60 = vsel %vm2109_vm2, %v11388_v6, %v2196_v43  ;;  %v7163_v43 = vld [vmem:[%s7637_s19 + $0xa0] sm:$0xff] }
 0x106   : > { %2709 = vmatmul.mubr.f32.gmra.mrb[94].mxu1 %v2195_v51  ;;  %2568 = vmatprep.mubr.f32.mxu0 %v7579_v1  ;;  %v2218_v12 = vrot.slane %v7158_v0, 2  ;;  %v9020_v51 = vsel %vm2109_vm2, %v11389_v15, %v2198_v31  ;;  %v2227_v53 = vrot.slane %v7163_v43, 2  ;;  %v9054_v31 = vld [vmem:[%s7637_s19 + $0xb0] sm:$0xff] }
 0x107   : > { %2713 = vmatprep.mubr.f32.mxu1 %v8966_v22  ;;  %6828 = vmatpush3.bf16.msra.mxu1 %v6827_v52  ;;  %v9023_v52 = vsel %vm2109_vm2, %v2222_v32, %v2223_v50  ;;  %v11285_v30 = vrot.slane %v9054_v31, 2  ;;  %v644_v32 = vld [vmem:[%s7637_s19 + $0x38] sm:$0xff] }
 0x108   : > { %6796 = vmatpush3.bf16.msra.mxu0 %v6795_v10  ;;  %6862 = vmatprep.subr.bf16.mxu1 %v6861_v19  ;;  %v8995_v57 = vsel %vm2109_vm2, %v2217_v27, %v2218_v12  ;;  %v11286_v10 = vrot.slane %v9026_v28, 2  ;;  %v7164_v27 = vld [vmem:[%s7637_s19 + $0xa8] sm:$0xff] }
 0x109   : > { %2569 = vmatmul.mubr.f32.gmra.mrb[96].mxu0 %v8668_v7  ;;  %6830 = vmatprep.subr.bf16.mxu0 %v8973_v26  ;;  %v11287_v7 = vrot.slane %v8998_v34, 2  ;;  %v2228_v0 = vrot.slane %v7164_v27, 2 }
 0x10a   : > { %2714 = vmatmul.mubr.f32.gmra.mrb[96].mxu1 %v8695_v36  ;;  %2573 = vmatprep.mubr.f32.mxu0 %v7685_v46  ;;  %v9037_v19 = vsel %vm2109_vm2, %v2223_v50, %v11286_v10 }
 0x10b   : > { %2718 = vmatprep.mubr.f32.mxu1 %v8980_v37  ;;  %v9009_v16 = vsel %vm2109_vm2, %v2218_v12, %v11287_v7  ;;  %v11390_v12 = vrot.slane %v8492_v49, 2  ;;  %v9051_v47 = vsel %vm2109_vm2, %v2227_v53, %v2228_v0  ;;  %v2451_v7 = vld [vmem:[%s11225_s6 + $0x418] sm:$0xff] }
 0x10d   : > { %2574 = vmatmul.mubr.f32.gmra.mrb[98].mxu0 %v8695_v36 }
 0x10e   : > { %2719 = vmatmul.mubr.f32.gmra.mrb[98].mxu1 %v8992_v60  ;;  %2578 = vmatprep.mubr.f32.mxu0 %v7712_v63 }
 0x10f   : > { %2723 = vmatprep.mubr.f32.mxu1 %v8995_v57 }
 0x111   : > { %2579 = vmatmul.mubr.f32.gmra.mrb[100].mxu0 %v8755_v14  ;;  %v640_v14 = vld [vmem:[%s7637_s19 + $0x18] sm:$0xff] }
 0x112   : > { %2724 = vmatmul.mubr.f32.gmra.mrb[100].mxu1 %v8780_v2  ;;  %2583 = vmatprep.mubr.f32.mxu0 %v7732_v9  ;;  %v2200_v59 = vrot.slane %v640_v14, 2  ;;  %v2202_v14 = vrot.slane %v644_v32, 2  ;;  %v11395_v32 = vrot.slane %v8900_v56, 2  ;;  %v3433_v56 = vld [vmem:[%s11226_s7 + $0x90] sm:$0xff] }
 0x113   : > { %2728 = vmatprep.mubr.f32.mxu1 %v9009_v16 }
 0x114   : > { %v9048_v6 = vsel %vm2109_vm2, %v11390_v12, %v2200_v59  ;;  %v9071_v59 = vsel %vm2109_vm2, %v2228_v0, %v11285_v30  ;;  %v9086_v0 = vsel %vm2109_vm2, %v11395_v32, %v2202_v14  ;;  %v3434_v14 = vld [vmem:[%s11226_s7 + $0x98] sm:$0xff]  ;;  %v2450_v32 = vld [vmem:[%s11225_s6 + $0x410] sm:$0xff] }
 0x115   : > { %2584 = vmatmul.mubr.f32.gmra.mrb[102].mxu0 %v8780_v2 }
 0x116   : > { %2729 = vmatmul.mubr.f32.gmra.mrb[102].mxu1 %v9020_v51  ;;  %2588 = vmatprep.mubr.f32.mxu0 %v7758_v20 }
 0x117   : > { %2733 = vmatprep.mubr.f32.mxu1 %v9023_v52 }
 0x119   : > { %2589 = vmatmul.mubr.f32.gmra.mrb[104].mxu0 %v8828_v25 }
 0x11a   : > { %2734 = vmatmul.mubr.f32.gmra.mrb[104].mxu1 %v8861_v23  ;;  %2593 = vmatprep.mubr.f32.mxu0 %v7799_v44 }
 0x11b   : > { %2738 = vmatprep.mubr.f32.mxu1 %v9037_v19 }
 0x11c   : > { %v9058_v25 = vpop.f32.mrb[0].mxu0 }
 0x11d   : > { %11391 = vst [vmem:[#allocation56_spill] sm:$0xff] %v9058_v25  ;;  %v5101_v5 = vpop.f32.mrb[0].mxu1  ;;  %2594 = vmatmul.mubr.f32.gmra.mrb[106].mxu0 %v8861_v23  ;;  %v9061_v50 = vpop.f32.mrb[1].mxu0 }
 0x11e   : > { %11392 = vst [vmem:[#allocation57_spill] sm:$0xff] %v9061_v50  ;;  %v5102_v15 = vpop.f32.mrb[1].mxu1  ;;  %2739 = vmatmul.mubr.f32.gmra.mrb[106].mxu1 %v9048_v6  ;;  %2598 = vmatprep.mubr.f32.mxu0 %v7812_v55 }
 0x11f   : > { %v9065_v49 = vadd.f32 %v5102_v15, %v5101_v5  ;;  %2743 = vmatprep.mubr.f32.mxu1 %v9051_v47  ;;  %v3416_v15 = vld [vmem:[%s11226_s7 + $0x8] sm:$0xff] }
 0x120   : > { %v9073_v43 = vpop.f32.mrb[2].mxu0 }
 0x121   : > { %11393 = vst [vmem:[#allocation58_spill] sm:$0xff] %v9073_v43  ;;  %v5104_v53 = vpop.f32.mrb[2].mxu1  ;;  %2599 = vmatmul.mubr.f32.gmra.mrb[108].mxu0 %v8897_v42  ;;  %v9076_v27 = vpop.f32.mrb[3].mxu0  ;;  %v3415_v42 = vld [vmem:[%s11226_s7] sm:$0xff] }
 0x122   : > { %11394 = vst [vmem:[#allocation59_spill] sm:$0xff] %v9076_v27  ;;  %v5105_v12 = vpop.f32.mrb[3].mxu1  ;;  %2744 = vmatmul.mubr.f32.gmra.mrb[108].mxu1 %v8935_v13  ;;  %2603 = vmatprep.mubr.f32.mxu0 %v7849_v24  ;;  %v3418_v27 = vld [vmem:[%s11226_s7 + $0x18] sm:$0xff] }
 0x123   : > { %v9080_v5 = vadd.f32 %v5105_v12, %v5104_v53  ;;  %2748 = vmatprep.mubr.f32.mxu1 %v9071_v59 }
 0x124   : > { %v9094_v30 = vpop.f32.mrb[4].mxu0 }
 0x125   : > { %11396 = vst [vmem:[#allocation60_spill] sm:$0xff] %v9094_v30  ;;  %v5107_v10 = vpop.f32.mrb[4].mxu1  ;;  %2604 = vmatmul.mubr.f32.gmra.mrb[110].mxu0 %v8935_v13  ;;  %v9097_v53 = vpop.f32.mrb[5].mxu0  ;;  %v6863_v30 = vpack.c.bf16 %v3416_v15, %v3415_v42  ;;  %v3436_v42 = vld [vmem:[%s11226_s7 + $0xa8] sm:$0xff]  ;;  %v6833_v15 = vpack.c.bf16 %v2451_v7, %v2450_v32 }
 0x126   : > { %11397 = vst [vmem:[#allocation61_spill] sm:$0xff] %v9097_v53  ;;  %v5108_v12 = vpop.f32.mrb[5].mxu1  ;;  %2749 = vmatmul.mubr.f32.gmra.mrb[110].mxu1 %v9086_v0  ;;  %2818 = vmatprep.mubr.f32.mxu0 %v8695_v36  ;;  %v6865_v53 = vpack.c.bf16 %v3434_v14, %v3433_v56  ;;  %v3417_v36 = vld [vmem:[%s11226_s7 + $0x10] sm:$0xff]  ;;  %v2452_v14 = vld [vmem:[%s11225_s6 + $0x420] sm:$0xff]  ;;  %v3420_v32 = vld [vmem:[%s11226_s7 + $0x28] sm:$0xff] }
 0x127   : > { %v9113_v39 = vadd.f32 %v5108_v12, %v5107_v10  ;;  %2963 = vmatprep.mubr.f32.mxu1 %v7877_v21  ;;  %v3435_v10 = vld [vmem:[%s11226_s7 + $0xa0] sm:$0xff]  ;;  %v2453_v12 = vld [vmem:[%s11225_s6 + $0x428] sm:$0xff] }
 0x128   : > { %v9116_v43 = vpop.f32.mrb[6].mxu0 }
 0x129   : > { %11398 = vst [vmem:[#allocation62_spill] sm:$0xff] %v9116_v43  ;;  %v5110_v25 = vpop.f32.mrb[6].mxu1  ;;  %2819 = vmatmul.mubr.f32.vlgmr.msra.gmra.mrb[112].mxu0 %v7579_v1  ;;  %v9125_v50 = vpop.f32.mrb[7].mxu0 }
 0x12a   : > { %11399 = vst [vmem:[#allocation63_spill] sm:$0xff] %v9125_v50  ;;  %v5111_v56 = vpop.f32.mrb[7].mxu1  ;;  %2964 = vmatmul.mubr.f32.vlgmr.msra.gmra.mrb[112].mxu1 %v8966_v22  ;;  %2823 = vmatprep.mubr.f32.mxu0 %v8992_v60  ;;  %v6867_v50 = vpack.c.bf16 %v3418_v27, %v3417_v36  ;;  %v6869_v22 = vpack.c.bf16 %v3436_v42, %v3435_v10  ;;  %v3419_v60 = vld [vmem:[%s11226_s7 + $0x20] sm:$0xff]  ;;  %v3437_v27 = vld [vmem:[%s11226_s7 + $0xb0] sm:$0xff]  ;;  %v2455_v42 = vld [vmem:[%s11225_s6 + $0x438] sm:$0xff] }
 0x12b   : > { %v9141_v43 = vadd.f32 %v5111_v56, %v5110_v25  ;;  %6864 = vmatpush3.bf16.msra.mxu1 %v6863_v30  ;;  %2968 = vmatprep.mubr.f32.mxu1 %v7902_v11  ;;  %v6837_v36 = vpack.c.bf16 %v2453_v12, %v2452_v14 }
 0x12c   : > { %6866 = vmatprep.subr.bf16.mxu1 %v6865_v53  ;;  %v9144_v7 = vpop.f32.mrb[8].mxu0  ;;  %6832 = vmatpush3.bf16.msra.mxu0 %v8973_v26  ;;  %v3438_v53 = vld [vmem:[%s11226_s7 + $0xb8] sm:$0xff]  ;;  %v2454_v26 = vld [vmem:[%s11225_s6 + $0x430] sm:$0xff] }
 0x12d   : > { %11400 = vst [vmem:[#allocation64_spill] sm:$0xff] %v9144_v7  ;;  %v5113_v25 = vpop.f32.mrb[8].mxu1  ;;  %2824 = vmatmul.mubr.f32.gmra.mrb[114].mxu0 %v7685_v46  ;;  %v9154_v30 = vpop.f32.mrb[9].mxu0  ;;  %6834 = vmatprep.subr.bf16.mxu0 %v6833_v15  ;;  %v6871_v7 = vpack.c.bf16 %v3420_v32, %v3419_v60  ;;  %v6873_v12 = vpack.c.bf16 %v3438_v53, %v3437_v27  ;;  %v2457_v27 = vld [vmem:[%s11225_s6 + $0x448] sm:$0xff] }
 0x12e   : > { %11401 = vst [vmem:[#allocation65_spill] sm:$0xff] %v9154_v30  ;;  %v5114_v10 = vpop.f32.mrb[9].mxu1  ;;  %2969 = vmatmul.mubr.f32.gmra.mrb[114].mxu1 %v8980_v37  ;;  %2828 = vmatprep.mubr.f32.mxu0 %v8780_v2  ;;  %v3421_v2 = vld [vmem:[%s11226_s7 + $0x30] sm:$0xff]  ;;  %v3422_v30 = vld [vmem:[%s11226_s7 + $0x38] sm:$0xff]  ;;  %v6841_v60 = vpack.c.bf16 %v2455_v42, %v2454_v26  ;;  %v3424_v42 = vld [vmem:[%s11226_s7 + $0x48] sm:$0xff] }
 0x12f   : > { %v9170_v56 = vadd.f32 %v5114_v10, %v5113_v25  ;;  %2973 = vmatprep.mubr.f32.mxu1 %v7927_v41  ;;  %6868 = vmatpush3.bf16.msra.mxu1 %v6867_v50  ;;  %v3439_v50 = vld [vmem:[%s11226_s7 + $0xc0] sm:$0xff]  ;;  %v6875_v10 = vpack.c.bf16 %v3422_v30, %v3421_v2  ;;  %v3442_v30 = vld [vmem:[%s11226_s7 + $0xd8] sm:$0xff] }
 0x130   : > { %v9173_v14 = vpop.f32.mrb[10].mxu0  ;;  %6870 = vmatprep.subr.bf16.mxu1 %v6869_v22  ;;  %6836 = vmatpush3.bf16.msra.mxu0 %v6833_v15  ;;  %v3440_v22 = vld [vmem:[%s11226_s7 + $0xc8] sm:$0xff]  ;;  %v2456_v15 = vld [vmem:[%s11225_s6 + $0x440] sm:$0xff] }
 0x131   : > { %11402 = vst [vmem:[#allocation66_spill] sm:$0xff] %v9173_v14  ;;  %v5116_v46 = vpop.f32.mrb[10].mxu1  ;;  %2829 = vmatmul.mubr.f32.gmra.mrb[116].mxu0 %v7712_v63  ;;  %v9182_v25 = vpop.f32.mrb[11].mxu0  ;;  %6838 = vmatprep.subr.bf16.mxu0 %v6837_v36 }
 0x132   : > { %11403 = vst [vmem:[#allocation67_spill] sm:$0xff] %v9182_v25  ;;  %v5117_v32 = vpop.f32.mrb[11].mxu1  ;;  %2974 = vmatmul.mubr.f32.gmra.mrb[116].mxu1 %v8995_v57  ;;  %2833 = vmatprep.mubr.f32.mxu0 %v9020_v51  ;;  %v6877_v57 = vpack.c.bf16 %v3440_v22, %v3439_v50  ;;  %v3423_v51 = vld [vmem:[%s11226_s7 + $0x40] sm:$0xff]  ;;  %v2459_v50 = vld [vmem:[%s11225_s6 + $0x458] sm:$0xff] }
 0x133   : > { %v9198_v53 = vadd.f32 %v5117_v32, %v5116_v46  ;;  %2978 = vmatprep.mubr.f32.mxu1 %v7952_v54  ;;  %6872 = vmatpush3.bf16.msra.mxu1 %v6871_v7  ;;  %v3441_v7 = vld [vmem:[%s11226_s7 + $0xd0] sm:$0xff] }
 0x134   : > { %v9201_v26 = vpop.f32.mrb[12].mxu0  ;;  %6874 = vmatprep.subr.bf16.mxu1 %v6873_v12  ;;  %6840 = vmatpush3.bf16.msra.mxu0 %v6837_v36  ;;  %v6845_v12 = vpack.c.bf16 %v2457_v27, %v2456_v15  ;;  %v2458_v36 = vld [vmem:[%s11225_s6 + $0x450] sm:$0xff]  ;;  %v6879_v15 = vpack.c.bf16 %v3424_v42, %v3423_v51  ;;  %v2460_v42 = vld [vmem:[%s11225_s6 + $0x460] sm:$0xff] }
 0x135   : > { %11404 = vst [vmem:[#allocation68_spill] sm:$0xff] %v9201_v26  ;;  %v5119_v46 = vpop.f32.mrb[12].mxu1  ;;  %2834 = vmatmul.mubr.f32.gmra.mrb[118].mxu0 %v7732_v9  ;;  %v9210_v32 = vpop.f32.mrb[13].mxu0  ;;  %6842 = vmatprep.subr.bf16.mxu0 %v6841_v60  ;;  %v3425_v26 = vld [vmem:[%s11226_s7 + $0x50] sm:$0xff] }
 0x136   : > { %11405 = vst [vmem:[#allocation69_spill] sm:$0xff] %v9210_v32  ;;  %v5120_v2 = vpop.f32.mrb[13].mxu1  ;;  %2979 = vmatmul.mubr.f32.gmra.mrb[118].mxu1 %v9009_v16  ;;  %2838 = vmatprep.mubr.f32.mxu0 %v8861_v23  ;;  %v6881_v23 = vpack.c.bf16 %v3442_v30, %v3441_v7  ;;  %v3426_v32 = vld [vmem:[%s11226_s7 + $0x58] sm:$0xff]  ;;  %v2461_v7 = vld [vmem:[%s11225_s6 + $0x468] sm:$0xff] }
 0x137   : > { %v9227_v22 = vadd.f32 %v5120_v2, %v5119_v46  ;;  %2983 = vmatprep.mubr.f32.mxu1 %v11374_v61  ;;  %6876 = vmatpush3.bf16.msra.mxu1 %v6875_v10  ;;  %v3443_v10 = vld [vmem:[%s11226_s7 + $0xe0] sm:$0xff]  ;;  %v6883_v2 = vpack.c.bf16 %v3426_v32, %v3425_v26  ;;  %v3445_v26 = vld [vmem:[%s11226_s7 + $0xf0] sm:$0xff]  ;;  %v3446_v32 = vld [vmem:[%s11226_s7 + $0xf8] sm:$0xff] }
 0x138   : > { %v9230_v27 = vpop.f32.mrb[14].mxu0  ;;  %6878 = vmatprep.subr.bf16.mxu1 %v6877_v57  ;;  %6844 = vmatpush3.bf16.msra.mxu0 %v6841_v60  ;;  %v3444_v57 = vld [vmem:[%s11226_s7 + $0xe8] sm:$0xff]  ;;  %v6849_v60 = vpack.c.bf16 %v2459_v50, %v2458_v36 }
 0x139   : > { %11406 = vst [vmem:[#allocation70_spill] sm:$0xff] %v9230_v27  ;;  %v5122_v14 = vpop.f32.mrb[14].mxu1  ;;  %2839 = vmatmul.mubr.f32.gmra.mrb[120].mxu0 %v7758_v20  ;;  %v9239_v46 = vpop.f32.mrb[15].mxu0  ;;  %6846 = vmatprep.subr.bf16.mxu0 %v6845_v12  ;;  %v3428_v50 = vld [vmem:[%s11226_s7 + $0x68] sm:$0xff] }
 0x13a   : > { %11407 = vst [vmem:[#allocation71_spill] sm:$0xff] %v9239_v46  ;;  %v5123_v51 = vpop.f32.mrb[15].mxu1  ;;  %2984 = vmatmul.mubr.f32.gmra.mrb[120].mxu1 %v9023_v52  ;;  %2843 = vmatprep.mubr.f32.mxu0 %v9048_v6  ;;  %v6885_v52 = vpack.c.bf16 %v3444_v57, %v3443_v10  ;;  %v3427_v6 = vld [vmem:[%s11226_s7 + $0x60] sm:$0xff]  ;;  %v2463_v10 = vld [vmem:[%s11225_s6 + $0x478] sm:$0xff] }
 0x13b   : > { %v9261_v30 = vadd.f32 %v5123_v51, %v5122_v14  ;;  %2988 = vmatprep.mubr.f32.mxu1 %v7999_v48  ;;  %6880 = vmatpush3.bf16.msra.mxu1 %v6879_v15  ;;  %v6853_v14 = vpack.c.bf16 %v2461_v7, %v2460_v42  ;;  %v6887_v51 = vpack.c.bf16 %v3428_v50, %v3427_v6 }
 0x13c   : > { %v5181_v36 = vpop.f32.mrb[16].mxu0  ;;  %6882 = vmatprep.subr.bf16.mxu1 %v6881_v23  ;;  %6848 = vmatpush3.bf16.msra.mxu0 %v6845_v12  ;;  %v2462_v23 = vld [vmem:[%s11225_s6 + $0x470] sm:$0xff]  ;;  %v6889_v7 = vpack.c.bf16 %v3446_v32, %v3445_v26  ;;  %v7166_v26 = vld [vmem:[%s7637_s19 + $0xc0] sm:$0xff] }
 0x13d   : > { %v5125_v27 = vpop.f32.mrb[16].mxu1  ;;  %v5182_v46 = vpop.f32.mrb[17].mxu0  ;;  %2844 = vmatmul.mubr.f32.gmra.mrb[122].mxu0 %v7799_v44  ;;  %6850 = vmatprep.subr.bf16.mxu0 %v6849_v60  ;;  %v2262_v32 = vrot.slane %v7166_v26, 2 }
 0x13e   : > { %v5126_v12 = vpop.f32.mrb[17].mxu1  ;;  %v5183_v15 = vadd.f32 %v5182_v46, %v5181_v36  ;;  %2989 = vmatmul.mubr.f32.gmra.mrb[122].mxu1 %v9037_v19  ;;  %2848 = vmatprep.mubr.f32.mxu0 %v8935_v13  ;;  %v648_v13 = vld [vmem:[%s7637_s19 + $0x58] sm:$0xff]  ;;  %v3429_v36 = vld [vmem:[%s11226_s7 + $0x70] sm:$0xff] }
 0x13f   : > { %v9291_v57 = vadd.f32 %v5126_v12, %v5125_v27  ;;  %2993 = vmatprep.mubr.f32.mxu1 %v8021_v17  ;;  %6884 = vmatpush3.bf16.msra.mxu1 %v6883_v2  ;;  %v3430_v27 = vld [vmem:[%s11226_s7 + $0x78] sm:$0xff]  ;;  %v2244_v25 = vrot.slane %v648_v13, 2 }
 0x140   : > { %v9295_v46 = vadd.f32 %v5183_v15, %v9065_v49  ;;  %v5184_v42 = vpop.f32.mrb[18].mxu0  ;;  %6886 = vmatprep.subr.bf16.mxu1 %v6885_v52  ;;  %6852 = vmatpush3.bf16.msra.mxu0 %v6849_v60  ;;  %v6857_v49 = vpack.c.bf16 %v2463_v10, %v2462_v23  ;;  %v3495_v60 = vld [vmem:[%s11226_s7 + $0x280] sm:$0xff]  ;;  %v3496_v52 = vld [vmem:[%s11226_s7 + $0x288] sm:$0xff] }
 0x141   : > { %v5128_v12 = vpop.f32.mrb[18].mxu1  ;;  %v5185_v2 = vpop.f32.mrb[19].mxu0  ;;  %2849 = vmatmul.mubr.f32.gmra.mrb[124].mxu0 %v7812_v55  ;;  %6854 = vmatprep.subr.bf16.mxu0 %v6853_v14  ;;  %v3463_v15 = vld [vmem:[%s11226_s7 + $0x180] sm:$0xff]  ;;  %v3464_v23 = vld [vmem:[%s11226_s7 + $0x188] sm:$0xff]  ;;  %v6925_v55 = vpack.c.bf16 %v3496_v52, %v3495_v60  ;;  %v11409_v60 = vrot.slane %v8969_v45, 2 }
 0x142   : > { %v5129_v6 = vpop.f32.mrb[19].mxu1  ;;  %v5186_v50 = vadd.f32 %v5185_v2, %v5184_v42  ;;  %2994 = vmatmul.mubr.f32.gmra.mrb[124].mxu1 %v9051_v47  ;;  %2853 = vmatprep.mubr.f32.mxu0 %v9086_v0  ;;  %v7167_v42 = vld [vmem:[%s7637_s19 + $0xc8] sm:$0xff]  ;;  %v6891_v47 = vpack.c.bf16 %v3430_v27, %v3429_v36  ;;  %v6893_v13 = vpack.c.bf16 %v3464_v23, %v3463_v15  ;;  %v652_v23 = vld [vmem:[%s7637_s19 + $0x78] sm:$0xff] }
 0x143   : > { %v9321_v10 = vadd.f32 %v5129_v6, %v5128_v12  ;;  %2998 = vmatprep.mubr.f32.mxu1 %v8038_v35  ;;  %v2263_v2 = vrot.slane %v7167_v42, 2  ;;  %6888 = vmatpush3.bf16.msra.mxu1 %v6887_v51  ;;  %v9345_v52 = vsel %vm2109_vm2, %v11409_v60, %v2244_v25  ;;  %v7169_v25 = vld [vmem:[%s7637_s19 + $0xe0] sm:$0xff]  ;;  %v9375_v60 = vld [vmem:[%s9362_s23 + $0x8] sm:$0xff] }
 0x144   : > { %v9326_v0 = vadd.f32 %v5186_v50, %v9080_v5  ;;  %v5187_v26 = vpop.f32.mrb[20].mxu0  ;;  %6890 = vmatprep.subr.bf16.mxu1 %v6889_v7  ;;  %6856 = vmatpush3.bf16.msra.mxu0 %v6853_v14  ;;  %v9335_v5 = vld [vmem:[%s7637_s19 + $0xd0] sm:$0xff] }
 0x145   : > { %v5131_v12 = vpop.f32.mrb[20].mxu1  ;;  %v5188_v6 = vpop.f32.mrb[21].mxu0  ;;  %2854 = vmatmul.mubr.f32.gmra.mrb[126].mxu0 %v7849_v24  ;;  %6858 = vmatprep.subr.bf16.mxu0 %v6857_v49  ;;  %v11292_v7 = vrot.slane %v9335_v5, 2  ;;  %v2264_v27 = vsel %vm2109_vm2, %v2262_v32, %v2263_v2 }
 0x146   : > { %v5132_v51 = vpop.f32.mrb[21].mxu1  ;;  %v5189_v36 = vadd.f32 %v5188_v6, %v5187_v26  ;;  %2999 = vmatmul.mubr.f32.gmra.mrb[126].mxu1 %v9071_v59  ;;  %2858 = vmatprep.mubr.f32.mxu0 %v8980_v37  ;;  %v2246_v6 = vrot.slane %v652_v23, 2  ;;  %v9380_v23 = vld [vmem:[%s7637_s19 + $0xf0] sm:$0xff] }
 0x147   : > { %v9338_v14 = vadd.f32 %v5132_v51, %v5131_v12  ;;  %3003 = vmatprep.mubr.f32.mxu1 %v8542_v18  ;;  %6892 = vmatpush3.bf16.msra.mxu1 %v6891_v47  ;;  %v7170_v47 = vld [vmem:[%s7637_s19 + $0xe8] sm:$0xff] }
 0x148   : > { %v9349_v50 = vadd.f32 %v5189_v36, %v9113_v39  ;;  %v5190_v15 = vpop.f32.mrb[22].mxu0  ;;  %6860 = vmatpush3.bf16.msra.mxu0 %v6857_v49  ;;  %6926 = vmatprep.subr.bf16.mxu1 %v6925_v55  ;;  %v9357_v39 = vsel %vm2109_vm2, %v2263_v2, %v11292_v7  ;;  %v2267_v49 = vrot.slane %v7169_v25, 2  ;;  %v2268_v12 = vrot.slane %v7170_v47, 2 }
 0x149   : > { %v5134_v42 = vpop.f32.mrb[22].mxu1  ;;  %v5191_v26 = vpop.f32.mrb[23].mxu0  ;;  %2859 = vmatmul.mubr.f32.gmra.mrb[128].mxu0 %v7877_v21  ;;  %6894 = vmatprep.subr.bf16.mxu0 %v6893_v13  ;;  %v2291_v7 = vrot.slane %v9375_v60, 6 }
 0x14a   : > { %v5135_v45 = vpop.f32.mrb[23].mxu1  ;;  %v5192_v32 = vadd.f32 %v5191_v26, %v5190_v15  ;;  %3004 = vmatmul.mubr.f32.gmra.mrb[128].mxu1 %v2264_v27  ;;  %2863 = vmatprep.mubr.f32.mxu0 %v9345_v52  ;;  %v669_v27 = vld [vmem:[%s9362_s23] sm:$0xff] }
 0x14b   : > { %v9364_v55 = vadd.f32 %v5135_v45, %v5134_v42  ;;  %3008 = vmatprep.mubr.f32.mxu1 %v8568_v38  ;;  %v2269_v45 = vsel %vm2109_vm2, %v2267_v49, %v2268_v12  ;;  %v656_v38 = vld [vmem:[%s7637_s19 + $0x98] sm:$0xff] }
 0x14c   : > { %v9370_v2 = vadd.f32 %v5192_v32, %v9141_v43  ;;  %v5193_v13 = vpop.f32.mrb[24].mxu0  ;;  %v11410_v32 = vrot.slane %v8998_v34, 2  ;;  %v11411_v34 = vrot.slane %v9380_v23, 2  ;;  %v2248_v18 = vrot.slane %v656_v38, 2 }
 0x14d   : > { %v5137_v51 = vpop.f32.mrb[24].mxu1  ;;  %v5194_v36 = vpop.f32.mrb[25].mxu0  ;;  %2864 = vmatmul.mubr.f32.gmra.mrb[130].mxu0 %v7902_v11 }
 0x14e   : > { %v5138_v15 = vpop.f32.mrb[25].mxu1  ;;  %v5195_v42 = vadd.f32 %v5194_v36, %v5193_v13  ;;  %3009 = vmatmul.mubr.f32.gmra.mrb[130].mxu1 %v9357_v39  ;;  %2868 = vmatprep.mubr.f32.mxu0 %v9009_v16  ;;  %v9390_v25 = vsel %vm2109_vm2, %v11410_v32, %v2246_v6  ;;  %v2290_v36 = vrot.slane %v669_v27, 6  ;;  %v2273_v32 = vrot.slane %v9375_v60, 2 }
 0x14f   : > { %v9383_v26 = vadd.f32 %v5138_v15, %v5137_v51  ;;  %3013 = vmatprep.mubr.f32.mxu1 %v8596_v4  ;;  %v9399_v15 = vld [vmem:[%s9362_s23 + $0x10] sm:$0xff] }
 0x150   : > { %v9393_v47 = vadd.f32 %v5195_v42, %v9170_v56  ;;  %v5196_v13 = vpop.f32.mrb[26].mxu0  ;;  %v9405_v56 = vsel %vm2109_vm2, %v2268_v12, %v11411_v34  ;;  %v2272_v42 = vrot.slane %v669_v27, 2 }
 0x151   : > { %v5140_v43 = vpop.f32.mrb[26].mxu1  ;;  %v5197_v51 = vpop.f32.mrb[27].mxu0  ;;  %2869 = vmatmul.mubr.f32.gmra.mrb[132].mxu0 %v7927_v41  ;;  %v2293_v41 = vrot.slane %v9399_v15, 6 }
 0x152   : > { %v5141_v49 = vpop.f32.mrb[27].mxu1  ;;  %v5198_v4 = vadd.f32 %v5197_v51, %v5196_v13  ;;  %3014 = vmatmul.mubr.f32.gmra.mrb[132].mxu1 %v2269_v45  ;;  %2873 = vmatprep.mubr.f32.mxu0 %v9390_v25  ;;  %v9415_v51 = vsel %vm711_vm0, %v2290_v36, %v2291_v7  ;;  %v11413_v36 = vrot.slane %v9026_v28, 2 }
 0x153   : > { %v9407_v6 = vadd.f32 %v5141_v49, %v5140_v43  ;;  %3018 = vmatprep.mubr.f32.mxu1 %v8622_v58  ;;  %11412 = vst [vmem:[#allocation72_spill] sm:$0xff] %v9415_v51  ;;  %v673_v43 = vld [vmem:[%s9362_s23 + $0x20] sm:$0xff]  ;;  %v9421_v49 = vld [vmem:[%s9362_s23 + $0x28] sm:$0xff]  ;;  %v9439_v58 = vsel %vm711_vm0, %v2291_v7, %v2293_v41  ;;  %v11415_v41 = vrot.slane %v9399_v15, 2 }
 0x154   : > { %v9412_v13 = vadd.f32 %v5198_v4, %v9198_v53  ;;  %v5199_v45 = vpop.f32.mrb[28].mxu0  ;;  %v2274_v53 = vsel %vm2109_vm2, %v2272_v42, %v2273_v32  ;;  %v9433_v34 = vsel %vm2109_vm2, %v11413_v36, %v2248_v18  ;;  %11414 = vst [vmem:[#allocation73_spill] sm:$0xff] %v9439_v58  ;;  %v9445_v42 = vld [vmem:[%s9362_s23 + $0x30] sm:$0xff]  ;;  %v2278_v36 = vrot.slane %v9421_v49, 2 }
 0x155   : > { %v5143_v11 = vpop.f32.mrb[28].mxu1  ;;  %v5200_v12 = vpop.f32.mrb[29].mxu0  ;;  %2874 = vmatmul.mubr.f32.gmra.mrb[134].mxu0 %v7952_v54  ;;  %v2295_v54 = vrot.slane %v673_v43, 6 }
 0x156   : > { %v5144_v27 = vpop.f32.mrb[29].mxu1  ;;  %v5201_v60 = vadd.f32 %v5200_v12, %v5199_v45  ;;  %3019 = vmatmul.mubr.f32.gmra.mrb[134].mxu1 %v9405_v56  ;;  %2878 = vmatprep.mubr.f32.mxu0 %v9037_v19 }
 0x157   : > { %v9426_v4 = vadd.f32 %v5144_v27, %v5143_v11  ;;  %3023 = vmatprep.mubr.f32.mxu1 %v9415_v51  ;;  %v2296_v11 = vrot.slane %v9421_v49, 6  ;;  %v660_v27 = vld [vmem:[%s7637_s19 + $0xb8] sm:$0xff] }
 0x158   : > { %v9436_v45 = vadd.f32 %v5201_v60, %v9227_v22  ;;  %v5202_v12 = vpop.f32.mrb[30].mxu0  ;;  %v9451_v22 = vsel %vm2109_vm2, %v2273_v32, %v11415_v41  ;;  %v2277_v60 = vrot.slane %v673_v43, 2  ;;  %v2250_v21 = vrot.slane %v660_v27, 2 }
 0x159   : > { %v5146_v38 = vpop.f32.mrb[30].mxu1  ;;  %v5203_v51 = vpop.f32.mrb[31].mxu0  ;;  %2879 = vmatmul.mubr.f32.gmra.mrb[136].mxu0 %v11374_v61  ;;  %v2298_v61 = vrot.slane %v9445_v42, 6  ;;  %v11417_v27 = vrot.slane %v9054_v31, 2  ;;  %v11306_v41 = vrot.slane %v9445_v42, 2 }
 0x15a   : > { %v5147_v28 = vpop.f32.mrb[31].mxu1  ;;  %v5204_v18 = vadd.f32 %v5203_v51, %v5202_v12  ;;  %3024 = vmatmul.mubr.f32.gmra.mrb[136].mxu1 %v2274_v53  ;;  %2883 = vmatprep.mubr.f32.mxu0 %v9433_v34  ;;  %v9461_v12 = vsel %vm711_vm0, %v2295_v54, %v2296_v11  ;;  %v2279_v54 = vsel %vm2109_vm2, %v2277_v60, %v2278_v36 }
 0x15b   : > { %v9453_v7 = vadd.f32 %v5147_v28, %v5146_v38  ;;  %3028 = vmatprep.mubr.f32.mxu1 %v9439_v58  ;;  %11416 = vst [vmem:[#allocation74_spill] sm:$0xff] %v9461_v12  ;;  %v9466_v38 = vld [vmem:[%s7523_s16] sm:$0xff]  ;;  %v9469_v28 = vld [vmem:[%s7523_s16 + $0x8] sm:$0xff]  ;;  %v9485_v58 = vsel %vm711_vm0, %v2296_v11, %v2298_v61 }
 0x15c   : > { %v9458_v51 = vadd.f32 %v5204_v18, %v9261_v30  ;;  %v5205_v53 = vpop.f32.mrb[32].mxu0  ;;  %v9478_v18 = vsel %vm2109_vm2, %v11417_v27, %v2250_v21  ;;  %11418 = vst [vmem:[#allocation75_spill] sm:$0xff] %v9485_v58  ;;  %v3447_v11 = vld [vmem:[%s11226_s7 + $0x100] sm:$0xff] }
 0x15d   : > { %v5261_v24 = vpop.f32.mrb[32].mxu1  ;;  %v5206_v32 = vpop.f32.mrb[33].mxu0  ;;  %2884 = vmatmul.mubr.f32.gmra.mrb[138].mxu0 %v7999_v48 }
 0x15e   : > { %v5207_v43 = vadd.f32 %v5206_v32, %v5205_v53  ;;  %v5262_v49 = vpop.f32.mrb[33].mxu1  ;;  %3029 = vmatmul.mubr.f32.gmra.mrb[138].mxu1 %v9451_v22  ;;  %2888 = vmatprep.mubr.f32.mxu0 %v9071_v59 }
 0x15f   : > { %v5263_v30 = vadd.f32 %v5262_v49, %v5261_v24  ;;  %3033 = vmatprep.mubr.f32.mxu1 %v9461_v12  ;;  %v3285_v24 = vrot.slane %v9466_v38, 6  ;;  %v3286_v49 = vrot.slane %v9469_v28, 6 }
 0x160   : > { %v9482_v53 = vadd.f32 %v5207_v43, %v9291_v57  ;;  %v5208_v32 = vpop.f32.mrb[34].mxu0  ;;  %v9495_v57 = vld [vmem:[%s7523_s16 + $0x10] sm:$0xff] }
 0x161   : > { %v9490_v60 = vadd.f32 %v5263_v30, %v9295_v46  ;;  %v5264_v31 = vpop.f32.mrb[34].mxu1  ;;  %v5209_v12 = vpop.f32.mrb[35].mxu0  ;;  %2889 = vmatmul.mubr.f32.gmra.mrb[140].mxu0 %v8021_v17  ;;  %v9501_v46 = vsel %vm2109_vm2, %v2278_v36, %v11306_v41  ;;  %v3479_v36 = vld [vmem:[%s11226_s7 + $0x200] sm:$0xff]  ;;  %v3466_v41 = vld [vmem:[%s11226_s7 + $0x198] sm:$0xff]  ;;  %v9534_v17 = vld [vmem:[%s7523_s16 + $0x28] sm:$0xff] }
 0x162   : > { %v5210_v21 = vadd.f32 %v5209_v12, %v5208_v32  ;;  %v5265_v27 = vpop.f32.mrb[35].mxu1  ;;  %3034 = vmatmul.mubr.f32.gmra.mrb[140].mxu1 %v2279_v54  ;;  %2893 = vmatprep.mubr.f32.mxu0 %v9478_v18  ;;  %v3448_v12 = vld [vmem:[%s11226_s7 + $0x108] sm:$0xff]  ;;  %v3287_v54 = vsel %vm711_vm0, %v3285_v24, %v3286_v49  ;;  %v3288_v24 = vrot.slane %v9495_v57, 6  ;;  %v3291_v1 = vrot.slane %v9534_v17, 6 }
 0x163   : > { %v5266_v61 = vadd.f32 %v5265_v27, %v5264_v31  ;;  %3038 = vmatprep.mubr.f32.mxu1 %v9485_v58  ;;  %v3480_v32 = vld [vmem:[%s11226_s7 + $0x208] sm:$0xff]  ;;  %v3465_v31 = vld [vmem:[%s11226_s7 + $0x190] sm:$0xff]  ;;  %v9531_v58 = vld [vmem:[%s7523_s16 + $0x20] sm:$0xff] }
 0x164   : > { %v9510_v43 = vadd.f32 %v5210_v21, %v9321_v10  ;;  %v5211_v30 = vpop.f32.mrb[36].mxu0  ;;  %v6927_v9 = vpack.c.bf16 %v3480_v32, %v3479_v36  ;;  %v3290_v63 = vrot.slane %v9531_v58, 6  ;;  %v9562_v36 = vld [vmem:[%s7523_s16 + $0x30] sm:$0xff] }
 0x165   : > { %v9523_v27 = vadd.f32 %v5266_v61, %v9326_v0  ;;  %v5267_v10 = vpop.f32.mrb[36].mxu1  ;;  %v5212_v21 = vpop.f32.mrb[37].mxu0  ;;  %2894 = vmatmul.mubr.f32.gmra.mrb[142].mxu0 %v8038_v35  ;;  %v6895_v0 = vpack.c.bf16 %v3448_v12, %v3447_v11  ;;  %v3497_v61 = vld [vmem:[%s11226_s7 + $0x290] sm:$0xff]  ;;  %v3498_v35 = vld [vmem:[%s11226_s7 + $0x298] sm:$0xff] }
 0x166   : > { %v5213_v48 = vadd.f32 %v5212_v21, %v5211_v30  ;;  %v5268_v44 = vpop.f32.mrb[37].mxu1  ;;  %3039 = vmatmul.mubr.f32.gmra.mrb[142].mxu1 %v9501_v46  ;;  %6429 = vmatprep.mubr.f32.mxu0 %v8980_v37  ;;  %v3449_v30 = vld [vmem:[%s11226_s7 + $0x110] sm:$0xff]  ;;  %v3450_v37 = vld [vmem:[%s11226_s7 + $0x118] sm:$0xff]  ;;  %v6897_v21 = vpack.c.bf16 %v3466_v41, %v3465_v31  ;;  %v3289_v41 = vsel %vm711_vm0, %v3286_v49, %v3288_v24  ;;  %v3451_v24 = vld [vmem:[%s11226_s7 + $0x120] sm:$0xff] }
 0x167   : > { %v5269_v20 = vadd.f32 %v5268_v44, %v5267_v10  ;;  %3623 = vmatprep.mubr.f32.mxu1 %v3287_v54  ;;  %v3467_v44 = vld [vmem:[%s11226_s7 + $0x1a0] sm:$0xff]  ;;  %v3468_v54 = vld [vmem:[%s11226_s7 + $0x1a8] sm:$0xff]  ;;  %v6929_v31 = vpack.c.bf16 %v3498_v35, %v3497_v61  ;;  %v3481_v10 = vld [vmem:[%s11226_s7 + $0x210] sm:$0xff] }
 0x168   : > { %v9551_v11 = vadd.f32 %v5213_v48, %v9338_v14  ;;  %v5214_v12 = vpop.f32.mrb[38].mxu0  ;;  %v3500_v35 = vld [vmem:[%s11226_s7 + $0x2a8] sm:$0xff]  ;;  %v6901_v49 = vpack.c.bf16 %v3468_v54, %v3467_v44  ;;  %v3501_v54 = vld [vmem:[%s11226_s7 + $0x2b0] sm:$0xff] }
 0x169   : > { %v9565_v32 = vadd.f32 %v5269_v20, %v9349_v50  ;;  %v5270_v48 = vpop.f32.mrb[38].mxu1  ;;  %v5215_v14 = vpop.f32.mrb[39].mxu0  ;;  %6430 = vmatmul.mubr.f32.vlgmr.msra.gmra.mrb[144].mxu0 %v9345_v52  ;;  %v6899_v20 = vpack.c.bf16 %v3450_v37, %v3449_v30  ;;  %v3499_v52 = vld [vmem:[%s11226_s7 + $0x2a0] sm:$0xff] }
 0x16a   : > { %11419 = vst [vmem:[#allocation76_spill] sm:$0xff] %v9551_v11  ;;  %v5216_v11 = vadd.f32 %v5215_v14, %v5214_v12  ;;  %v5271_v40 = vpop.f32.mrb[39].mxu1  ;;  %3624 = vmatmul.mubr.f32.vlgmr.msra.gmra.mrb[144].mxu1 %v9466_v38  ;;  %6896 = vmatpush3.bf16.msra.mxu0 %v6895_v0  ;;  %v3452_v38 = vld [vmem:[%s11226_s7 + $0x128] sm:$0xff]  ;;  %v3293_v0 = vrot.slane %v9562_v36, 6 }
 0x16b   : > { %v5272_v50 = vadd.f32 %v5271_v40, %v5270_v48  ;;  %6928 = vmatpush3.bf16.msra.mxu1 %v6927_v9  ;;  %6432 = vmatprep.mubr.f32.mxu0 %v9009_v16  ;;  %v3292_v9 = vsel %vm711_vm0, %v3290_v63, %v3291_v1  ;;  %v6931_v40 = vpack.c.bf16 %v3482_v8, %v3481_v10  ;;  %v3469_v16 = vld [vmem:[%s11226_s7 + $0x1b0] sm:$0xff]  ;;  %v3483_v63 = vld [vmem:[%s11226_s7 + $0x220] sm:$0xff]  ;;  %v3484_v8 = vld [vmem:[%s11226_s7 + $0x228] sm:$0xff] }
 0x16c   : > { %v9591_v61 = vadd.f32 %v5216_v11, %v9364_v55  ;;  %v5217_v30 = vpop.f32.mrb[40].mxu0  ;;  %3628 = vmatprep.mubr.f32.mxu1 %v3289_v41  ;;  %6898 = vmatprep.subr.bf16.mxu0 %v6897_v21  ;;  %v3470_v55 = vld [vmem:[%s11226_s7 + $0x1b8] sm:$0xff]  ;;  %v6933_v11 = vpack.c.bf16 %v3500_v35, %v3499_v52  ;;  %v3294_v41 = vsel %vm711_vm0, %v3291_v1, %v3293_v0  ;;  %v3471_v1 = vld [vmem:[%s11226_s7 + $0x1c0] sm:$0xff] }
 0x16d   : > { %v9598_v37 = vadd.f32 %v5272_v50, %v9370_v2  ;;  %v5273_v12 = vpop.f32.mrb[40].mxu1  ;;  %v5218_v44 = vpop.f32.mrb[41].mxu0  ;;  %6433 = vmatmul.mubr.f32.gmra.mrb[146].mxu0 %v9390_v25  ;;  %6930 = vmatprep.subr.bf16.mxu1 %v6929_v31  ;;  %v6903_v25 = vpack.c.bf16 %v3452_v38, %v3451_v24  ;;  %v3502_v48 = vld [vmem:[%s11226_s7 + $0x2b8] sm:$0xff]  ;;  %v3453_v31 = vld [vmem:[%s11226_s7 + $0x130] sm:$0xff]  ;;  %v6905_v50 = vpack.c.bf16 %v3470_v55, %v3469_v16 }
 0x16e   : > { %v5219_v2 = vadd.f32 %v5218_v44, %v5217_v30  ;;  %v5274_v21 = vpop.f32.mrb[41].mxu1  ;;  %3629 = vmatmul.mubr.f32.gmra.mrb[146].mxu1 %v9469_v28  ;;  %6900 = vmatpush3.bf16.msra.mxu0 %v6899_v20  ;;  %v3454_v10 = vld [vmem:[%s11226_s7 + $0x138] sm:$0xff]  ;;  %v3485_v30 = vld [vmem:[%s11226_s7 + $0x230] sm:$0xff]  ;;  %v3504_v44 = vld [vmem:[%s11226_s7 + $0x2c8] sm:$0xff] }
 0x16f   : > { %v5275_v14 = vadd.f32 %v5274_v21, %v5273_v12  ;;  %6435 = vmatprep.mubr.f32.mxu0 %v9037_v19  ;;  %3633 = vmatprep.mubr.f32.mxu1 %v3292_v9  ;;  %v664_v20 = vld [vmem:[%s7637_s19 + $0xd8] sm:$0xff]  ;;  %v6935_v19 = vpack.c.bf16 %v3484_v8, %v3483_v63  ;;  %v3503_v12 = vld [vmem:[%s11226_s7 + $0x2c0] sm:$0xff] }
 0x170   : > { %v9627_v52 = vadd.f32 %v5219_v2, %v9383_v26  ;;  %v5220_v35 = vpop.f32.mrb[42].mxu0  ;;  %6902 = vmatprep.subr.bf16.mxu0 %v6901_v49  ;;  %6932 = vmatpush3.bf16.msra.mxu1 %v6931_v40  ;;  %v3472_v26 = vld [vmem:[%s11226_s7 + $0x1c8] sm:$0xff]  ;;  %v6937_v49 = vpack.c.bf16 %v3502_v48, %v3501_v54  ;;  %v2308_v16 = vrot.slane %v664_v20, 2  ;;  %v668_v63 = vld [vmem:[%s7637_s19 + $0xf8] sm:$0xff] }
 0x171   : > { %v9633_v24 = vadd.f32 %v5275_v14, %v9393_v47  ;;  %v5276_v38 = vpop.f32.mrb[42].mxu1  ;;  %v5221_v0 = vpop.f32.mrb[43].mxu0  ;;  %6436 = vmatmul.mubr.f32.gmra.mrb[148].mxu0 %v9433_v34  ;;  %6934 = vmatprep.subr.bf16.mxu1 %v6933_v11  ;;  %v3486_v47 = vld [vmem:[%s11226_s7 + $0x238] sm:$0xff]  ;;  %v6907_v34 = vpack.c.bf16 %v3454_v10, %v3453_v31  ;;  %v3455_v11 = vld [vmem:[%s11226_s7 + $0x140] sm:$0xff]  ;;  %v6909_v21 = vpack.c.bf16 %v3472_v26, %v3471_v1  ;;  %v2310_v1 = vrot.slane %v668_v63, 2 }
 0x172   : > { %v5222_v9 = vadd.f32 %v5221_v0, %v5220_v35  ;;  %v5277_v40 = vpop.f32.mrb[43].mxu1  ;;  %3634 = vmatmul.mubr.f32.gmra.mrb[148].mxu1 %v9531_v58  ;;  %6904 = vmatpush3.bf16.msra.mxu0 %v6903_v25  ;;  %v3456_v58 = vld [vmem:[%s11226_s7 + $0x148] sm:$0xff]  ;;  %v6939_v25 = vpack.c.bf16 %v3486_v47, %v3485_v30  ;;  %v3487_v31 = vld [vmem:[%s11226_s7 + $0x240] sm:$0xff]  ;;  %v3458_v26 = vld [vmem:[%s11226_s7 + $0x158] sm:$0xff]  ;;  %v11421_v63 = vrot.slane %v9380_v23, 2 }
 0x173   : > { %v5278_v55 = vadd.f32 %v5277_v40, %v5276_v38  ;;  %6438 = vmatprep.mubr.f32.mxu0 %v9071_v59  ;;  %3638 = vmatprep.mubr.f32.mxu1 %v3294_v41  ;;  %v3473_v59 = vld [vmem:[%s11226_s7 + $0x1d0] sm:$0xff]  ;;  %v6941_v41 = vpack.c.bf16 %v3504_v44, %v3503_v12  ;;  %v3506_v38 = vld [vmem:[%s11226_s7 + $0x2d8] sm:$0xff]  ;;  %v3459_v23 = vld [vmem:[%s11226_s7 + $0x160] sm:$0xff] }
 0x174   : > { %v9661_v8 = vadd.f32 %v5222_v9, %v9407_v6  ;;  %v5223_v2 = vpop.f32.mrb[44].mxu0  ;;  %6906 = vmatprep.subr.bf16.mxu0 %v6905_v50  ;;  %6936 = vmatpush3.bf16.msra.mxu1 %v6935_v19  ;;  %v3474_v6 = vld [vmem:[%s11226_s7 + $0x1d8] sm:$0xff]  ;;  %v6911_v50 = vpack.c.bf16 %v3456_v58, %v3455_v11  ;;  %v3505_v19 = vld [vmem:[%s11226_s7 + $0x2d0] sm:$0xff]  ;;  %v7172_v58 = vld [vmem:[%s7523_s16 + $0x40] sm:$0xff] }
 0x175   : > { %v9667_v54 = vadd.f32 %v5278_v55, %v9412_v13  ;;  %v5279_v48 = vpop.f32.mrb[44].mxu1  ;;  %v5224_v14 = vpop.f32.mrb[45].mxu0  ;;  %6439 = vmatmul.mubr.f32.gmra.mrb[150].mxu0 %v9478_v18  ;;  %6938 = vmatprep.subr.bf16.mxu1 %v6937_v49  ;;  %v3488_v13 = vld [vmem:[%s11226_s7 + $0x248] sm:$0xff]  ;;  %v11420_v18 = vrot.slane %v9335_v5, 2  ;;  %v3457_v5 = vld [vmem:[%s11226_s7 + $0x150] sm:$0xff]  ;;  %v672_v49 = vld [vmem:[%s9362_s23 + $0x18] sm:$0xff]  ;;  %v6913_v9 = vpack.c.bf16 %v3474_v6, %v3473_v59  ;;  %v6945_v12 = vpack.c.bf16 %v3506_v38, %v3505_v19 }
 0x176   : > { %v5225_v10 = vadd.f32 %v5224_v14, %v5223_v2  ;;  %v5280_v20 = vpop.f32.mrb[45].mxu1  ;;  %3639 = vmatmul.mubr.f32.gmra.mrb[150].mxu1 %v9534_v17  ;;  %6908 = vmatpush3.bf16.msra.mxu0 %v6907_v34  ;;  %v3489_v44 = vld [vmem:[%s11226_s7 + $0x250] sm:$0xff]  ;;  %v3490_v55 = vld [vmem:[%s11226_s7 + $0x258] sm:$0xff]  ;;  %v2311_v2 = vsel %vm2109_vm2, %v11421_v63, %v2310_v1  ;;  %v2312_v59 = vrot.slane %v672_v49, 2  ;;  %v3460_v6 = vld [vmem:[%s11226_s7 + $0x168] sm:$0xff] }
 0x177   : > { %v2309_v35 = vsel %vm2109_vm2, %v11420_v18, %v2308_v16  ;;  %v5281_v0 = vadd.f32 %v5280_v20, %v5279_v48  ;;  %6441 = vmatprep.mubr.f32.mxu0 %v9357_v39  ;;  %3643 = vmatprep.mubr.f32.mxu1 %v8656_v3  ;;  %v3475_v3 = vld [vmem:[%s11226_s7 + $0x1e0] sm:$0xff]  ;;  %v6943_v39 = vpack.c.bf16 %v3488_v13, %v3487_v31  ;;  %v3508_v48 = vld [vmem:[%s11226_s7 + $0x2e8] sm:$0xff]  ;;  %v3494_v63 = vld [vmem:[%s11226_s7 + $0x278] sm:$0xff] }
 0x178   : > { %v9699_v30 = vadd.f32 %v5225_v10, %v9426_v4  ;;  %v5226_v47 = vpop.f32.mrb[46].mxu0  ;;  %6910 = vmatprep.subr.bf16.mxu0 %v6909_v21  ;;  %6940 = vmatpush3.bf16.msra.mxu1 %v6939_v25  ;;  %v3476_v4 = vld [vmem:[%s11226_s7 + $0x1e8] sm:$0xff]  ;;  %v6915_v21 = vpack.c.bf16 %v3458_v26, %v3457_v5  ;;  %v3507_v25 = vld [vmem:[%s11226_s7 + $0x2e0] sm:$0xff]  ;;  %v11422_v5 = vrot.slane %v9399_v15, 2  ;;  %v6919_v49 = vpack.c.bf16 %v3460_v6, %v3459_v23  ;;  %v3461_v15 = vld [vmem:[%s11226_s7 + $0x170] sm:$0xff] }
 0x179   : > { %v9705_v40 = vadd.f32 %v5281_v0, %v9436_v45  ;;  %v5282_v34 = vpop.f32.mrb[46].mxu1  ;;  %v5227_v16 = vpop.f32.mrb[47].mxu0  ;;  %6442 = vmatmul.mubr.f32.gmra.mrb[152].mxu0 %v2309_v35  ;;  %6942 = vmatprep.subr.bf16.mxu1 %v6941_v41  ;;  %v676_v41 = vld [vmem:[%s9362_s23 + $0x38] sm:$0xff]  ;;  %v6917_v10 = vpack.c.bf16 %v3476_v4, %v3475_v3  ;;  %v3491_v1 = vld [vmem:[%s11226_s7 + $0x260] sm:$0xff]  ;;  %v3492_v19 = vld [vmem:[%s11226_s7 + $0x268] sm:$0xff]  ;;  %v3301_v23 = vrot.slane %v9469_v28, 4 }
 0x17a   : > { %v5228_v45 = vadd.f32 %v5227_v16, %v5226_v47  ;;  %v5283_v11 = vpop.f32.mrb[47].mxu1  ;;  %3644 = vmatmul.mubr.f32.gmra.mrb[152].mxu1 %v7172_v58  ;;  %6912 = vmatpush3.bf16.msra.mxu0 %v6911_v50  ;;  %v6949_v50 = vpack.c.bf16 %v3508_v48, %v3507_v25  ;;  %v9754_v0 = vld [vmem:[%s7523_s16 + $0x48] sm:$0xff]  ;;  %v2313_v26 = vsel %vm2109_vm2, %v11422_v5, %v2312_v59  ;;  %v2314_v47 = vrot.slane %v676_v41, 2  ;;  %v3510_v3 = vld [vmem:[%s11226_s7 + $0x2f8] sm:$0xff]  ;;  %v7174_v59 = vld [vmem:[%s7523_s16 + $0x60] sm:$0xff] }
 0x17b   : > { %v5284_v14 = vadd.f32 %v5283_v11, %v5282_v34  ;;  %6444 = vmatprep.mubr.f32.mxu0 %v9405_v56  ;;  %3648 = vmatprep.mubr.f32.mxu1 %v8706_v62  ;;  %v3477_v62 = vld [vmem:[%s11226_s7 + $0x1f0] sm:$0xff]  ;;  %v6947_v56 = vpack.c.bf16 %v3490_v55, %v3489_v44  ;;  %v3462_v34 = vld [vmem:[%s11226_s7 + $0x178] sm:$0xff]  ;;  %v11423_v25 = vrot.slane %v9445_v42, 2  ;;  %v3543_v6 = vld [vmem:[%s11226_s7 + $0x400] sm:$0xff] }
 0x17c   : > { %v9736_v31 = vadd.f32 %v5228_v45, %v9453_v7  ;;  %v5341_v13 = vpop.f32.mrb[48].mxu0  ;;  %6914 = vmatprep.subr.bf16.mxu0 %v6913_v9  ;;  %6944 = vmatpush3.bf16.msra.mxu1 %v6943_v39  ;;  %v3478_v7 = vld [vmem:[%s11226_s7 + $0x1f8] sm:$0xff]  ;;  %v3509_v9 = vld [vmem:[%s11226_s7 + $0x2f0] sm:$0xff]  ;;  %v3544_v41 = vld [vmem:[%s11226_s7 + $0x408] sm:$0xff] }
 0x17d   : > { %v9742_v20 = vadd.f32 %v5284_v14, %v9458_v51  ;;  %v5285_v18 = vpop.f32.mrb[48].mxu1  ;;  %v5342_v35 = vpop.f32.mrb[49].mxu0  ;;  %6445 = vmatmul.mubr.f32.gmra.mrb[154].mxu0 %v2311_v2  ;;  %6946 = vmatprep.subr.bf16.mxu1 %v6945_v12  ;;  %v6921_v4 = vpack.c.bf16 %v3478_v7, %v3477_v62  ;;  %v6951_v12 = vpack.c.bf16 %v3492_v19, %v3491_v1  ;;  %v3528_v2 = vld [vmem:[%s11226_s7 + $0x388] sm:$0xff]  ;;  %v3530_v1 = vld [vmem:[%s11226_s7 + $0x398] sm:$0xff] }
 0x17e   : > { %v5286_v38 = vpop.f32.mrb[49].mxu1  ;;  %v5343_v51 = vadd.f32 %v5342_v35, %v5341_v13  ;;  %3649 = vmatmul.mubr.f32.gmra.mrb[154].mxu1 %v9754_v0  ;;  %6916 = vmatpush3.bf16.msra.mxu0 %v6915_v21  ;;  %v6953_v58 = vpack.c.bf16 %v3510_v3, %v3509_v9  ;;  %v2315_v48 = vsel %vm2109_vm2, %v11423_v25, %v2314_v47  ;;  %v9836_v47 = vld [vmem:[%s7523_s16 + $0xc0] sm:$0xff] }
 0x17f   : > { %v5287_v39 = vadd.f32 %v5286_v38, %v5285_v18  ;;  %6447 = vmatprep.mubr.f32.mxu0 %v9451_v22  ;;  %3653 = vmatprep.mubr.f32.mxu1 %v8749_v33  ;;  %v3493_v33 = vld [vmem:[%s11226_s7 + $0x270] sm:$0xff]  ;;  %v3302_v22 = vrot.slane %v9495_v57, 4  ;;  %v6923_v14 = vpack.c.bf16 %v3462_v34, %v3461_v15  ;;  %v3511_v18 = vld [vmem:[%s11226_s7 + $0x300] sm:$0xff] }
 0x180   : > { %v5344_v16 = vpop.f32.mrb[50].mxu0  ;;  %6918 = vmatprep.subr.bf16.mxu0 %v6917_v10  ;;  %6948 = vmatpush3.bf16.msra.mxu1 %v6947_v56  ;;  %v9775_v44 = vadd.f32 %v5343_v51, %v9490_v60  ;;  %v3527_v60 = vld [vmem:[%s11226_s7 + $0x380] sm:$0xff]  ;;  %v608_v10 = vld [vmem:[%s7523_s16 + $0x18] sm:$0xff]  ;;  %v6955_v62 = vpack.c.bf16 %v3494_v63, %v3493_v33  ;;  %v9828_v51 = vld [vmem:[%s7523_s16 + $0x68] sm:$0xff] }
 0x181   : > { %v9782_v55 = vadd.f32 %v5287_v39, %v9482_v53  ;;  %v5288_v45 = vpop.f32.mrb[50].mxu1  ;;  %v5345_v11 = vpop.f32.mrb[51].mxu0  ;;  %6448 = vmatmul.mubr.f32.gmra.mrb[156].mxu0 %v2313_v26  ;;  %6950 = vmatprep.subr.bf16.mxu1 %v6949_v50  ;;  %v6957_v56 = vpack.c.bf16 %v3528_v2, %v3527_v60  ;;  %v3529_v50 = vld [vmem:[%s11226_s7 + $0x390] sm:$0xff]  ;;  %v3304_v5 = vrot.slane %v608_v10, 4  ;;  %v7177_v60 = vld [vmem:[%s7523_s16 + $0x80] sm:$0xff]  ;;  %v9860_v2 = vld [vmem:[%s7523_s16 + $0xc8] sm:$0xff] }
 0x182   : > { %v5289_v53 = vpop.f32.mrb[51].mxu1  ;;  %v5346_v21 = vadd.f32 %v5345_v11, %v5344_v16  ;;  %3654 = vmatmul.mubr.f32.gmra.mrb[156].mxu1 %v7174_v59  ;;  %6920 = vmatpush3.bf16.msra.mxu0 %v6919_v49  ;;  %v11424_v49 = vld [vmem:[#allocation9_spill] sm:$0xff]  ;;  %v6961_v15 = vpack.c.bf16 %v3530_v1, %v3529_v50  ;;  %v3513_v34 = vld [vmem:[%s11226_s7 + $0x310] sm:$0xff]  ;;  %v3514_v16 = vld [vmem:[%s11226_s7 + $0x318] sm:$0xff]  ;;  %v3307_v59 = vrot.slane %v9562_v36, 4 }
 0x183   : > { %v5290_v13 = vadd.f32 %v5289_v53, %v5288_v45  ;;  %6450 = vmatprep.mubr.f32.mxu0 %v9501_v46  ;;  %3658 = vmatprep.mubr.f32.mxu1 %v8791_v29  ;;  %v3512_v46 = vld [vmem:[%s11226_s7 + $0x308] sm:$0xff]  ;;  %v3305_v53 = vsel %vm1025_vm1, %v3302_v22, %v3304_v5  ;;  %v11427_v50 = vld [vmem:[#allocation22_spill] sm:$0xff] }
 0x184   : > { %v5347_v42 = vpop.f32.mrb[52].mxu0  ;;  %6922 = vmatprep.subr.bf16.mxu0 %v6921_v4  ;;  %6952 = vmatpush3.bf16.msra.mxu1 %v6951_v12  ;;  %v9808_v28 = vadd.f32 %v5346_v21, %v9523_v27  ;;  %v9819_v27 = vpack.c.bf16 %v3544_v41, %v3543_v6  ;;  %v6959_v9 = vpack.c.bf16 %v3512_v46, %v3511_v18  ;;  %v11425_v4 = vld [vmem:[#allocation76_spill] sm:$0xff]  ;;  %v3532_v11 = vld [vmem:[%s11226_s7 + $0x3a8] sm:$0xff]  ;;  %v3306_v21 = vrot.slane %v9534_v17, 4  ;;  %v3517_v5 = vld [vmem:[%s11226_s7 + $0x330] sm:$0xff] }
 0x185   : > { %v9817_v29 = vadd.f32 %v5290_v13, %v9510_v43  ;;  %v5291_v35 = vpop.f32.mrb[52].mxu1  ;;  %v5348_v7 = vpop.f32.mrb[53].mxu0  ;;  %6451 = vmatmul.mubr.f32.gmra.mrb[158].mxu0 %v2315_v48  ;;  %6954 = vmatprep.subr.bf16.mxu1 %v6953_v58  ;;  %v3303_v43 = vsel %vm1025_vm1, %v3301_v23, %v3302_v22  ;;  %v11426_v48 = vld [vmem:[#allocation16_spill] sm:$0xff]  ;;  %v6963_v23 = vpack.c.bf16 %v3514_v16, %v3513_v34  ;;  %v3516_v36 = vld [vmem:[%s11226_s7 + $0x328] sm:$0xff] }
 0x186   : > { %v5292_v19 = vpop.f32.mrb[53].mxu1  ;;  %v5349_v38 = vadd.f32 %v5348_v7, %v5347_v42  ;;  %3659 = vmatmul.mubr.f32.gmra.mrb[158].mxu1 %v9828_v51  ;;  %6924 = vmatpush3.bf16.msra.mxu0 %v6923_v14  ;;  %v612_v14 = vld [vmem:[%s7523_s16 + $0x38] sm:$0xff]  ;;  %v3515_v17 = vld [vmem:[%s11226_s7 + $0x320] sm:$0xff]  ;;  %v7179_v18 = vld [vmem:[%s7523_s16 + $0x88] sm:$0xff] }
 0x187   : > { %v5293_v26 = vadd.f32 %v5292_v19, %v5291_v35  ;;  %3663 = vmatprep.mubr.f32.mxu1 %v11424_v49  ;;  %3768 = vmatprep.mubr.f32.mxu0 %v9836_v47  ;;  %v3534_v42 = vld [vmem:[%s11226_s7 + $0x3b8] sm:$0xff]  ;;  %v9890_v46 = vld [vmem:[%s7523_s16 + $0xe0] sm:$0xff]  ;;  %v3309_v35 = vrot.slane %v612_v14, 4  ;;  %v6967_v1 = vpack.c.bf16 %v3516_v36, %v3515_v17  ;;  %v7184_v36 = vld [vmem:[%s7523_s16 + $0xa8] sm:$0xff] }
 0x188   : > { %v5350_v3 = vpop.f32.mrb[54].mxu0  ;;  %v9840_v39 = vadd.f32 %v5349_v38, %v9565_v32  ;;  %6956 = vmatpush3.bf16.msra.mxu1 %v6955_v62  ;;  %6958 = vmatprep.subr.bf16.mxu0 %v6957_v56  ;;  %v3531_v32 = vld [vmem:[%s11226_s7 + $0x3a0] sm:$0xff] }
 0x189   : > { %v9849_v12 = vadd.f32 %v5293_v26, %v11425_v4  ;;  %v5294_v33 = vpop.f32.mrb[54].mxu1  ;;  %v5351_v45 = vpop.f32.mrb[55].mxu0  ;;  %3769 = vmatmul.mubr.f32.vlgmr.msra.gmra.mrb[160].mxu0 %v3303_v43  ;;  %6990 = vmatprep.subr.bf16.mxu1 %v9819_v27  ;;  %v6965_v57 = vpack.c.bf16 %v3532_v11, %v3531_v32  ;;  %v3518_v26 = vld [vmem:[%s11226_s7 + $0x338] sm:$0xff]  ;;  %v7181_v4 = vld [vmem:[%s7523_s16 + $0xa0] sm:$0xff]  ;;  %v7183_v32 = vld [vmem:[%s7523_s16 + $0x50] sm:$0xff] }
 0x18a   : > { %v5295_v58 = vpop.f32.mrb[55].mxu1  ;;  %v5352_v63 = vadd.f32 %v5351_v45, %v5350_v3  ;;  %3664 = vmatmul.mubr.f32.gmra.mrb[160].mxu1 %v7177_v60  ;;  %3773 = vmatprep.mubr.f32.mxu0 %v9860_v2  ;;  %v3311_v45 = vrot.slane %v9754_v0, 4  ;;  %v3312_v11 = vrot.slane %v7183_v32, 4  ;;  %v6971_v60 = vpack.c.bf16 %v3518_v26, %v3517_v5  ;;  %v3519_v0 = vld [vmem:[%s11226_s7 + $0x340] sm:$0xff]  ;;  %v3540_v5 = vld [vmem:[%s11226_s7 + $0x3e8] sm:$0xff] }
 0x18b   : > { %v5296_v25 = vadd.f32 %v5295_v58, %v5294_v33  ;;  %3668 = vmatprep.mubr.f32.mxu1 %v11426_v48  ;;  %6960 = vmatpush3.bf16.msra.mxu0 %v6959_v9  ;;  %v9915_v33 = vld [vmem:[%s7523_s16 + $0xe8] sm:$0xff] }
 0x18c   : > { %v5353_v6 = vpop.f32.mrb[56].mxu0  ;;  %v9871_v41 = vadd.f32 %v5352_v63, %v9598_v37  ;;  %6962 = vmatprep.subr.bf16.mxu0 %v6961_v15  ;;  %v3533_v37 = vld [vmem:[%s11226_s7 + $0x3b0] sm:$0xff]  ;;  %v3536_v15 = vld [vmem:[%s11226_s7 + $0x3c8] sm:$0xff] }
 0x18d   : > { %v9880_v22 = vadd.f32 %v5296_v25, %v9591_v61  ;;  %v5297_v13 = vpop.f32.mrb[56].mxu1  ;;  %v5354_v10 = vpop.f32.mrb[57].mxu0  ;;  %3774 = vmatmul.mubr.f32.gmra.mrb[162].mxu0 %v3305_v53  ;;  %v3308_v61 = vsel %vm1025_vm1, %v3306_v21, %v3307_v59  ;;  %v6969_v43 = vpack.c.bf16 %v3534_v42, %v3533_v37  ;;  %v11428_v63 = vld [vmem:[#allocation26_spill] sm:$0xff] }
 0x18e   : > { %v5298_v62 = vpop.f32.mrb[57].mxu1  ;;  %v5355_v56 = vadd.f32 %v5354_v10, %v5353_v6  ;;  %3669 = vmatmul.mubr.f32.gmra.mrb[162].mxu1 %v7179_v18  ;;  %3778 = vmatprep.mubr.f32.mxu0 %v9890_v46  ;;  %v3538_v6 = vld [vmem:[%s11226_s7 + $0x3d8] sm:$0xff] }
 0x18f   : > { %v5299_v7 = vadd.f32 %v5298_v62, %v5297_v13  ;;  %3673 = vmatprep.mubr.f32.mxu1 %v11427_v50  ;;  %6964 = vmatpush3.bf16.msra.mxu0 %v6963_v23  ;;  %v7185_v13 = vld [vmem:[%s7637_s19] sm:$0xff]  ;;  %v7186_v10 = vld [vmem:[%s7523_s16 + $0x58] sm:$0xff] }
 0x190   : > { %v5356_v19 = vpop.f32.mrb[58].mxu0  ;;  %v9896_v38 = vadd.f32 %v5355_v56, %v9633_v24  ;;  %6966 = vmatprep.subr.bf16.mxu0 %v6965_v57  ;;  %v3535_v24 = vld [vmem:[%s11226_s7 + $0x3c0] sm:$0xff]  ;;  %v3314_v37 = vrot.slane %v7186_v10, 4  ;;  %v3522_v50 = vld [vmem:[%s11226_s7 + $0x358] sm:$0xff] }
 0x191   : > { %v9905_v49 = vadd.f32 %v5299_v7, %v9627_v52  ;;  %v5300_v9 = vpop.f32.mrb[58].mxu1  ;;  %v5357_v3 = vpop.f32.mrb[59].mxu0  ;;  %3779 = vmatmul.mubr.f32.gmra.mrb[164].mxu0 %v3308_v61  ;;  %v3310_v52 = vsel %vm1025_vm1, %v3307_v59, %v3309_v35  ;;  %v6973_v25 = vpack.c.bf16 %v3536_v15, %v3535_v24  ;;  %v3520_v59 = vld [vmem:[%s11226_s7 + $0x348] sm:$0xff]  ;;  %v11429_v62 = vld [vmem:[#allocation8_spill] sm:$0xff]  ;;  %v3521_v7 = vld [vmem:[%s11226_s7 + $0x350] sm:$0xff]  ;;  %v3316_v24 = vrot.slane %v9828_v51, 4 }
 0x192   : > { %v5301_v34 = vpop.f32.mrb[59].mxu1  ;;  %v5358_v16 = vadd.f32 %v5357_v3, %v5356_v19  ;;  %3674 = vmatmul.mubr.f32.gmra.mrb[164].mxu1 %v7181_v4  ;;  %3783 = vmatprep.mubr.f32.mxu0 %v9915_v33  ;;  %v6975_v56 = vpack.c.bf16 %v3520_v59, %v3519_v0  ;;  %v7187_v3 = vld [vmem:[%s7637_s19 + $0x8] sm:$0xff]  ;;  %v7188_v15 = vld [vmem:[%s7523_s16 + $0x70] sm:$0xff] }
 0x193   : > { %v5302_v58 = vadd.f32 %v5301_v34, %v5300_v9  ;;  %3678 = vmatprep.mubr.f32.mxu1 %v11428_v63  ;;  %6968 = vmatpush3.bf16.msra.mxu0 %v6967_v1  ;;  %v3317_v34 = vrot.slane %v7188_v15, 4  ;;  %v11430_v4 = vld [vmem:[#allocation13_spill] sm:$0xff] }
 0x194   : > { %v5359_v53 = vpop.f32.mrb[60].mxu0  ;;  %v9923_v21 = vadd.f32 %v5358_v16, %v9667_v54  ;;  %6970 = vmatprep.subr.bf16.mxu0 %v6969_v43  ;;  %v3537_v54 = vld [vmem:[%s11226_s7 + $0x3d0] sm:$0xff]  ;;  %v3524_v51 = vld [vmem:[%s11226_s7 + $0x368] sm:$0xff] }
 0x195   : > { %v9932_v48 = vadd.f32 %v5302_v58, %v9661_v8  ;;  %v5303_v14 = vpop.f32.mrb[60].mxu1  ;;  %v5360_v23 = vpop.f32.mrb[61].mxu0  ;;  %3784 = vmatmul.mubr.f32.gmra.mrb[166].mxu0 %v3310_v52  ;;  %v3313_v8 = vsel %vm1025_vm1, %v3311_v45, %v3312_v11  ;;  %v6977_v35 = vpack.c.bf16 %v3538_v6, %v3537_v54  ;;  %v6979_v52 = vpack.c.bf16 %v3522_v50, %v3521_v7 }
 0x196   : > { %v5304_v57 = vpop.f32.mrb[61].mxu1  ;;  %v5361_v17 = vadd.f32 %v5360_v23, %v5359_v53  ;;  %3679 = vmatmul.mubr.f32.gmra.mrb[166].mxu1 %v7184_v36  ;;  %3788 = vmatprep.mubr.f32.mxu0 %v7185_v13  ;;  %v3542_v53 = vld [vmem:[%s11226_s7 + $0x3f8] sm:$0xff]  ;;  %v3525_v13 = vld [vmem:[%s11226_s7 + $0x370] sm:$0xff] }
 0x197   : > { %v5305_v42 = vadd.f32 %v5304_v57, %v5303_v14  ;;  %3683 = vmatprep.mubr.f32.mxu1 %v11429_v62  ;;  %6972 = vmatpush3.bf16.msra.mxu0 %v6971_v60  ;;  %v3318_v14 = vsel %vm1025_vm1, %v3316_v24, %v3317_v34  ;;  %v7190_v23 = vld [vmem:[%s7523_s16 + $0x78] sm:$0xff] }
 0x198   : > { %v5362_v18 = vpop.f32.mrb[62].mxu0  ;;  %v9946_v61 = vadd.f32 %v5361_v17, %v9705_v40  ;;  %6974 = vmatprep.subr.bf16.mxu0 %v6973_v25  ;;  %v3539_v40 = vld [vmem:[%s11226_s7 + $0x3e0] sm:$0xff]  ;;  %v3319_v54 = vrot.slane %v7190_v23, 4  ;;  %v11431_v57 = vld [vmem:[#allocation15_spill] sm:$0xff]  ;;  %v7195_v23 = vld [vmem:[%s7637_s19 + $0x48] sm:$0xff] }
 0x199   : > { %v9955_v1 = vadd.f32 %v5305_v42, %v9699_v30  ;;  %v5306_v19 = vpop.f32.mrb[62].mxu1  ;;  %v5363_v43 = vpop.f32.mrb[63].mxu0  ;;  %3789 = vmatmul.mubr.f32.gmra.mrb[168].mxu0 %v3313_v8  ;;  %v3315_v30 = vsel %vm1025_vm1, %v3312_v11, %v3314_v37  ;;  %v3523_v11 = vld [vmem:[%s11226_s7 + $0x360] sm:$0xff] }
 0x19a   : > { %v5307_v26 = vpop.f32.mrb[63].mxu1  ;;  %v5364_v9 = vadd.f32 %v5363_v43, %v5362_v18  ;;  %3684 = vmatmul.mubr.f32.gmra.mrb[168].mxu1 %v9836_v47  ;;  %3793 = vmatprep.mubr.f32.mxu0 %v7187_v3  ;;  %v6981_v47 = vpack.c.bf16 %v3540_v5, %v3539_v40  ;;  %v6983_v17 = vpack.c.bf16 %v3524_v51, %v3523_v11  ;;  %v4390_v37 = vld [vmem:[%s11227_s8 + $0x80] sm:$0xff]  ;;  %v7192_v5 = vld [vmem:[%s7523_s16 + $0xd8] sm:$0xff]  ;;  %v11434_v51 = vld [vmem:[#allocation10_spill] sm:$0xff] }
 0x19b   : > { %v5308_v16 = vadd.f32 %v5307_v26, %v5306_v19  ;;  %3688 = vmatprep.mubr.f32.mxu1 %v11430_v4  ;;  %6976 = vmatpush3.bf16.msra.mxu0 %v6975_v56  ;;  %v3320_v7 = vsel %vm1025_vm1, %v3317_v34, %v3319_v54  ;;  %v11432_v19 = vld [vmem:[#allocation17_spill] sm:$0xff]  ;;  %v3325_v26 = vrot.slane %v7192_v5, 4  ;;  %v7193_v34 = vld [vmem:[%s7637_s19 + $0x40] sm:$0xff]  ;;  %v11437_v54 = vld [vmem:[#allocation11_spill] sm:$0xff] }
 0x19c   : > { %v5365_v45 = vpop.f32.mrb[64].mxu0  ;;  %v9970_v32 = vadd.f32 %v5364_v9, %v9742_v20  ;;  %6978 = vmatprep.subr.bf16.mxu0 %v6977_v35  ;;  %v3541_v20 = vld [vmem:[%s11226_s7 + $0x3f0] sm:$0xff]  ;;  %v7191_v35 = vld [vmem:[%s7637_s19 + $0x28] sm:$0xff] }
 0x19d   : > { %v9979_v58 = vadd.f32 %v5308_v16, %v9736_v31  ;;  %v6375_v63 = vpop.f32.mrb[64].mxu1  ;;  %v5366_v60 = vpop.f32.mrb[65].mxu0  ;;  %3794 = vmatmul.mubr.f32.gmra.mrb[170].mxu0 %v3315_v30  ;;  %v7189_v31 = vld [vmem:[%s7637_s19 + $0x20] sm:$0xff]  ;;  %v3546_v30 = vld [vmem:[%s11226_s7 + $0x418] sm:$0xff] }
 0x19e   : > { %v9988_v25 = vadd.f32 %v6375_v63, %v9808_v28  ;;  %v5367_v0 = vadd.f32 %v5366_v60, %v5365_v45  ;;  %v1934_v59 = vpop.f32.mrb[65].mxu1  ;;  %3689 = vmatmul.mubr.f32.gmra.mrb[170].mxu1 %v9860_v2  ;;  %3798 = vmatprep.mubr.f32.mxu0 %v7189_v31  ;;  %v6985_v2 = vpack.c.bf16 %v3542_v53, %v3541_v20  ;;  %v7194_v16 = vld [vmem:[%s7523_s16 + $0x98] sm:$0xff]  ;;  %v11435_v63 = vrot.slane %v11434_v51, 4 }
 0x19f   : > { %v9995_v6 = vadd.f32 %v1934_v59, %v9775_v44  ;;  %3693 = vmatprep.mubr.f32.mxu1 %v11431_v57  ;;  %6980 = vmatpush3.bf16.msra.mxu0 %v6979_v52  ;;  %v3526_v44 = vld [vmem:[%s11226_s7 + $0x378] sm:$0xff]  ;;  %v3321_v52 = vrot.slane %v7194_v16, 4  ;;  %v3548_v59 = vld [vmem:[%s11226_s7 + $0x428] sm:$0xff] }
 0x1a0   : > { %v5368_v28 = vpop.f32.mrb[66].mxu0  ;;  %v9999_v36 = vadd.f32 %v5367_v0, %v9782_v55  ;;  %6982 = vmatprep.subr.bf16.mxu0 %v6981_v47  ;;  %v4391_v55 = vld [vmem:[%s11227_s8 + $0x88] sm:$0xff]  ;;  %v6987_v43 = vpack.c.bf16 %v3526_v44, %v3525_v13  ;;  %v11433_v47 = vld [vmem:[#allocation35_spill] sm:$0xff] }
 0x1a1   : > { %v6378_v8 = vpop.f32.mrb[66].mxu1  ;;  %v5369_v10 = vpop.f32.mrb[67].mxu0  ;;  %3799 = vmatmul.mubr.f32.gmra.mrb[172].mxu0 %v3318_v14  ;;  %v11436_v0 = vld [vmem:[#allocation19_spill] sm:$0xff] }
 0x1a2   : > { %v10014_v42 = vadd.f32 %v6378_v8, %v9871_v41  ;;  %v5370_v56 = vadd.f32 %v5369_v10, %v5368_v28  ;;  %v1944_v18 = vpop.f32.mrb[67].mxu1  ;;  %3694 = vmatmul.mubr.f32.gmra.mrb[172].mxu1 %v9890_v46  ;;  %3803 = vmatprep.mubr.f32.mxu0 %v7191_v35  ;;  %v7021_v46 = vpack.c.bf16 %v4391_v55, %v4390_v37  ;;  %v7198_v35 = vld [vmem:[%s7523_s16 + $0xb8] sm:$0xff] }
 0x1a3   : > { %v10020_v50 = vadd.f32 %v1944_v18, %v9840_v39  ;;  %3698 = vmatprep.mubr.f32.mxu1 %v11432_v19  ;;  %6984 = vmatpush3.bf16.msra.mxu0 %v6983_v17  ;;  %v3545_v39 = vld [vmem:[%s11226_s7 + $0x410] sm:$0xff]  ;;  %v11438_v17 = vrot.slane %v11437_v54, 4  ;;  %v7197_v18 = vld [vmem:[%s7637_s19 + $0x60] sm:$0xff] }
 0x1a4   : > { %v5371_v40 = vpop.f32.mrb[68].mxu0  ;;  %v1835_v41 = vadd.f32 %v5370_v56, %v9817_v29  ;;  %6986 = vmatprep.subr.bf16.mxu0 %v6985_v2 }
 0x1a5   : > { %v6381_v9 = vpop.f32.mrb[68].mxu1  ;;  %v5372_v3 = vpop.f32.mrb[69].mxu0  ;;  %3804 = vmatmul.mubr.f32.gmra.mrb[174].mxu0 %v3320_v7  ;;  %v3322_v28 = vsel %vm1025_vm1, %v11438_v17, %v3321_v52  ;;  %v3323_v7 = vrot.slane %v7198_v35, 4  ;;  %v11443_v52 = vld [vmem:[#allocation18_spill] sm:$0xff] }
 0x1a6   : > { %v10032_v24 = vadd.f32 %v6381_v9, %v9923_v21  ;;  %v5373_v29 = vadd.f32 %v5372_v3, %v5371_v40  ;;  %v1954_v15 = vpop.f32.mrb[69].mxu1  ;;  %3699 = vmatmul.mubr.f32.gmra.mrb[174].mxu1 %v9915_v33  ;;  %3808 = vmatprep.mubr.f32.mxu0 %v7193_v34  ;;  %v10044_v21 = vsel %vm1025_vm1, %v11435_v63, %v3325_v26  ;;  %v11439_v40 = vld [vmem:[#allocation41_spill] sm:$0xff]  ;;  %v11440_v26 = vld [vmem:[#allocation12_spill] sm:$0xff] }
 0x1a7   : > { %v10038_v45 = vadd.f32 %v1954_v15, %v9896_v38  ;;  %3913 = vmatprep.mubr.f32.mxu1 %v11433_v47  ;;  %6988 = vmatpush3.bf16.msra.mxu0 %v6987_v43  ;;  %v6993_v33 = vpack.c.bf16 %v3546_v30, %v3545_v39  ;;  %v3547_v38 = vld [vmem:[%s11226_s7 + $0x420] sm:$0xff] }
 0x1a8   : > { %v5374_v11 = vpop.f32.mrb[70].mxu0  ;;  %v1840_v60 = vadd.f32 %v5373_v29, %v9849_v12  ;;  %7022 = vmatprep.subr.bf16.mxu0 %v7021_v46  ;;  %v6997_v8 = vpack.c.bf16 %v3548_v59, %v3547_v38  ;;  %v11441_v46 = vrot.slane %v11440_v26, 4  ;;  %v11442_v30 = vld [vmem:[#allocation28_spill] sm:$0xff]  ;;  %v3552_v29 = vld [vmem:[%s11226_s7 + $0x448] sm:$0xff] }
 0x1a9   : > { %v6384_v20 = vpop.f32.mrb[70].mxu1  ;;  %v5375_v53 = vpop.f32.mrb[71].mxu0  ;;  %3809 = vmatmul.mubr.f32.gmra.mrb[176].mxu0 %v11436_v0 }
 0x1aa   : > { %v10055_v31 = vadd.f32 %v6384_v20, %v9970_v32  ;;  %v5376_v14 = vadd.f32 %v5375_v53, %v5374_v11  ;;  %v1964_v12 = vpop.f32.mrb[71].mxu1  ;;  %3914 = vmatmul.mubr.f32.vlgmr.msra.gmra.mrb[176].mxu1 %v11429_v62  ;;  %3813 = vmatprep.mubr.f32.mxu0 %v7195_v23  ;;  %v7196_v62 = vld [vmem:[%s7523_s16 + $0xf8] sm:$0xff]  ;;  %v11444_v11 = vrot.slane %v11443_v52, 4  ;;  %v11451_v52 = vld [vmem:[#allocation21_spill] sm:$0xff] }
 0x1ab   : > { %v10063_v2 = vadd.f32 %v1964_v12, %v9946_v61  ;;  %6992 = vmatpush3.bf16.msra.mxu1 %v9819_v27  ;;  %3918 = vmatprep.mubr.f32.mxu1 %v10044_v21  ;;  %v3327_v44 = vrot.slane %v7196_v62, 4  ;;  %v3549_v61 = vld [vmem:[%s11226_s7 + $0x430] sm:$0xff]  ;;  %v3550_v27 = vld [vmem:[%s11226_s7 + $0x438] sm:$0xff] }
 0x1ac   : > { %v5377_v32 = vpop.f32.mrb[72].mxu0  ;;  %v1845_v13 = vadd.f32 %v5376_v14, %v9880_v22  ;;  %6994 = vmatprep.subr.bf16.mxu1 %v6993_v33  ;;  %v3324_v51 = vsel %vm1025_vm1, %v11444_v11, %v3323_v7  ;;  %v7200_v53 = vld [vmem:[%s7637_s19 + $0x18] sm:$0xff]  ;;  %v3553_v14 = vld [vmem:[%s11226_s7 + $0x450] sm:$0xff]  ;;  %v11452_v11 = vrot.slane %v11451_v52, 4 }
 0x1ad   : > { %v6387_v10 = vpop.f32.mrb[72].mxu1  ;;  %v5378_v37 = vpop.f32.mrb[73].mxu0  ;;  %3814 = vmatmul.mubr.f32.gmra.mrb[178].mxu0 %v3322_v28  ;;  %v3341_v0 = vrot.slane %v7200_v53, 4  ;;  %v11445_v28 = vld [vmem:[#allocation42_spill] sm:$0xff] }
 0x1ae   : > { %v10075_v55 = vadd.f32 %v6387_v10, %v1835_v41  ;;  %v5379_v56 = vadd.f32 %v5378_v37, %v5377_v32  ;;  %v1974_v22 = vpop.f32.mrb[73].mxu1  ;;  %3919 = vmatmul.mubr.f32.gmra.mrb[178].mxu1 %v11430_v4  ;;  %3818 = vmatprep.mubr.f32.mxu0 %v7197_v18  ;;  %v10087_v41 = vsel %vm1025_vm1, %v11441_v46, %v3327_v44  ;;  %v11446_v62 = vld [vmem:[#allocation14_spill] sm:$0xff]  ;;  %v10138_v18 = vld [vmem:[%s7637_s19 + $0x88] sm:$0xff] }
 0x1af   : > { %v10081_v43 = vadd.f32 %v1974_v22, %v9999_v36  ;;  %3923 = vmatprep.mubr.f32.mxu1 %v11439_v40  ;;  %6996 = vmatpush3.bf16.msra.mxu1 %v6993_v33  ;;  %v7001_v4 = vpack.c.bf16 %v3550_v27, %v3549_v61  ;;  %v3551_v36 = vld [vmem:[%s11226_s7 + $0x440] sm:$0xff]  ;;  %v11447_v44 = vrot.slane %v11446_v62, 4  ;;  %v3556_v27 = vld [vmem:[%s11226_s7 + $0x468] sm:$0xff] }
 0x1b0   : > { %v5380_v5 = vpop.f32.mrb[74].mxu0  ;;  %v1850_v9 = vadd.f32 %v5379_v56, %v9905_v49  ;;  %6998 = vmatprep.subr.bf16.mxu1 %v6997_v8  ;;  %v7199_v49 = vld [vmem:[%s7637_s19 + $0x68] sm:$0xff]  ;;  %v7005_v38 = vpack.c.bf16 %v3552_v29, %v3551_v36  ;;  %v3555_v61 = vld [vmem:[%s11226_s7 + $0x460] sm:$0xff]  ;;  %v11449_v29 = vld [vmem:[#allocation23_spill] sm:$0xff] }
 0x1b1   : > { %v6390_v3 = vpop.f32.mrb[74].mxu1  ;;  %v5381_v39 = vpop.f32.mrb[75].mxu0  ;;  %3819 = vmatmul.mubr.f32.gmra.mrb[180].mxu0 %v11442_v30  ;;  %v11448_v22 = vld [vmem:[#allocation20_spill] sm:$0xff]  ;;  %v7013_v46 = vpack.c.bf16 %v3556_v27, %v3555_v61  ;;  %v11454_v61 = vld [vmem:[#allocation27_spill] sm:$0xff]  ;;  %v11455_v27 = vld [vmem:[#allocation37_spill] sm:$0xff] }
 0x1b2   : > { %v10097_v15 = vadd.f32 %v6390_v3, %v1845_v13  ;;  %v5382_v34 = vadd.f32 %v5381_v39, %v5380_v5  ;;  %v1984_v16 = vpop.f32.mrb[75].mxu1  ;;  %3924 = vmatmul.mubr.f32.gmra.mrb[180].mxu1 %v11431_v57  ;;  %3823 = vmatprep.mubr.f32.mxu0 %v7199_v49  ;;  %v7203_v5 = vld [vmem:[%s7637_s19 + $0x38] sm:$0xff]  ;;  %v3557_v3 = vld [vmem:[%s11226_s7 + $0x470] sm:$0xff] }
 0x1b3   : > { %v10104_v63 = vadd.f32 %v1984_v16, %v1840_v60  ;;  %3928 = vmatprep.mubr.f32.mxu1 %v10087_v41  ;;  %7000 = vmatpush3.bf16.msra.mxu1 %v6997_v8  ;;  %v3554_v60 = vld [vmem:[%s11226_s7 + $0x458] sm:$0xff]  ;;  %v3342_v8 = vsel %vm1025_vm1, %v11447_v44, %v3341_v0  ;;  %v3343_v26 = vrot.slane %v7203_v5, 4 }
 0x1b4   : > { %v5383_v33 = vpop.f32.mrb[76].mxu0  ;;  %v1855_v20 = vadd.f32 %v5382_v34, %v9932_v48  ;;  %7002 = vmatprep.subr.bf16.mxu1 %v7001_v4  ;;  %v10119_v48 = vld [vmem:[%s7637_s19 + $0x80] sm:$0xff]  ;;  %v7009_v10 = vpack.c.bf16 %v3554_v60, %v3553_v14  ;;  %v3558_v39 = vld [vmem:[%s11226_s7 + $0x478] sm:$0xff]  ;;  %v10168_v14 = vld [vmem:[%s7637_s19 + $0xa8] sm:$0xff] }
 0x1b5   : > { %v6393_v57 = vpop.f32.mrb[76].mxu1  ;;  %v5384_v59 = vpop.f32.mrb[77].mxu0  ;;  %3824 = vmatmul.mubr.f32.gmra.mrb[182].mxu0 %v3324_v51  ;;  %v10156_v34 = vld [vmem:[%s7637_s19 + $0xa0] sm:$0xff]  ;;  %v11450_v16 = vld [vmem:[#allocation43_spill] sm:$0xff]  ;;  %v3344_v51 = vsel %vm1025_vm1, %v11452_v11, %v3343_v26 }
 0x1b6   : > { %v10115_v12 = vadd.f32 %v6393_v57, %v1855_v20  ;;  %v5385_v23 = vadd.f32 %v5384_v59, %v5383_v33  ;;  %v1994_v54 = vpop.f32.mrb[77].mxu1  ;;  %3929 = vmatmul.mubr.f32.gmra.mrb[182].mxu1 %v11432_v19  ;;  %3828 = vmatprep.mubr.f32.mxu0 %v10119_v48  ;;  %v7017_v33 = vpack.c.bf16 %v3558_v39, %v3557_v3  ;;  %v11453_v59 = vld [vmem:[#allocation24_spill] sm:$0xff] }
 0x1b7   : > { %v10122_v17 = vadd.f32 %v1994_v54, %v1850_v9  ;;  %3933 = vmatprep.mubr.f32.mxu1 %v11445_v28  ;;  %7004 = vmatpush3.bf16.msra.mxu1 %v7001_v4  ;;  %v7206_v54 = vld [vmem:[%s7637_s19 + $0x58] sm:$0xff] }
 0x1b8   : > { %v5386_v32 = vpop.f32.mrb[78].mxu0  ;;  %v1860_v13 = vadd.f32 %v5385_v23, %v9955_v1  ;;  %7006 = vmatprep.subr.bf16.mxu1 %v7005_v38  ;;  %v3345_v28 = vrot.slane %v7206_v54, 4  ;;  %v4397_v54 = vld [vmem:[%s11227_s8 + $0xb8] sm:$0xff] }
 0x1b9   : > { %v6396_v19 = vpop.f32.mrb[78].mxu1  ;;  %v5387_v37 = vpop.f32.mrb[79].mxu0  ;;  %3829 = vmatmul.mubr.f32.gmra.mrb[184].mxu0 %v11433_v47 }
 0x1ba   : > { %v5388_v1 = vadd.f32 %v5387_v37, %v5386_v32  ;;  %v2004_v56 = vpop.f32.mrb[79].mxu1  ;;  %3934 = vmatmul.mubr.f32.gmra.mrb[184].mxu1 %v11448_v22  ;;  %3833 = vmatprep.mubr.f32.mxu0 %v10138_v18  ;;  %v4374_v32 = vld [vmem:[%s11227_s8] sm:$0xff] }
 0x1bb   : > { %v10141_v35 = vadd.f32 %v2004_v56, %v1860_v13  ;;  %3938 = vmatprep.mubr.f32.mxu1 %v3342_v8  ;;  %7008 = vmatpush3.bf16.msra.mxu1 %v7005_v38  ;;  %v4392_v8 = vld [vmem:[%s11227_s8 + $0x90] sm:$0xff]  ;;  %v11456_v56 = vld [vmem:[#allocation44_spill] sm:$0xff] }
 0x1bc   : > { %v1865_v47 = vadd.f32 %v5388_v1, %v9979_v58  ;;  %v5453_v7 = vpop.f32.mrb[80].mxu0  ;;  %7010 = vmatprep.subr.bf16.mxu1 %v7009_v10 }
 0x1bd   : > { %v5533_v9 = vpop.f32.mrb[80].mxu1  ;;  %v5454_v4 = vpop.f32.mrb[81].mxu0  ;;  %3834 = vmatmul.mubr.f32.gmra.mrb[186].mxu0 %v10044_v21 }
 0x1be   : > { %v10152_v30 = vadd.f32 %v6396_v19, %v1865_v47  ;;  %v5455_v58 = vadd.f32 %v5454_v4, %v5453_v7  ;;  %v5534_v36 = vpop.f32.mrb[81].mxu1  ;;  %3939 = vmatmul.mubr.f32.gmra.mrb[186].mxu1 %v11449_v29  ;;  %3838 = vmatprep.mubr.f32.mxu0 %v10156_v34  ;;  %v11457_v47 = vld [vmem:[#allocation25_spill] sm:$0xff] }
 0x1bf   : > { %v5535_v21 = vadd.f32 %v5534_v36, %v5533_v9  ;;  %3943 = vmatprep.mubr.f32.mxu1 %v11450_v16  ;;  %7012 = vmatpush3.bf16.msra.mxu1 %v7009_v10  ;;  %v4393_v10 = vld [vmem:[%s11227_s8 + $0x98] sm:$0xff]  ;;  %v11458_v7 = vrot.slane %v11457_v47, 4  ;;  %v4395_v36 = vld [vmem:[%s11227_s8 + $0xa8] sm:$0xff]  ;;  %v11459_v16 = vld [vmem:[#allocation30_spill] sm:$0xff] }
 0x1c0   : > { %v5456_v49 = vpop.f32.mrb[82].mxu0  ;;  %7014 = vmatprep.subr.bf16.mxu1 %v7013_v46  ;;  %v7025_v26 = vpack.c.bf16 %v4393_v10, %v4392_v8  ;;  %v4377_v9 = vld [vmem:[%s11227_s8 + $0x18] sm:$0xff]  ;;  %v11463_v8 = vld [vmem:[#allocation45_spill] sm:$0xff] }
 0x1c1   : > { %v10163_v20 = vadd.f32 %v5535_v21, %v5455_v58  ;;  %v5536_v53 = vpop.f32.mrb[82].mxu1  ;;  %v5457_v0 = vpop.f32.mrb[83].mxu0  ;;  %3839 = vmatmul.mubr.f32.gmra.mrb[188].mxu0 %v11439_v40  ;;  %v4375_v40 = vld [vmem:[%s11227_s8 + $0x8] sm:$0xff]  ;;  %v3346_v5 = vsel %vm1025_vm1, %v11458_v7, %v3345_v28  ;;  %v4394_v58 = vld [vmem:[%s11227_s8 + $0xa0] sm:$0xff] }
 0x1c2   : > { %v5458_v38 = vadd.f32 %v5457_v0, %v5456_v49  ;;  %v5537_v57 = vpop.f32.mrb[83].mxu1  ;;  %3944 = vmatmul.mubr.f32.gmra.mrb[188].mxu1 %v11453_v59  ;;  %3843 = vmatprep.mubr.f32.mxu0 %v10168_v14  ;;  %v7023_v22 = vpack.c.bf16 %v4375_v40, %v4374_v32  ;;  %v11460_v49 = vld [vmem:[#allocation38_spill] sm:$0xff]  ;;  %v4378_v0 = vld [vmem:[%s11227_s8 + $0x20] sm:$0xff]  ;;  %v11461_v40 = vld [vmem:[#allocation31_spill] sm:$0xff] }
 0x1c3   : > { %v5538_v60 = vadd.f32 %v5537_v57, %v5536_v53  ;;  %3948 = vmatprep.mubr.f32.mxu1 %v3344_v51  ;;  %7016 = vmatpush3.bf16.msra.mxu1 %v7013_v46  ;;  %v4376_v46 = vld [vmem:[%s11227_s8 + $0x10] sm:$0xff]  ;;  %v7029_v53 = vpack.c.bf16 %v4395_v36, %v4394_v58 }
 0x1c4   : > { %v5459_v23 = vpop.f32.mrb[84].mxu0  ;;  %7018 = vmatprep.subr.bf16.mxu1 %v7017_v33  ;;  %v7027_v11 = vpack.c.bf16 %v4377_v9, %v4376_v46 }
 0x1c5   : > { %v10178_v13 = vadd.f32 %v5538_v60, %v5458_v38  ;;  %v5539_v62 = vpop.f32.mrb[84].mxu1  ;;  %v5460_v44 = vpop.f32.mrb[85].mxu0  ;;  %3844 = vmatmul.mubr.f32.gmra.mrb[190].mxu0 %v10087_v41  ;;  %v4379_v38 = vld [vmem:[%s11227_s8 + $0x28] sm:$0xff] }
 0x1c6   : > { %v5461_v19 = vadd.f32 %v5460_v44, %v5459_v23  ;;  %v5540_v37 = vpop.f32.mrb[85].mxu1  ;;  %3949 = vmatmul.mubr.f32.gmra.mrb[190].mxu1 %v11454_v61  ;;  %4058 = vmatprep.mubr.f32.mxu0 %v11455_v27  ;;  %v4396_v23 = vld [vmem:[%s11227_s8 + $0xb0] sm:$0xff]  ;;  %v7031_v10 = vpack.c.bf16 %v4379_v38, %v4378_v0  ;;  %v4401_v0 = vld [vmem:[%s11227_s8 + $0xd8] sm:$0xff] }
 0x1c7   : > { %v5541_v1 = vadd.f32 %v5540_v37, %v5539_v62  ;;  %3953 = vmatprep.mubr.f32.mxu1 %v11456_v56  ;;  %7020 = vmatpush3.bf16.msra.mxu1 %v7017_v33  ;;  %v11462_v62 = vld [vmem:[#allocation39_spill] sm:$0xff]  ;;  %v4380_v56 = vld [vmem:[%s11227_s8 + $0x30] sm:$0xff] }
 0x1c8   : > { %v5462_v41 = vpop.f32.mrb[86].mxu0 }
 0x1c9   : > { %v10199_v4 = vadd.f32 %v5541_v1, %v5461_v19  ;;  %v5542_v3 = vpop.f32.mrb[86].mxu1  ;;  %v5463_v39 = vpop.f32.mrb[87].mxu0  ;;  %4059 = vmatmul.mubr.f32.vlgmr.msra.gmra.mrb[192].mxu0 %v10119_v48  ;;  %v7207_v48 = vld [vmem:[%s7637_s19 + $0x78] sm:$0xff]  ;;  %v11464_v19 = vld [vmem:[#allocation29_spill] sm:$0xff]  ;;  %v7033_v1 = vpack.c.bf16 %v4397_v54, %v4396_v23 }
 0x1ca   : > { %v5464_v29 = vadd.f32 %v5463_v39, %v5462_v41  ;;  %v5543_v21 = vpop.f32.mrb[87].mxu1  ;;  %3954 = vmatmul.mubr.f32.gmra.mrb[192].mxu1 %v11459_v16  ;;  %4063 = vmatprep.mubr.f32.mxu0 %v11460_v49  ;;  %v3347_v33 = vrot.slane %v7207_v48, 4  ;;  %v11465_v37 = vrot.slane %v11464_v19, 4  ;;  %v11467_v39 = vld [vmem:[#allocation40_spill] sm:$0xff]  ;;  %v11469_v23 = vld [vmem:[#allocation49_spill] sm:$0xff]  ;;  %v4385_v19 = vld [vmem:[%s11227_s8 + $0x58] sm:$0xff] }
 0x1cb   : > { %v5544_v52 = vadd.f32 %v5543_v21, %v5542_v3  ;;  %3958 = vmatprep.mubr.f32.mxu1 %v3346_v5  ;;  %7024 = vmatpush3.bf16.msra.mxu0 %v7023_v22  ;;  %v4381_v22 = vld [vmem:[%s11227_s8 + $0x38] sm:$0xff]  ;;  %v4398_v5 = vld [vmem:[%s11227_s8 + $0xc0] sm:$0xff]  ;;  %v11466_v3 = vld [vmem:[#allocation33_spill] sm:$0xff] }
 0x1cc   : > { %v5465_v51 = vpop.f32.mrb[88].mxu0  ;;  %7026 = vmatprep.subr.bf16.mxu0 %v7025_v26  ;;  %v3348_v61 = vsel %vm1025_vm1, %v11465_v37, %v3347_v33  ;;  %v4399_v26 = vld [vmem:[%s11227_s8 + $0xc8] sm:$0xff]  ;;  %v7035_v36 = vpack.c.bf16 %v4381_v22, %v4380_v56  ;;  %v7209_v56 = vld [vmem:[%s7637_s19 + $0xc0] sm:$0xff] }
 0x1cd   : > { %v10217_v57 = vadd.f32 %v5544_v52, %v5464_v29  ;;  %v5545_v59 = vpop.f32.mrb[88].mxu1  ;;  %v5466_v60 = vpop.f32.mrb[89].mxu0  ;;  %4064 = vmatmul.mubr.f32.gmra.mrb[194].mxu0 %v10138_v18  ;;  %v7037_v16 = vpack.c.bf16 %v4399_v26, %v4398_v5  ;;  %v4382_v52 = vld [vmem:[%s11227_s8 + $0x40] sm:$0xff]  ;;  %v11473_v26 = vld [vmem:[#allocation50_spill] sm:$0xff] }
 0x1ce   : > { %v5467_v28 = vadd.f32 %v5466_v60, %v5465_v51  ;;  %v5546_v32 = vpop.f32.mrb[89].mxu1  ;;  %3959 = vmatmul.mubr.f32.gmra.mrb[194].mxu1 %v11461_v40  ;;  %4068 = vmatprep.mubr.f32.mxu0 %v11462_v62  ;;  %v11468_v60 = vld [vmem:[#allocation34_spill] sm:$0xff]  ;;  %v11471_v40 = vld [vmem:[#allocation32_spill] sm:$0xff] }
 0x1cf   : > { %v5547_v44 = vadd.f32 %v5546_v32, %v5545_v59  ;;  %3963 = vmatprep.mubr.f32.mxu1 %v11463_v8  ;;  %7028 = vmatpush3.bf16.msra.mxu0 %v7027_v11  ;;  %v4383_v11 = vld [vmem:[%s11227_s8 + $0x48] sm:$0xff]  ;;  %v4402_v22 = vld [vmem:[%s11227_s8 + $0xe0] sm:$0xff] }
 0x1d0   : > { %v5468_v18 = vpop.f32.mrb[90].mxu0  ;;  %7030 = vmatprep.subr.bf16.mxu0 %v7029_v53  ;;  %v4400_v53 = vld [vmem:[%s11227_s8 + $0xd0] sm:$0xff] }
 0x1d1   : > { %v10238_v41 = vadd.f32 %v5547_v44, %v5467_v28  ;;  %v5548_v47 = vpop.f32.mrb[90].mxu1  ;;  %v5469_v7 = vpop.f32.mrb[91].mxu0  ;;  %4069 = vmatmul.mubr.f32.gmra.mrb[196].mxu0 %v10156_v34  ;;  %v7208_v34 = vld [vmem:[%s7637_s19 + $0x98] sm:$0xff]  ;;  %v11470_v28 = vld [vmem:[#allocation46_spill] sm:$0xff]  ;;  %v11472_v44 = vrot.slane %v11471_v40, 4 }
 0x1d2   : > { %v5470_v46 = vadd.f32 %v5469_v7, %v5468_v18  ;;  %v5549_v9 = vpop.f32.mrb[91].mxu1  ;;  %3964 = vmatmul.mubr.f32.gmra.mrb[196].mxu1 %v11466_v3  ;;  %4073 = vmatprep.mubr.f32.mxu0 %v11467_v39  ;;  %v3349_v21 = vrot.slane %v7208_v34, 4  ;;  %v4384_v18 = vld [vmem:[%s11227_s8 + $0x50] sm:$0xff]  ;;  %v4386_v34 = vld [vmem:[%s11227_s8 + $0x60] sm:$0xff] }
 0x1d3   : > { %v5550_v58 = vadd.f32 %v5549_v9, %v5548_v47  ;;  %3968 = vmatprep.mubr.f32.mxu1 %v3348_v61  ;;  %7032 = vmatpush3.bf16.msra.mxu0 %v7031_v10  ;;  %v7041_v10 = vpack.c.bf16 %v4401_v0, %v4400_v53  ;;  %v4403_v47 = vld [vmem:[%s11227_s8 + $0xe8] sm:$0xff]  ;;  %v7043_v9 = vpack.c.bf16 %v4385_v19, %v4384_v18 }
 0x1d4   : > { %v5471_v29 = vpop.f32.mrb[92].mxu0  ;;  %7034 = vmatprep.subr.bf16.mxu0 %v7033_v1  ;;  %v10271_v8 = vsel %vm1025_vm1, %v11472_v44, %v3349_v21 }
 0x1d5   : > { %v10256_v51 = vadd.f32 %v5550_v58, %v5470_v46  ;;  %v5551_v48 = vpop.f32.mrb[92].mxu1  ;;  %v5472_v33 = vpop.f32.mrb[93].mxu0  ;;  %4074 = vmatmul.mubr.f32.gmra.mrb[198].mxu0 %v10168_v14  ;;  %v7039_v14 = vpack.c.bf16 %v4383_v11, %v4382_v52  ;;  %v7210_v58 = vld [vmem:[%s7637_s19 + $0xb8] sm:$0xff]  ;;  %v7211_v11 = vld [vmem:[%s7637_s19 + $0xc8] sm:$0xff] }
 0x1d6   : > { %v5473_v38 = vadd.f32 %v5472_v33, %v5471_v29  ;;  %v5552_v59 = vpop.f32.mrb[93].mxu1  ;;  %3969 = vmatmul.mubr.f32.gmra.mrb[198].mxu1 %v11468_v60  ;;  %4078 = vmatprep.mubr.f32.mxu0 %v11469_v23  ;;  %v7045_v29 = vpack.c.bf16 %v4403_v47, %v4402_v22  ;;  %v4405_v33 = vld [vmem:[%s11227_s8 + $0xf8] sm:$0xff]  ;;  %v11478_v47 = vld [vmem:[#allocation54_spill] sm:$0xff] }
 0x1d7   : > { %v5553_v54 = vadd.f32 %v5552_v59, %v5551_v48  ;;  %3973 = vmatprep.mubr.f32.mxu1 %v11470_v28  ;;  %7036 = vmatpush3.bf16.msra.mxu0 %v7035_v36  ;;  %v3351_v36 = vrot.slane %v7210_v58, 4  ;;  %v4404_v48 = vld [vmem:[%s11227_s8 + $0xf0] sm:$0xff]  ;;  %v11475_v60 = vld [vmem:[#allocation47_spill] sm:$0xff]  ;;  %v7213_v58 = vld [vmem:[%s7637_s19 + $0xe8] sm:$0xff] }
 0x1d8   : > { %v5474_v32 = vpop.f32.mrb[94].mxu0  ;;  %7038 = vmatprep.subr.bf16.mxu0 %v7037_v16  ;;  %v7049_v44 = vpack.c.bf16 %v4405_v33, %v4404_v48  ;;  %v7214_v48 = vld [vmem:[%s9362_s23] sm:$0xff]  ;;  %v929_v33 = vlaneseq }
 0x1d9   : > { %v10279_v37 = vadd.f32 %v5553_v54, %v5473_v38  ;;  %v5554_v61 = vpop.f32.mrb[94].mxu1  ;;  %v5475_v1 = vpop.f32.mrb[95].mxu0  ;;  %4079 = vmatmul.mubr.f32.gmra.mrb[200].mxu0 %v7209_v56  ;;  %v11474_v38 = vld [vmem:[#allocation53_spill] sm:$0xff] }
 0x1da   : > { %v5476_v7 = vadd.f32 %v5475_v1, %v5474_v32  ;;  %v5555_v5 = vpop.f32.mrb[95].mxu1  ;;  %3974 = vmatmul.mubr.f32.gmra.mrb[200].mxu1 %v11455_v27  ;;  %4083 = vmatprep.mubr.f32.mxu0 %v11473_v26  ;;  %v4387_v27 = vld [vmem:[%s11227_s8 + $0x68] sm:$0xff]  ;;  %v7212_v1 = vld [vmem:[%s7637_s19 + $0xe0] sm:$0xff] }
 0x1db   : > { %v5556_v46 = vadd.f32 %v5555_v5, %v5554_v61  ;;  %3978 = vmatprep.mubr.f32.mxu1 %v10271_v8  ;;  %7040 = vmatpush3.bf16.msra.mxu0 %v7039_v14  ;;  %v7047_v23 = vpack.c.bf16 %v4387_v27, %v4386_v34  ;;  %v11476_v14 = vld [vmem:[#allocation36_spill] sm:$0xff] }
 0x1dc   : > { %v5477_v3 = vpop.f32.mrb[96].mxu0  ;;  %7042 = vmatprep.subr.bf16.mxu0 %v7041_v10  ;;  %v11477_v32 = vrot.slane %v11476_v14, 4  ;;  %v4388_v10 = vld [vmem:[%s11227_s8 + $0x70] sm:$0xff]  ;;  %v10341_v14 = vld [vmem:[%s9362_s23 + $0x48] sm:$0xff] }
 0x1dd   : > { %v10298_v21 = vadd.f32 %v5556_v46, %v5476_v7  ;;  %v5557_v16 = vpop.f32.mrb[96].mxu1  ;;  %v5478_v52 = vpop.f32.mrb[97].mxu0  ;;  %4084 = vmatmul.mubr.f32.gmra.mrb[202].mxu0 %v7211_v11 }
 0x1de   : > { %v5479_v53 = vadd.f32 %v5478_v52, %v5477_v3  ;;  %v5558_v0 = vpop.f32.mrb[97].mxu1  ;;  %3979 = vmatmul.mubr.f32.gmra.mrb[202].mxu1 %v11460_v49  ;;  %4088 = vmatprep.mubr.f32.mxu0 %v11474_v38  ;;  %v3352_v40 = vsel %vm1025_vm1, %v11477_v32, %v3351_v36  ;;  %v4389_v49 = vld [vmem:[%s11227_s8 + $0x78] sm:$0xff] }
 0x1df   : > { %v5559_v59 = vadd.f32 %v5558_v0, %v5557_v16  ;;  %3983 = vmatprep.mubr.f32.mxu1 %v11475_v60  ;;  %7044 = vmatpush3.bf16.msra.mxu0 %v7043_v9  ;;  %v7051_v5 = vpack.c.bf16 %v4389_v49, %v4388_v10  ;;  %v11480_v0 = vld [vmem:[#allocation73_spill] sm:$0xff]  ;;  %v7215_v38 = vld [vmem:[%s7637_s19 + $0xd8] sm:$0xff] }
 0x1e0   : > { %v5480_v54 = vpop.f32.mrb[98].mxu0  ;;  %7046 = vmatprep.subr.bf16.mxu0 %v7045_v29  ;;  %v7216_v49 = vld [vmem:[%s9362_s23 + $0x8] sm:$0xff] }
 0x1e1   : > { %v10319_v18 = vadd.f32 %v5559_v59, %v5479_v53  ;;  %v5560_v19 = vpop.f32.mrb[98].mxu1  ;;  %v5481_v61 = vpop.f32.mrb[99].mxu0  ;;  %4089 = vmatmul.mubr.f32.gmra.mrb[204].mxu0 %v7212_v1  ;;  %v11483_v1 = vld [vmem:[#allocation48_spill] sm:$0xff] }
 0x1e2   : > { %v5482_v56 = vadd.f32 %v5481_v61, %v5480_v54  ;;  %v5561_v22 = vpop.f32.mrb[99].mxu1  ;;  %3984 = vmatmul.mubr.f32.gmra.mrb[204].mxu1 %v11462_v62  ;;  %4093 = vmatprep.mubr.f32.mxu0 %v11478_v47  ;;  %v11479_v62 = vld [vmem:[#allocation72_spill] sm:$0xff] }
 0x1e3   : > { %v5562_v7 = vadd.f32 %v5561_v22, %v5560_v19  ;;  %3988 = vmatprep.mubr.f32.mxu1 %v3352_v40  ;;  %7048 = vmatpush3.bf16.msra.mxu0 %v7047_v23  ;;  %v10338_v54 = vld [vmem:[%s9362_s23 + $0x40] sm:$0xff] }
 0x1e4   : > { %v5483_v26 = vpop.f32.mrb[100].mxu0  ;;  %7050 = vmatprep.subr.bf16.mxu0 %v7049_v44 }
 0x1e5   : > { %v10324_v46 = vadd.f32 %v5562_v7, %v5482_v56  ;;  %v5563_v9 = vpop.f32.mrb[100].mxu1  ;;  %v5484_v3 = vpop.f32.mrb[101].mxu0  ;;  %4094 = vmatmul.mubr.f32.gmra.mrb[206].mxu0 %v7213_v58  ;;  %v11484_v56 = vrot.slane %v11483_v1, 4  ;;  %v11485_v7 = vld [vmem:[#allocation52_spill] sm:$0xff] }
 0x1e6   : > { %v5485_v36 = vadd.f32 %v5484_v3, %v5483_v26  ;;  %v5564_v29 = vpop.f32.mrb[101].mxu1  ;;  %3989 = vmatmul.mubr.f32.gmra.mrb[206].mxu1 %v11467_v39  ;;  %4098 = vmatprep.mubr.f32.mxu0 %v11479_v62  ;;  %v3366_v3 = vrot.slane %v10341_v14, 6  ;;  %v10358_v62 = vld [vmem:[%s9362_s23 + $0x50] sm:$0xff] }
 0x1e7   : > { %v5565_v34 = vadd.f32 %v5564_v29, %v5563_v9  ;;  %6485 = vmatprep.mubr.f32.mxu1 %v11470_v28  ;;  %7052 = vmatpush3.bf16.msra.mxu0 %v7051_v5  ;;  %v3381_v28 = vrot.slane %v7215_v38, 4  ;;  %v7217_v5 = vld [vmem:[%s7637_s19 + $0xf8] sm:$0xff]  ;;  %v3365_v9 = vrot.slane %v10338_v54, 6  ;;  %s601_s19 = sadd.s32 %s5023_s28, %s5022_s21 }
 0x1e8   : > { %v5486_v27 = vpop.f32.mrb[102].mxu0  ;;  %v3383_v26 = vrot.slane %v7217_v5, 4  ;;  %s5024_s20 = sshll.u32 %s601_s19, 3 }
 0x1e9   : > { %v10330_v16 = vadd.f32 %v5565_v34, %v5485_v36  ;;  %v5566_v52 = vpop.f32.mrb[102].mxu1  ;;  %v5487_v11 = vpop.f32.mrb[103].mxu0  ;;  %4099 = vmatmul.mubr.f32.gmra.mrb[208].mxu0 %v7214_v48  ;;  %v3382_v22 = vsel %vm1025_vm1, %v11484_v56, %v3381_v28  ;;  %v3385_v36 = vrot.slane %v7216_v49, 4  ;;  %v7219_v48 = vld [vmem:[%s9362_s23 + $0x20] sm:$0xff] }
 0x1ea   : > { %v5488_v53 = vadd.f32 %v5487_v11, %v5486_v27  ;;  %v5567_v39 = vpop.f32.mrb[103].mxu1  ;;  %6486 = vmatmul.mubr.f32.vlgmr.msra.gmra.mrb[208].mxu1 %v10271_v8  ;;  %4103 = vmatprep.mubr.f32.mxu0 %v11480_v0  ;;  %v10346_v8 = vshrl.u32 %v929_v33, 7  ;;  %v7220_v0 = vld [vmem:[%s9362_s23 + $0x18] sm:$0xff]  ;;  %v685_v28 = vld [vmem:[%s11228_s9] sm:$0xf] }
 0x1eb   : > { %v5568_v59 = vadd.f32 %v5567_v39, %v5566_v52  ;;  %6488 = vmatprep.mubr.f32.mxu1 %v11475_v60  ;;  %v11482_v60 = vld [vmem:[#allocation74_spill] sm:$0xff]  ;;  %v11486_v39 = vld [vmem:[#allocation75_spill] sm:$0xff]  ;;  %v3388_v38 = vrot.slane %v7220_v0, 4 }
 0x1ec   : > { %v5489_v23 = vpop.f32.mrb[104].mxu0  ;;  %11481 = vst [vmem:[#allocation9_spill] sm:$0xff] %v10346_v8  ;;  %v2015_v34 = vsub.s32 1, %v10346_v8 }
 0x1ed   : > { %v10343_v32 = vadd.f32 %v5568_v59, %v5488_v53  ;;  %v5569_v44 = vpop.f32.mrb[104].mxu1  ;;  %v5490_v10 = vpop.f32.mrb[105].mxu0  ;;  %4104 = vmatmul.mubr.f32.gmra.mrb[210].mxu0 %v7216_v49 }
 0x1ee   : > { %v5491_v19 = vadd.f32 %v5490_v10, %v5489_v23  ;;  %v5570_v61 = vpop.f32.mrb[105].mxu1  ;;  %6489 = vmatmul.mubr.f32.gmra.mrb[210].mxu1 %v3352_v40  ;;  %4108 = vmatprep.mubr.f32.mxu0 %v11482_v60  ;;  %v7218_v40 = vld [vmem:[%s9362_s23 + $0x10] sm:$0xff]  ;;  %v11487_v23 = vld [vmem:[#allocation55_spill] sm:$0xff]  ;;  %v931_v60 = vsub.s32 0, %v10346_v8 }
 0x1ef   : > { %v5571_v47 = vadd.f32 %v5570_v61, %v5569_v44  ;;  %6491 = vmatprep.mubr.f32.mxu1 %v11485_v7  ;;  %v3386_v29 = vrot.slane %v7218_v40, 4  ;;  %v11488_v44 = vld [vmem:[#allocation51_spill] sm:$0xff]  ;;  %v3368_v61 = vrot.slane %v10358_v62, 6  ;;  %v7222_v7 = vld [vmem:[%s9362_s23 + $0x30] sm:$0xff]  ;;  %v10383_v40 = vld [vmem:[%s9362_s23 + $0x68] sm:$0xff] }
 0x1f0   : > { %v5492_v58 = vpop.f32.mrb[106].mxu0  ;;  %v11489_v10 = vrot.slane %v11488_v44, 4  ;;  %v3391_v5 = vrot.slane %v7222_v7, 4  ;;  %v10406_v7 = vld [vmem:[%s9362_s23 + $0x70] sm:$0xff] }
 0x1f1   : > { %v10361_v27 = vadd.f32 %v5571_v47, %v5491_v19  ;;  %v5572_v52 = vpop.f32.mrb[106].mxu1  ;;  %v5493_v11 = vpop.f32.mrb[107].mxu0  ;;  %4109 = vmatmul.mubr.f32.gmra.mrb[212].mxu0 %v7219_v48  ;;  %v3367_v19 = vsel %vm711_vm0, %v3365_v9, %v3366_v3  ;;  %v3387_v56 = vsel %vm1025_vm1, %v3385_v36, %v3386_v29  ;;  %v3389_v36 = vsel %vm1025_vm1, %v3386_v29, %v3388_v38 }
 0x1f2   : > { %v5494_v33 = vadd.f32 %v5493_v11, %v5492_v58  ;;  %v5573_v53 = vpop.f32.mrb[107].mxu1  ;;  %6492 = vmatmul.mubr.f32.gmra.mrb[212].mxu1 %v3382_v22  ;;  %4113 = vmatprep.mubr.f32.mxu0 %v11486_v39  ;;  %v3384_v49 = vsel %vm1025_vm1, %v11489_v10, %v3383_v26  ;;  %v7221_v22 = vld [vmem:[%s9362_s23 + $0x28] sm:$0xff]  ;;  %v10380_v58 = vld [vmem:[%s9362_s23 + $0x60] sm:$0xff]  ;;  %v7223_v39 = vld [vmem:[%s9362_s23 + $0x38] sm:$0xff]  ;;  %v3371_v10 = vrot.slane %v10383_v40, 6 }
 0x1f3   : > { %v5574_v59 = vadd.f32 %v5573_v53, %v5572_v52  ;;  %6494 = vmatprep.mubr.f32.mxu1 %v11487_v23  ;;  %v3390_v47 = vrot.slane %v7221_v22, 4  ;;  %v10385_v52 = vrot.slane %v685_v28, %v2015_v34  ;;  %v3393_v0 = vrot.slane %v7223_v39, 4 }
 0x1f4   : > { %v5495_v1 = vpop.f32.mrb[108].mxu0  ;;  %v3369_v23 = vsel %vm711_vm0, %v3366_v3, %v3368_v61  ;;  %v3370_v44 = vrot.slane %v10380_v58, 6 }
 0x1f5   : > { %v10387_v26 = vadd.f32 %v5574_v59, %v5494_v33  ;;  %v5575_v9 = vpop.f32.mrb[108].mxu1  ;;  %v5496_v11 = vpop.f32.mrb[109].mxu0  ;;  %4114 = vmatmul.mubr.f32.gmra.mrb[214].mxu0 %v7221_v22  ;;  %v686_v33 = vld [vmem:[%s11229_s10] sm:$0xf]  ;;  %v3392_v38 = vsel %vm1025_vm1, %v3390_v47, %v3391_v5  ;;  %v680_v22 = vld [vmem:[%s9362_s23 + $0x58] sm:$0xff]  ;;  %v2017_v3 = vmul.f32 %v10385_v52, %v9995_v6 }
 0x1f6   : > { %v5497_v48 = vadd.f32 %v5496_v11, %v5495_v1  ;;  %v5576_v53 = vpop.f32.mrb[109].mxu1  ;;  %6495 = vmatmul.mubr.f32.gmra.mrb[214].mxu1 %v3384_v49  ;;  %4118 = vmatprep.mubr.f32.mxu0 %v3367_v19  ;;  %v10399_v49 = vrot.slane %v685_v28, %v931_v60  ;;  %v3395_v19 = vrot.slane %v10341_v14, 4  ;;  %v3396_v1 = vrot.slane %v10358_v62, 4 }
 0x1f7   : > { %v5577_v59 = vadd.f32 %v5576_v53, %v5575_v9  ;;  %6497 = vmatprep.mubr.f32.mxu1 %v3387_v56  ;;  %v10410_v56 = vrot.slane %v686_v33, %v2015_v34  ;;  %v10417_v47 = vrot.slane %v686_v33, %v931_v60  ;;  %v3394_v53 = vsel %vm1025_vm1, %v3391_v5, %v3393_v0 }
 0x1f8   : > { %v5498_v29 = vpop.f32.mrb[110].mxu0  ;;  %v3372_v39 = vsel %vm711_vm0, %v3370_v44, %v3371_v10  ;;  %v3398_v6 = vrot.slane %v680_v22, 4  ;;  %v3397_v60 = vsel %vm1025_vm1, %v3395_v19, %v3396_v1  ;;  %v3400_v33 = vrot.slane %v10383_v40, 4  ;;  %v11491_v22 = vld [vmem:[#allocation56_spill] sm:$0xff] }
 0x1f9   : > { %v10414_v61 = vadd.f32 %v5577_v59, %v5497_v48  ;;  %v5578_v28 = vpop.f32.mrb[110].mxu1  ;;  %v5499_v9 = vpop.f32.mrb[111].mxu0  ;;  %4119 = vmatmul.mubr.f32.gmra.mrb[216].mxu0 %v10338_v54  ;;  %v3373_v48 = vrot.slane %v10406_v7, 6  ;;  %v11490_v59 = vld [vmem:[#allocation57_spill] sm:$0xff]  ;;  %v2018_v5 = vmul.f32 %v10385_v52, %v9988_v25  ;;  %v2037_v0 = vadd.f32 %v10410_v56, %v2017_v3 }
 0x1fa   : > { %v5500_v62 = vadd.f32 %v5499_v9, %v5498_v29  ;;  %v5579_v11 = vpop.f32.mrb[111].mxu1  ;;  %6498 = vmatmul.mubr.f32.gmra.mrb[216].mxu1 %v3389_v36  ;;  %4123 = vmatprep.mubr.f32.mxu0 %v3369_v23  ;;  %v933_v8 = vmul.f32 %v10399_v49, %v11490_v59  ;;  %v3401_v36 = vrot.slane %v10406_v7, 4  ;;  %v684_v23 = vld [vmem:[%s9362_s23 + $0x78] sm:$0xff]  ;;  %v934_v19 = vmul.f32 %v11491_v22, %v10399_v49  ;;  %s5030_s23 = sld [smem:[#allocation2 + $0x5]] }
 0x1fb   : > { %v5580_v34 = vadd.f32 %v5579_v11, %v5578_v28  ;;  %6500 = vmatprep.mubr.f32.mxu1 %v3392_v38  ;;  %v10437_v7 = vstv %s10391_s30  ;;  %v3399_v25 = vsel %vm1025_vm1, %v3396_v1, %v3398_v6  ;;  %v3374_v3 = vsel %vm711_vm0, %v3371_v10, %v3373_v48  ;;  %s5026_s30 = sld [smem:[#allocation2 + $0x2]] }
 0x1fc   : > { %v5613_v54 = vpop.f32.mrb[112].mxu0  ;;  %v3402_v22 = vsel %vm1025_vm1, %v3400_v33, %v3401_v36  ;;  %v2071_v10 = vmul.f32 %v10437_v7, %v2037_v0  ;;  %vm2054_vm3 = vcmp.ge.f32.partialorder %v2037_v0, 0.0  ;;  %v954_v6 = vadd.f32 %v10417_v47, %v934_v19 }
 0x1fd   : > { %v10431_v44 = vadd.f32 %v5580_v34, %v5500_v62  ;;  %v5693_v29 = vpop.f32.mrb[112].mxu1  ;;  %v5614_v38 = vpop.f32.mrb[113].mxu0  ;;  %4124 = vmatmul.mubr.f32.gmra.mrb[218].mxu0 %v10341_v14  ;;  %v3403_v62 = vrot.slane %v684_v23, 4  ;;  %v953_v34 = vadd.f32 %v10417_v47, %v933_v8  ;;  %v11492_v23 = vld [vmem:[#allocation59_spill] sm:$0xff] }
 0x1fe   : > { %v5615_v28 = vadd.f32 %v5614_v38, %v5613_v54  ;;  %v5694_v9 = vpop.f32.mrb[113].mxu1  ;;  %6501 = vmatmul.mubr.f32.gmra.mrb[218].mxu1 %v3394_v53  ;;  %4128 = vmatprep.mubr.f32.mxu0 %v3372_v39  ;;  %v10445_v54 = vstv %s10408_s0  ;;  %v2038_v53 = vadd.f32 %v10410_v56, %v2018_v5  ;;  %v2019_v39 = vmul.f32 %v10385_v52, %v10020_v50 }
 0x1ff   : > { %v5695_v11 = vadd.f32 %v5694_v9, %v5693_v29  ;;  %6503 = vmatprep.mubr.f32.mxu1 %v3397_v60  ;;  %v3404_v33 = vsel %vm1025_vm1, %v3401_v36, %v3403_v62  ;;  %vm970_vm4 = vcmp.ge.f32.partialorder %v953_v34, 0.0  ;;  %v987_v50 = vmul.f32 %v10445_v54, %v953_v34 }
 0x200   : > { %v2821_v14 = vadd.f32 %v5615_v28, %v10163_v20  ;;  %v5616_v59 = vpop.f32.mrb[114].mxu0  ;;  %v2020_v28 = vmul.f32 %v10385_v52, %v10014_v42  ;;  %v2039_v9 = vadd.f32 %v10410_v56, %v2019_v39  ;;  %v2087_v36 = vsel %vm2054_vm3, %v2037_v0, %v2071_v10 }
 0x201   : > { %v5696_v60 = vpop.f32.mrb[114].mxu1  ;;  %v5617_v29 = vpop.f32.mrb[115].mxu0  ;;  %4129 = vmatmul.mubr.f32.gmra.mrb[220].mxu0 %v10380_v58  ;;  %v935_v58 = vmul.f32 %v10399_v49, %v11492_v23  ;;  %vm2055_vm5 = vcmp.ge.f32.partialorder %v2038_v53, 0.0  ;;  %vm971_vm6 = vcmp.ge.f32.partialorder %v954_v6, 0.0  ;;  %v2021_v10 = vmul.f32 %v10385_v52, %v10038_v45 }
 0x202   : > { %v5618_v1 = vadd.f32 %v5617_v29, %v5616_v59  ;;  %v5697_v8 = vpop.f32.mrb[115].mxu1  ;;  %6504 = vmatmul.mubr.f32.gmra.mrb[220].mxu1 %v3399_v25  ;;  %4133 = vmatprep.mubr.f32.mxu0 %v3374_v3  ;;  %v10452_v20 = vadd.f32 %v5695_v11, %v2821_v14  ;;  %v2072_v25 = vmul.f32 %v10437_v7, %v2038_v53  ;;  %v11493_v14 = vld [vmem:[#allocation58_spill] sm:$0xff]  ;;  %vm2056_vm7 = vcmp.ge.f32.partialorder %v2039_v9, 0.0 }
 0x203   : > { %v5698_v48 = vadd.f32 %v5697_v8, %v5696_v60  ;;  %6506 = vmatprep.mubr.f32.mxu1 %v3402_v22  ;;  %v936_v42 = vmul.f32 %v11493_v14, %v10399_v49  ;;  %v988_v22 = vmul.f32 %v10445_v54, %v954_v6  ;;  %v955_v39 = vadd.f32 %v10417_v47, %v935_v58 }
 0x204   : > { %v2826_v5 = vadd.f32 %v5618_v1, %v10178_v13  ;;  %v5619_v38 = vpop.f32.mrb[116].mxu0  ;;  %v1003_v60 = vsel %vm970_vm4, %v953_v34, %v987_v50  ;;  %v2040_v29 = vadd.f32 %v10410_v56, %v2020_v28 }
 0x205   : > { %v5699_v11 = vpop.f32.mrb[116].mxu1  ;;  %v5620_v19 = vpop.f32.mrb[117].mxu0  ;;  %4134 = vmatmul.mubr.f32.gmra.mrb[222].mxu0 %v10383_v40  ;;  %v956_v34 = vadd.f32 %v10417_v47, %v936_v42  ;;  %v1004_v58 = vsel %vm971_vm6, %v954_v6, %v988_v22  ;;  %vm972_vm8 = vcmp.ge.f32.partialorder %v955_v39, 0.0 }
 0x206   : > { %v5621_v3 = vadd.f32 %v5620_v19, %v5619_v38  ;;  %v5700_v62 = vpop.f32.mrb[117].mxu1  ;;  %6507 = vmatmul.mubr.f32.gmra.mrb[222].mxu1 %v3404_v33  ;;  %4502 = vmatprep.mubr.f32.mxu0 %v2087_v36  ;;  %v10466_v13 = vadd.f32 %v5698_v48, %v2826_v5  ;;  %v2088_v48 = vsel %vm2055_vm5, %v2038_v53, %v2072_v25  ;;  %v11494_v38 = vld [vmem:[#allocation61_spill] sm:$0xff]  ;;  %vm2057_vm9 = vcmp.ge.f32.partialorder %v2040_v29, 0.0 }
 0x207   : > { %v5701_v59 = vadd.f32 %v5700_v62, %v5699_v11  ;;  %v2073_v33 = vmul.f32 %v10437_v7, %v2039_v9  ;;  %v937_v28 = vmul.f32 %v10399_v49, %v11494_v38  ;;  %v989_v53 = vmul.f32 %v10445_v54, %v955_v39 }
 0x208   : > { %v2831_v40 = vadd.f32 %v5621_v3, %v10199_v4  ;;  %v5622_v0 = vpop.f32.mrb[118].mxu0  ;;  %v2022_v19 = vmul.f32 %v10385_v52, %v10032_v24  ;;  %v2041_v36 = vadd.f32 %v10410_v56, %v2021_v10  ;;  %v2074_v6 = vmul.f32 %v10437_v7, %v2040_v29 }
 0x209   : > { %v5702_v1 = vpop.f32.mrb[118].mxu1  ;;  %v5623_v8 = vpop.f32.mrb[119].mxu0  ;;  %4503 = vmatmul.mubr.f32.vlgmr.msra.gmra.mrb[224].mxu0 %v1003_v60  ;;  %v2089_v62 = vsel %vm2056_vm7, %v2039_v9, %v2073_v33  ;;  %v990_v24 = vmul.f32 %v10445_v54, %v956_v34  ;;  %v1005_v9 = vsel %vm972_vm8, %v955_v39, %v989_v53  ;;  %vm973_vm10 = vcmp.ge.f32.partialorder %v956_v34, 0.0 }
 0x20a   : > { %v5624_v23 = vadd.f32 %v5623_v8, %v5622_v0  ;;  %v5703_v5 = vpop.f32.mrb[119].mxu1  ;;  %4507 = vmatprep.mubr.f32.mxu0 %v2088_v48  ;;  %v10478_v4 = vadd.f32 %v5701_v59, %v2831_v40  ;;  %v11495_v59 = vld [vmem:[#allocation60_spill] sm:$0xff]  ;;  %v957_v0 = vadd.f32 %v10417_v47, %v937_v28  ;;  %v2023_v8 = vmul.f32 %v10385_v52, %v10063_v2 }
 0x20b   : > { %v5704_v50 = vadd.f32 %v5703_v5, %v5702_v1  ;;  %v938_v22 = vmul.f32 %v11495_v59, %v10399_v49  ;;  %v2042_v1 = vadd.f32 %v10410_v56, %v2022_v19  ;;  %v2075_v5 = vmul.f32 %v10437_v7, %v2041_v36  ;;  %v11497_v59 = vld [vmem:[#allocation62_spill] sm:$0xff] }
 0x20c   : > { %v2836_v45 = vadd.f32 %v5624_v23, %v10217_v57  ;;  %v5625_v11 = vpop.f32.mrb[120].mxu0  ;;  %v2090_v23 = vsel %vm2057_vm9, %v2040_v29, %v2074_v6  ;;  %vm2058_vm11 = vcmp.ge.f32.partialorder %v2041_v36, 0.0  ;;  %v1006_v28 = vsel %vm973_vm10, %v956_v34, %v990_v24 }
 0x20d   : > { %v5705_v25 = vpop.f32.mrb[120].mxu1  ;;  %v5626_v3 = vpop.f32.mrb[121].mxu0  ;;  %4508 = vmatmul.mubr.f32.gmra.mrb[226].mxu0 %v1004_v58  ;;  %v958_v39 = vadd.f32 %v10417_v47, %v938_v22  ;;  %vm974_vm12 = vcmp.ge.f32.partialorder %v957_v0, 0.0  ;;  %v991_v29 = vmul.f32 %v10445_v54, %v957_v0  ;;  %v2024_v19 = vmul.f32 %v10385_v52, %v10055_v31 }
 0x20e   : > { %v5627_v14 = vadd.f32 %v5626_v3, %v5625_v11  ;;  %v5706_v42 = vpop.f32.mrb[121].mxu1  ;;  %4512 = vmatprep.mubr.f32.mxu0 %v2089_v62  ;;  %v10489_v57 = vadd.f32 %v5704_v50, %v2836_v45  ;;  %v11496_v45 = vld [vmem:[#allocation63_spill] sm:$0xff]  ;;  %v2091_v6 = vsel %vm2058_vm11, %v2041_v36, %v2075_v5  ;;  %v2076_v34 = vmul.f32 %v10437_v7, %v2042_v1 }
 0x20f   : > { %v5707_v40 = vadd.f32 %v5706_v42, %v5705_v25  ;;  %v939_v11 = vmul.f32 %v10399_v49, %v11496_v45  ;;  %v2043_v25 = vadd.f32 %v10410_v56, %v2023_v8  ;;  %vm2059_vm13 = vcmp.ge.f32.partialorder %v2042_v1, 0.0  ;;  %v11498_v45 = vld [vmem:[#allocation65_spill] sm:$0xff] }
 0x210   : > { %v2841_v60 = vadd.f32 %v5627_v14, %v10238_v41  ;;  %v5628_v10 = vpop.f32.mrb[122].mxu0  ;;  %v940_v22 = vmul.f32 %v11497_v59, %v10399_v49  ;;  %v992_v31 = vmul.f32 %v10445_v54, %v958_v39  ;;  %v1007_v36 = vsel %vm974_vm12, %v957_v0, %v991_v29 }
 0x211   : > { %v5708_v48 = vpop.f32.mrb[122].mxu1  ;;  %v5629_v33 = vpop.f32.mrb[123].mxu0  ;;  %4513 = vmatmul.mubr.f32.gmra.mrb[228].mxu0 %v1005_v9  ;;  %v959_v24 = vadd.f32 %v10417_v47, %v939_v11  ;;  %vm975_vm14 = vcmp.ge.f32.partialorder %v958_v39, 0.0  ;;  %v2044_v9 = vadd.f32 %v10410_v56, %v2024_v19  ;;  %v2025_v8 = vmul.f32 %v10385_v52, %v10081_v43 }
 0x212   : > { %v5630_v50 = vadd.f32 %v5629_v33, %v5628_v10  ;;  %v5709_v58 = vpop.f32.mrb[123].mxu1  ;;  %4517 = vmatprep.mubr.f32.mxu0 %v2090_v23  ;;  %v10501_v41 = vadd.f32 %v5707_v40, %v2841_v60  ;;  %v2092_v23 = vsel %vm2059_vm13, %v2042_v1, %v2076_v34  ;;  %v2077_v5 = vmul.f32 %v10437_v7, %v2043_v25 }
 0x213   : > { %v5710_v38 = vadd.f32 %v5709_v58, %v5708_v48  ;;  %vm2060_vm15 = vcmp.ge.f32.partialorder %v2043_v25, 0.0  ;;  %v960_v0 = vadd.f32 %v10417_v47, %v940_v22  ;;  %v941_v11 = vmul.f32 %v10399_v49, %v11498_v45 }
 0x214   : > { %v2846_v2 = vadd.f32 %v5630_v50, %v10256_v51  ;;  %v5631_v53 = vpop.f32.mrb[124].mxu0  ;;  %vm976_vm0 = vcmp.ge.f32.partialorder %v959_v24, 0.0  ;;  %v993_v1 = vmul.f32 %v10445_v54, %v959_v24  ;;  %v2045_v29 = vadd.f32 %v10410_v56, %v2025_v8 }
 0x215   : > { %v5711_v3 = vpop.f32.mrb[124].mxu1  ;;  %v5632_v62 = vpop.f32.mrb[125].mxu0  ;;  %4518 = vmatmul.mubr.f32.gmra.mrb[230].mxu0 %v1006_v28  ;;  %v1008_v28 = vsel %vm975_vm14, %v958_v39, %v992_v31  ;;  %v2078_v39 = vmul.f32 %v10437_v7, %v2044_v9  ;;  %vm2061_vm1 = vcmp.ge.f32.partialorder %v2044_v9, 0.0  ;;  %vm977_vm2 = vcmp.ge.f32.partialorder %v960_v0, 0.0 }
 0x216   : > { %v5633_v14 = vadd.f32 %v5632_v62, %v5631_v53  ;;  %v5712_v42 = vpop.f32.mrb[125].mxu1  ;;  %4522 = vmatprep.mubr.f32.mxu0 %v2091_v6  ;;  %v10512_v51 = vadd.f32 %v5710_v38, %v2846_v2  ;;  %v2026_v53 = vmul.f32 %v10385_v52, %v10075_v55  ;;  %v2093_v62 = vsel %vm2060_vm15, %v2043_v25, %v2077_v5 }
 0x217   : > { %v5713_v40 = vadd.f32 %v5712_v42, %v5711_v3  ;;  %v961_v55 = vadd.f32 %v10417_v47, %v941_v11  ;;  %v1009_v25 = vsel %vm976_vm0, %v959_v24, %v993_v1  ;;  %v994_v31 = vmul.f32 %v10445_v54, %v960_v0 }
 0x218   : > { %v2851_v60 = vadd.f32 %v5633_v14, %v10279_v37  ;;  %v5634_v10 = vpop.f32.mrb[126].mxu0  ;;  %v11499_v14 = vld [vmem:[#allocation64_spill] sm:$0xff]  ;;  %vm2062_vm3 = vcmp.ge.f32.partialorder %v2045_v29, 0.0 }
 0x219   : > { %v5714_v48 = vpop.f32.mrb[126].mxu1  ;;  %v5635_v33 = vpop.f32.mrb[127].mxu0  ;;  %4523 = vmatmul.mubr.f32.gmra.mrb[232].mxu0 %v1007_v36  ;;  %v942_v42 = vmul.f32 %v11499_v14, %v10399_v49  ;;  %v1010_v45 = vsel %vm977_vm2, %v960_v0, %v994_v31  ;;  %v995_v11 = vmul.f32 %v10445_v54, %v961_v55  ;;  %vm978_vm4 = vcmp.ge.f32.partialorder %v961_v55, 0.0 }
 0x21a   : > { %v5636_v50 = vadd.f32 %v5635_v33, %v5634_v10  ;;  %v5715_v58 = vpop.f32.mrb[127].mxu1  ;;  %4527 = vmatprep.mubr.f32.mxu0 %v2092_v23  ;;  %v10524_v37 = vadd.f32 %v5713_v40, %v2851_v60  ;;  %v2046_v60 = vadd.f32 %v10410_v56, %v2026_v53  ;;  %v2027_v10 = vmul.f32 %v10385_v52, %v10104_v63 }
 0x21b   : > { %v5716_v38 = vadd.f32 %v5715_v58, %v5714_v48  ;;  %v2094_v48 = vsel %vm2061_vm1, %v2044_v9, %v2078_v39  ;;  %v2079_v33 = vmul.f32 %v10437_v7, %v2045_v29  ;;  %v962_v24 = vadd.f32 %v10417_v47, %v942_v42 }
 0x21c   : > { %v2856_v43 = vadd.f32 %v5636_v50, %v10298_v21  ;;  %v5637_v2 = vpop.f32.mrb[128].mxu0  ;;  %v11500_v50 = vld [vmem:[#allocation67_spill] sm:$0xff]  ;;  %v2028_v63 = vmul.f32 %v10385_v52, %v10097_v15  ;;  %vm2063_vm5 = vcmp.ge.f32.partialorder %v2046_v60, 0.0  ;;  %v1011_v42 = vsel %vm978_vm4, %v961_v55, %v995_v11 }
 0x21d   : > { %v5717_v19 = vpop.f32.mrb[128].mxu1  ;;  %v5638_v3 = vpop.f32.mrb[129].mxu0  ;;  %4528 = vmatmul.mubr.f32.gmra.mrb[234].mxu0 %v1008_v28  ;;  %v943_v58 = vmul.f32 %v10399_v49, %v11500_v50  ;;  %v2095_v53 = vsel %vm2062_vm3, %v2045_v29, %v2079_v33  ;;  %vm979_vm6 = vcmp.ge.f32.partialorder %v962_v24, 0.0  ;;  %v11502_v50 = vld [vmem:[#allocation69_spill] sm:$0xff] }
 0x21e   : > { %v5639_v6 = vadd.f32 %v5638_v3, %v5637_v2  ;;  %v5718_v34 = vpop.f32.mrb[129].mxu1  ;;  %4532 = vmatprep.mubr.f32.mxu0 %v2093_v62  ;;  %v10535_v21 = vadd.f32 %v5716_v38, %v2856_v43  ;;  %v2047_v43 = vadd.f32 %v10410_v56, %v2027_v10 }
 0x21f   : > { %v5719_v59 = vadd.f32 %v5718_v34, %v5717_v19  ;;  %v2080_v19 = vmul.f32 %v10437_v7, %v2046_v60  ;;  %v963_v39 = vadd.f32 %v10417_v47, %v943_v58  ;;  %v10565_v34 = vadd.f32 %v10410_v56, %v2028_v63 }
 0x220   : > { %v2861_v22 = vadd.f32 %v5639_v6, %v10319_v18  ;;  %v5640_v40 = vpop.f32.mrb[130].mxu0  ;;  %v2081_v55 = vmul.f32 %v10437_v7, %v2047_v43  ;;  %vm2064_vm7 = vcmp.ge.f32.partialorder %v2047_v43, 0.0  ;;  %v945_v58 = vmul.f32 %v10399_v49, %v11502_v50  ;;  %v4411_v50 = vld [vmem:[%s11227_s8 + $0x128] sm:$0xff] }
 0x221   : > { %v5720_v36 = vpop.f32.mrb[130].mxu1  ;;  %v5641_v8 = vpop.f32.mrb[131].mxu0  ;;  %4533 = vmatmul.mubr.f32.gmra.mrb[236].mxu0 %v1009_v25  ;;  %v2029_v25 = vmul.f32 %v10385_v52, %v10122_v17  ;;  %vm980_vm8 = vcmp.ge.f32.partialorder %v963_v39, 0.0  ;;  %v2030_v63 = vmul.f32 %v10385_v52, %v10115_v12  ;;  %v997_v11 = vmul.f32 %v10445_v54, %v963_v39 }
 0x222   : > { %v5642_v23 = vadd.f32 %v5641_v8, %v5640_v40  ;;  %v5721_v5 = vpop.f32.mrb[131].mxu1  ;;  %4537 = vmatprep.mubr.f32.mxu0 %v2094_v48  ;;  %v10547_v18 = vadd.f32 %v5719_v59, %v2861_v22  ;;  %v996_v59 = vmul.f32 %v10445_v54, %v962_v24  ;;  %v4422_v22 = vld [vmem:[%s11227_s8 + $0x180] sm:$0xff]  ;;  %v4423_v40 = vld [vmem:[%s11227_s8 + $0x188] sm:$0xff]  ;;  %vm2065_vm9 = vcmp.ge.f32.partialorder %v10565_v34, 0.0 }
 0x223   : > { %v5722_v38 = vadd.f32 %v5721_v5, %v5720_v36  ;;  %v7053_v36 = vpack.c.bf16 %v4423_v40, %v4422_v22  ;;  %v4406_v8 = vld [vmem:[%s11227_s8 + $0x100] sm:$0xff]  ;;  %v4407_v48 = vld [vmem:[%s11227_s8 + $0x108] sm:$0xff]  ;;  %v10623_v40 = vadd.f32 %v10410_v56, %v2030_v63 }
 0x224   : > { %v2866_v28 = vadd.f32 %v5642_v23, %v10324_v46  ;;  %v5643_v9 = vpop.f32.mrb[132].mxu0  ;;  %v11501_v46 = vld [vmem:[#allocation66_spill] sm:$0xff]  ;;  %v7055_v5 = vpack.c.bf16 %v4407_v48, %v4406_v8  ;;  %v2031_v8 = vmul.f32 %v10385_v52, %v10141_v35 }
 0x225   : > { %v5723_v2 = vpop.f32.mrb[132].mxu1  ;;  %v5644_v1 = vpop.f32.mrb[133].mxu0  ;;  %4538 = vmatmul.mubr.f32.gmra.mrb[238].mxu0 %v1010_v45  ;;  %v944_v0 = vmul.f32 %v11501_v46, %v10399_v49  ;;  %7054 = vmatprep.subr.bf16.mxu1 %v7053_v36  ;;  %v1012_v45 = vsel %vm979_vm6, %v962_v24, %v996_v59  ;;  %v2082_v24 = vmul.f32 %v10437_v7, %v10565_v34  ;;  %v4409_v46 = vld [vmem:[%s11227_s8 + $0x118] sm:$0xff]  ;;  %v4427_v36 = vld [vmem:[%s11227_s8 + $0x1a8] sm:$0xff]  ;;  %vm2067_vm13 = vcmp.ge.f32.partialorder %v10623_v40, 0.0 }
 0x226   : > { %v5645_v3 = vadd.f32 %v5644_v1, %v5643_v9  ;;  %v5724_v62 = vpop.f32.mrb[133].mxu1  ;;  %4542 = vmatprep.mubr.f32.mxu0 %v2095_v53  ;;  %v10559_v15 = vadd.f32 %v5722_v38, %v2866_v28  ;;  %7056 = vmatpush3.bf16.msra.mxu1 %v7055_v5  ;;  %v4425_v1 = vld [vmem:[%s11227_s8 + $0x198] sm:$0xff]  ;;  %v2049_v53 = vadd.f32 %v10410_v56, %v2029_v25  ;;  %v4410_v5 = vld [vmem:[%s11227_s8 + $0x120] sm:$0xff] }
 0x227   : > { %v5725_v6 = vadd.f32 %v5724_v62, %v5723_v2  ;;  %v4424_v2 = vld [vmem:[%s11227_s8 + $0x190] sm:$0xff]  ;;  %v10619_v59 = vadd.f32 %v10417_v47, %v945_v58  ;;  %v7063_v63 = vpack.c.bf16 %v4411_v50, %v4410_v5  ;;  %v4415_v5 = vld [vmem:[%s11227_s8 + $0x148] sm:$0xff] }
 0x228   : > { %v2871_v29 = vadd.f32 %v5645_v3, %v10330_v16  ;;  %v5646_v14 = vpop.f32.mrb[134].mxu0  ;;  %v2096_v16 = vsel %vm2063_vm5, %v2046_v60, %v2080_v19  ;;  %v10588_v60 = vadd.f32 %v10417_v47, %v944_v0  ;;  %v7057_v3 = vpack.c.bf16 %v4425_v1, %v4424_v2  ;;  %v4408_v62 = vld [vmem:[%s11227_s8 + $0x110] sm:$0xff] }
 0x229   : > { %v5726_v31 = vpop.f32.mrb[134].mxu1  ;;  %v5647_v10 = vpop.f32.mrb[135].mxu0  ;;  %4543 = vmatmul.mubr.f32.gmra.mrb[240].mxu0 %v1011_v42  ;;  %vm2066_vm11 = vcmp.ge.f32.partialorder %v2049_v53, 0.0  ;;  %vm982_vm12 = vcmp.ge.f32.partialorder %v10619_v59, 0.0 }
 0x22a   : > { %v5648_v33 = vadd.f32 %v5647_v10, %v5646_v14  ;;  %v5727_v23 = vpop.f32.mrb[135].mxu1  ;;  %4547 = vmatprep.mubr.f32.mxu0 %v2096_v16  ;;  %v10585_v17 = vadd.f32 %v5725_v6, %v2871_v29  ;;  %v11503_v14 = vld [vmem:[#allocation68_spill] sm:$0xff]  ;;  %vm981_vm10 = vcmp.ge.f32.partialorder %v10588_v60, 0.0  ;;  %7058 = vmatprep.subr.bf16.mxu1 %v7057_v3  ;;  %v1013_v10 = vsel %vm980_vm8, %v963_v39, %v997_v11 }
 0x22b   : > { %v5728_v38 = vadd.f32 %v5727_v23, %v5726_v31  ;;  %v946_v42 = vmul.f32 %v11503_v14, %v10399_v49  ;;  %v998_v16 = vmul.f32 %v10445_v54, %v10588_v60  ;;  %v2098_v39 = vsel %vm2065_vm9, %v10565_v34, %v2082_v24 }
 0x22c   : > { %v2876_v28 = vadd.f32 %v5648_v33, %v10343_v32  ;;  %v5649_v9 = vpop.f32.mrb[136].mxu0  ;;  %v2097_v32 = vsel %vm2064_vm7, %v2047_v43, %v2081_v55  ;;  %v7059_v43 = vpack.c.bf16 %v4409_v46, %v4408_v62  ;;  %v4426_v55 = vld [vmem:[%s11227_s8 + $0x1a0] sm:$0xff]  ;;  %v2083_v33 = vmul.f32 %v10437_v7, %v2049_v53 }
 0x22d   : > { %v5729_v19 = vpop.f32.mrb[136].mxu1  ;;  %v5650_v12 = vpop.f32.mrb[137].mxu0  ;;  %4548 = vmatmul.mubr.f32.gmra.mrb[242].mxu0 %v1012_v45  ;;  %v7061_v23 = vpack.c.bf16 %v4427_v36, %v4426_v55  ;;  %v966_v34 = vadd.f32 %v10417_v47, %v946_v42  ;;  %v1014_v1 = vsel %vm981_vm10, %v10588_v60, %v998_v16  ;;  %v2032_v24 = vmul.f32 %v10385_v52, %v10152_v30 }
 0x22e   : > { %v5651_v0 = vadd.f32 %v5650_v12, %v5649_v9  ;;  %v5730_v6 = vpop.f32.mrb[137].mxu1  ;;  %4552 = vmatprep.mubr.f32.mxu0 %v2097_v32  ;;  %v10614_v29 = vadd.f32 %v5728_v38, %v2876_v28  ;;  %7060 = vmatpush3.bf16.msra.mxu1 %v7059_v43  ;;  %v11504_v28 = vld [vmem:[#allocation71_spill] sm:$0xff]  ;;  %v2084_v12 = vmul.f32 %v10437_v7, %v10623_v40  ;;  %v4428_v32 = vld [vmem:[%s11227_s8 + $0x1b0] sm:$0xff] }
 0x22f   : > { %v5731_v22 = vadd.f32 %v5730_v6, %v5729_v19  ;;  %v947_v9 = vmul.f32 %v10399_v49, %v11504_v28  ;;  %7062 = vmatprep.subr.bf16.mxu1 %v7061_v23  ;;  %v999_v19 = vmul.f32 %v10445_v54, %v10619_v59  ;;  %v2051_v60 = vadd.f32 %v10410_v56, %v2031_v8  ;;  %v4412_v6 = vld [vmem:[%s11227_s8 + $0x130] sm:$0xff]  ;;  %v4413_v43 = vld [vmem:[%s11227_s8 + $0x138] sm:$0xff]  ;;  %v4430_v8 = vld [vmem:[%s11227_s8 + $0x1c0] sm:$0xff] }
 0x230   : > { %v2881_v25 = vadd.f32 %v5651_v0, %v10361_v27  ;;  %v5652_v31 = vpop.f32.mrb[138].mxu0  ;;  %v2099_v46 = vsel %vm2066_vm11, %v2049_v53, %v2083_v33  ;;  %v7067_v52 = vpack.c.bf16 %v4413_v43, %v4412_v6  ;;  %vm983_vm14 = vcmp.ge.f32.partialorder %v966_v34, 0.0  ;;  %v4414_v23 = vld [vmem:[%s11227_s8 + $0x140] sm:$0xff]  ;;  %v4435_v43 = vld [vmem:[%s11227_s8 + $0x1e8] sm:$0xff] }
 0x231   : > { %v5732_v48 = vpop.f32.mrb[138].mxu1  ;;  %v5653_v27 = vpop.f32.mrb[139].mxu0  ;;  %4553 = vmatmul.mubr.f32.gmra.mrb[244].mxu0 %v1013_v10  ;;  %v1015_v55 = vsel %vm982_vm12, %v10619_v59, %v999_v19  ;;  %v1000_v36 = vmul.f32 %v10445_v54, %v966_v34  ;;  %v2085_v59 = vmul.f32 %v10437_v7, %v2051_v60  ;;  %vm2068_vm15 = vcmp.ge.f32.partialorder %v2051_v60, 0.0 }
 0x232   : > { %v5654_v58 = vadd.f32 %v5653_v27, %v5652_v31  ;;  %v5733_v35 = vpop.f32.mrb[139].mxu1  ;;  %4557 = vmatprep.mubr.f32.mxu0 %v2098_v39  ;;  %v10647_v38 = vadd.f32 %v5731_v22, %v2881_v25  ;;  %7064 = vmatpush3.bf16.msra.mxu1 %v7063_v63  ;;  %v11505_v22 = vld [vmem:[#allocation70_spill] sm:$0xff]  ;;  %v967_v31 = vadd.f32 %v10417_v47, %v947_v9 }
 0x233   : > { %v5734_v45 = vadd.f32 %v5733_v35, %v5732_v48  ;;  %v948_v53 = vmul.f32 %v11505_v22, %v10399_v49  ;;  %v4431_v49 = vld [vmem:[%s11227_s8 + $0x1c8] sm:$0xff]  ;;  %v2052_v39 = vadd.f32 %v10410_v56, %v2032_v24  ;;  %v4417_v24 = vld [vmem:[%s11227_s8 + $0x158] sm:$0xff] }
 0x234   : > { %v2886_v11 = vadd.f32 %v5654_v58, %v10387_v26  ;;  %v5655_v2 = vpop.f32.mrb[140].mxu0  ;;  %v4429_v26 = vld [vmem:[%s11227_s8 + $0x1b8] sm:$0xff]  ;;  %v7069_v33 = vpack.c.bf16 %v4431_v49, %v4430_v8  ;;  %vm984_vm0 = vcmp.ge.f32.partialorder %v967_v31, 0.0  ;;  %v4436_v8 = vld [vmem:[%s11227_s8 + $0x1f0] sm:$0xff] }
 0x235   : > { %v5735_v3 = vpop.f32.mrb[140].mxu1  ;;  %v5656_v62 = vpop.f32.mrb[141].mxu0  ;;  %4558 = vmatmul.mubr.f32.gmra.mrb[246].mxu0 %v1014_v1  ;;  %v7065_v0 = vpack.c.bf16 %v4429_v26, %v4428_v32  ;;  %v968_v63 = vadd.f32 %v10417_v47, %v948_v53  ;;  %v4433_v1 = vld [vmem:[%s11227_s8 + $0x1d8] sm:$0xff]  ;;  %v4416_v26 = vld [vmem:[%s11227_s8 + $0x150] sm:$0xff]  ;;  %vm2069_vm1 = vcmp.ge.f32.partialorder %v2052_v39, 0.0 }
 0x236   : > { %v5657_v14 = vadd.f32 %v5656_v62, %v5655_v2  ;;  %v5736_v42 = vpop.f32.mrb[141].mxu1  ;;  %4562 = vmatprep.mubr.f32.mxu0 %v2099_v46  ;;  %v10678_v30 = vadd.f32 %v5734_v45, %v2886_v11  ;;  %v1016_v45 = vsel %vm983_vm14, %v966_v34, %v1000_v36  ;;  %v1001_v11 = vmul.f32 %v10445_v54, %v967_v31  ;;  %v4432_v2 = vld [vmem:[%s11227_s8 + $0x1d0] sm:$0xff]  ;;  %v4437_v49 = vld [vmem:[%s11227_s8 + $0x1f8] sm:$0xff] }
 0x237   : > { %v5737_v25 = vadd.f32 %v5736_v42, %v5735_v3  ;;  %7066 = vmatprep.subr.bf16.mxu1 %v7065_v0  ;;  %v2101_v34 = vsel %vm2068_vm15, %v2051_v60, %v2085_v59  ;;  %v7073_v32 = vpack.c.bf16 %v4433_v1, %v4432_v2  ;;  %v7075_v60 = vpack.c.bf16 %v4417_v24, %v4416_v26  ;;  %v4420_v59 = vld [vmem:[%s11227_s8 + $0x170] sm:$0xff] }
 0x238   : > { %v2891_v10 = vadd.f32 %v5657_v14, %v10414_v61  ;;  %v5658_v16 = vpop.f32.mrb[142].mxu0  ;;  %7068 = vmatpush3.bf16.msra.mxu1 %v7067_v52  ;;  %v2100_v61 = vsel %vm2067_vm13, %v10623_v40, %v2084_v12  ;;  %v7071_v40 = vpack.c.bf16 %v4415_v5, %v4414_v23  ;;  %v2086_v12 = vmul.f32 %v10437_v7, %v2052_v39 }
 0x239   : > { %v5738_v48 = vpop.f32.mrb[142].mxu1  ;;  %v5659_v27 = vpop.f32.mrb[143].mxu0  ;;  %4563 = vmatmul.mubr.f32.gmra.mrb[248].mxu0 %v1015_v55  ;;  %7070 = vmatprep.subr.bf16.mxu1 %v7069_v33  ;;  %v1017_v0 = vsel %vm984_vm0, %v967_v31, %v1001_v11  ;;  %v1002_v6 = vmul.f32 %v10445_v54, %v968_v63  ;;  %vm985_vm2 = vcmp.ge.f32.partialorder %v968_v63, 0.0  ;;  %v4418_v54 = vld [vmem:[%s11227_s8 + $0x160] sm:$0xff] }
 0x23a   : > { %v5660_v50 = vadd.f32 %v5659_v27, %v5658_v16  ;;  %v5739_v58 = vpop.f32.mrb[143].mxu1  ;;  %4567 = vmatprep.mubr.f32.mxu0 %v2100_v61  ;;  %v10705_v35 = vadd.f32 %v5737_v25, %v2891_v10  ;;  %v2102_v22 = vsel %vm2069_vm1, %v2052_v39, %v2086_v12  ;;  %v4419_v25 = vld [vmem:[%s11227_s8 + $0x168] sm:$0xff]  ;;  %v7081_v61 = vpack.c.bf16 %v4437_v49, %v4436_v8  ;;  %v4421_v39 = vld [vmem:[%s11227_s8 + $0x178] sm:$0xff] }
 0x23b   : > { %v5740_v28 = vadd.f32 %v5739_v58, %v5738_v48  ;;  %v1018_v36 = vsel %vm985_vm2, %v968_v63, %v1002_v6  ;;  %v7083_v5 = vpack.c.bf16 %v4421_v39, %v4420_v59 }
 0x23c   : > { %v2896_v56 = vadd.f32 %v5660_v50, %v10431_v44  ;;  %v6431_v9 = vpop.f32.mrb[144].mxu0  ;;  %7072 = vmatpush3.bf16.msra.mxu1 %v7071_v40 }
 0x23d   : > { %v10718_v47 = vadd.f32 %v6431_v9, %v10466_v13  ;;  %v5805_v19 = vpop.f32.mrb[144].mxu1  ;;  %v3110_v44 = vpop.f32.mrb[145].mxu0  ;;  %4568 = vmatmul.mubr.f32.gmra.mrb[250].mxu0 %v1016_v45  ;;  %7074 = vmatprep.subr.bf16.mxu1 %v7073_v32 }
 0x23e   : > { %v10729_v3 = vadd.f32 %v3110_v44, %v10452_v20  ;;  %v5806_v13 = vpop.f32.mrb[145].mxu1  ;;  %4572 = vmatprep.mubr.f32.mxu0 %v2101_v34  ;;  %v10731_v62 = vadd.f32 %v5740_v28, %v2896_v56  ;;  %v4434_v20 = vld [vmem:[%s11227_s8 + $0x1e0] sm:$0xff] }
 0x23f   : > { %v10733_v46 = vadd.f32 %v5806_v13, %v5805_v19  ;;  %v7077_v53 = vpack.c.bf16 %v4435_v43, %v4434_v20 }
 0x240   : > { %v6434_v7 = vpop.f32.mrb[146].mxu0  ;;  %7076 = vmatpush3.bf16.msra.mxu1 %v7075_v60 }
 0x241   : > { %v10744_v14 = vadd.f32 %v6434_v7, %v10489_v57  ;;  %v5808_v42 = vpop.f32.mrb[146].mxu1  ;;  %v3120_v52 = vpop.f32.mrb[147].mxu0  ;;  %4573 = vmatmul.mubr.f32.gmra.mrb[252].mxu0 %v1017_v0  ;;  %v7079_v57 = vpack.c.bf16 %v4419_v25, %v4418_v54  ;;  %7078 = vmatprep.subr.bf16.mxu1 %v7077_v53 }
 0x242   : > { %v10753_v31 = vadd.f32 %v3120_v52, %v10478_v4  ;;  %v5809_v10 = vpop.f32.mrb[147].mxu1  ;;  %4577 = vmatprep.mubr.f32.mxu0 %v2102_v22 }
 0x243   : > { %v10755_v16 = vadd.f32 %v5809_v10, %v5808_v42 }
 0x244   : > { %v6437_v55 = vpop.f32.mrb[148].mxu0  ;;  %7080 = vmatpush3.bf16.msra.mxu1 %v7079_v57 }
 0x245   : > { %v10764_v4 = vadd.f32 %v6437_v55, %v10512_v51  ;;  %v5811_v48 = vpop.f32.mrb[148].mxu1  ;;  %v3130_v27 = vpop.f32.mrb[149].mxu0  ;;  %4578 = vmatmul.mubr.f32.gmra.mrb[254].mxu0 %v1018_v36  ;;  %7082 = vmatprep.subr.bf16.mxu1 %v7081_v61 }
 0x246   : > { %v10773_v33 = vadd.f32 %v3130_v27, %v10501_v41  ;;  %v5812_v23 = vpop.f32.mrb[149].mxu1 }
 0x247   : > { %v5813_v50 = vadd.f32 %v5812_v23, %v5811_v48 }
 0x248   : > { %v6440_v51 = vpop.f32.mrb[150].mxu0  ;;  %7084 = vmatpush3.bf16.msra.mxu1 %v7083_v5 }
 0x249   : > { %v10776_v58 = vadd.f32 %v6440_v51, %v10535_v21  ;;  %v5814_v40 = vpop.f32.mrb[150].mxu1  ;;  %v3140_v63 = vpop.f32.mrb[151].mxu0 }
 0x24a   : > { %v10779_v28 = vadd.f32 %v3140_v63, %v10524_v37  ;;  %v5815_v56 = vpop.f32.mrb[151].mxu1 }
 0x24b   : > { %v5816_v9 = vadd.f32 %v5815_v56, %v5814_v40 }
 0x24c   : > { %v6443_v45 = vpop.f32.mrb[152].mxu0 }
 0x24d   : > { %v10782_v41 = vadd.f32 %v6443_v45, %v10559_v15  ;;  %v5817_v11 = vpop.f32.mrb[152].mxu1  ;;  %v3150_v2 = vpop.f32.mrb[153].mxu0 }
 0x24e   : > { %v10785_v1 = vadd.f32 %v3150_v2, %v10547_v18  ;;  %v5818_v19 = vpop.f32.mrb[153].mxu1 }
 0x24f   : > { %v5819_v44 = vadd.f32 %v5818_v19, %v5817_v11 }
 0x250   : > { %v6446_v21 = vpop.f32.mrb[154].mxu0 }
 0x251   : > { %v10788_v34 = vadd.f32 %v6446_v21, %v10614_v29  ;;  %v5820_v12 = vpop.f32.mrb[154].mxu1  ;;  %v3160_v37 = vpop.f32.mrb[155].mxu0 }
 0x252   : > { %v10791_v32 = vadd.f32 %v3160_v37, %v10585_v17  ;;  %v5821_v26 = vpop.f32.mrb[155].mxu1 }
 0x253   : > { %v5822_v24 = vadd.f32 %v5821_v26, %v5820_v12 }
 0x254   : > { %v6449_v15 = vpop.f32.mrb[156].mxu0 }
 0x255   : > { %v10794_v13 = vadd.f32 %v6449_v15, %v10678_v30  ;;  %v5823_v60 = vpop.f32.mrb[156].mxu1  ;;  %v3170_v18 = vpop.f32.mrb[157].mxu0 }
 0x256   : > { %v10797_v7 = vadd.f32 %v3170_v18, %v10647_v38  ;;  %v5824_v0 = vpop.f32.mrb[157].mxu1 }
 0x257   : > { %v5825_v6 = vadd.f32 %v5824_v0, %v5823_v60 }
 0x258   : > { %v6452_v29 = vpop.f32.mrb[158].mxu0 }
 0x259   : > { %v10800_v20 = vadd.f32 %v6452_v29, %v10731_v62  ;;  %v5826_v43 = vpop.f32.mrb[158].mxu1  ;;  %v3180_v17 = vpop.f32.mrb[159].mxu0 }
 0x25a   : > { %v10803_v42 = vadd.f32 %v3180_v17, %v10705_v35  ;;  %v5827_v52 = vpop.f32.mrb[159].mxu1 }
 0x25b   : > { %v5828_v22 = vadd.f32 %v5827_v52, %v5826_v43 }
 0x25c   : > { %v5885_v30 = vpop.f32.mrb[160].mxu0 }
 0x25d   : > { %v5829_v53 = vpop.f32.mrb[160].mxu1  ;;  %v5886_v54 = vpop.f32.mrb[161].mxu0 }
 0x25e   : > { %v5830_v25 = vpop.f32.mrb[161].mxu1  ;;  %v5887_v10 = vadd.f32 %v5886_v54, %v5885_v30 }
 0x25f   : > { %v5831_v38 = vadd.f32 %v5830_v25, %v5829_v53 }
 0x260   : > { %v3771_v57 = vadd.f32 %v5887_v10, %v10733_v46  ;;  %v5888_v55 = vpop.f32.mrb[162].mxu0 }
 0x261   : > { %v5832_v36 = vpop.f32.mrb[162].mxu1  ;;  %v5889_v8 = vpop.f32.mrb[163].mxu0 }
 0x262   : > { %v5833_v62 = vpop.f32.mrb[163].mxu1  ;;  %v5890_v49 = vadd.f32 %v5889_v8, %v5888_v55 }
 0x263   : > { %v5834_v48 = vadd.f32 %v5833_v62, %v5832_v36 }
 0x264   : > { %v3776_v27 = vadd.f32 %v5890_v49, %v10755_v16  ;;  %v5891_v35 = vpop.f32.mrb[164].mxu0 }
 0x265   : > { %v5835_v61 = vpop.f32.mrb[164].mxu1  ;;  %v5892_v59 = vpop.f32.mrb[165].mxu0 }
 0x266   : > { %v5836_v39 = vpop.f32.mrb[165].mxu1  ;;  %v5893_v23 = vadd.f32 %v5892_v59, %v5891_v35 }
 0x267   : > { %v5837_v5 = vadd.f32 %v5836_v39, %v5835_v61 }
 0x268   : > { %v3781_v51 = vadd.f32 %v5893_v23, %v5813_v50  ;;  %v5894_v40 = vpop.f32.mrb[166].mxu0 }
 0x269   : > { %v5838_v63 = vpop.f32.mrb[166].mxu1  ;;  %v5895_v56 = vpop.f32.mrb[167].mxu0 }
 0x26a   : > { %v5839_v45 = vpop.f32.mrb[167].mxu1  ;;  %v5896_v46 = vadd.f32 %v5895_v56, %v5894_v40 }
 0x26b   : > { %v5840_v11 = vadd.f32 %v5839_v45, %v5838_v63 }
 0x26c   : > { %v3786_v2 = vadd.f32 %v5896_v46, %v5816_v9  ;;  %v5897_v19 = vpop.f32.mrb[168].mxu0 }
 0x26d   : > { %v5841_v21 = vpop.f32.mrb[168].mxu1  ;;  %v5898_v12 = vpop.f32.mrb[169].mxu0 }
 0x26e   : > { %v5842_v37 = vpop.f32.mrb[169].mxu1  ;;  %v5899_v26 = vadd.f32 %v5898_v12, %v5897_v19 }
 0x26f   : > { %v5843_v16 = vadd.f32 %v5842_v37, %v5841_v21 }
 0x270   : > { %v3791_v15 = vadd.f32 %v5899_v26, %v5819_v44  ;;  %v5900_v60 = vpop.f32.mrb[170].mxu0 }
 0x271   : > { %v5844_v18 = vpop.f32.mrb[170].mxu1  ;;  %v5901_v0 = vpop.f32.mrb[171].mxu0 }
 0x272   : > { %v5845_v29 = vpop.f32.mrb[171].mxu1  ;;  %v5902_v43 = vadd.f32 %v5901_v0, %v5900_v60 }
 0x273   : > { %v5846_v50 = vadd.f32 %v5845_v29, %v5844_v18 }
 0x274   : > { %v10807_v17 = vadd.f32 %v5902_v43, %v5822_v24  ;;  %v5903_v52 = vpop.f32.mrb[172].mxu0 }
 0x275   : > { %v5847_v30 = vpop.f32.mrb[172].mxu1  ;;  %v5904_v53 = vpop.f32.mrb[173].mxu0 }
 0x276   : > { %v5848_v54 = vpop.f32.mrb[173].mxu1  ;;  %v5905_v9 = vadd.f32 %v5904_v53, %v5903_v52 }
 0x277   : > { %v10809_v25 = vadd.f32 %v5848_v54, %v5847_v30 }
 0x278   : > { %v10811_v10 = vadd.f32 %v5905_v9, %v5825_v6  ;;  %v5906_v55 = vpop.f32.mrb[174].mxu0 }
 0x279   : > { %v5850_v36 = vpop.f32.mrb[174].mxu1  ;;  %v5907_v44 = vpop.f32.mrb[175].mxu0 }
 0x27a   : > { %v5851_v8 = vpop.f32.mrb[175].mxu1  ;;  %v5908_v62 = vadd.f32 %v5907_v44, %v5906_v55 }
 0x27b   : > { %v10813_v49 = vadd.f32 %v5851_v8, %v5850_v36 }
 0x27c   : > { %v10815_v35 = vadd.f32 %v5908_v62, %v5828_v22  ;;  %v5909_v24 = vpop.f32.mrb[176].mxu0 }
 0x27d   : > { %v5965_v61 = vpop.f32.mrb[176].mxu1  ;;  %v5910_v59 = vpop.f32.mrb[177].mxu0 }
 0x27e   : > { %v5911_v39 = vadd.f32 %v5910_v59, %v5909_v24  ;;  %v5966_v23 = vpop.f32.mrb[177].mxu1 }
 0x27f   : > { %v5967_v40 = vadd.f32 %v5966_v23, %v5965_v61 }
 0x280   : > { %v10817_v63 = vadd.f32 %v5911_v39, %v5831_v38  ;;  %v5912_v56 = vpop.f32.mrb[178].mxu0 }
 0x281   : > { %v10819_v6 = vadd.f32 %v5967_v40, %v3771_v57  ;;  %v5968_v45 = vpop.f32.mrb[178].mxu1  ;;  %v5913_v46 = vpop.f32.mrb[179].mxu0 }
 0x282   : > { %v5914_v19 = vadd.f32 %v5913_v46, %v5912_v56  ;;  %v5969_v21 = vpop.f32.mrb[179].mxu1 }
 0x283   : > { %v5970_v12 = vadd.f32 %v5969_v21, %v5968_v45 }
 0x284   : > { %v10821_v37 = vadd.f32 %v5914_v19, %v5834_v48  ;;  %v5915_v22 = vpop.f32.mrb[180].mxu0 }
 0x285   : > { %v10823_v26 = vadd.f32 %v5970_v12, %v3776_v27  ;;  %v5971_v60 = vpop.f32.mrb[180].mxu1  ;;  %v5916_v18 = vpop.f32.mrb[181].mxu0 }
 0x286   : > { %v5917_v0 = vadd.f32 %v5916_v18, %v5915_v22  ;;  %v5972_v29 = vpop.f32.mrb[181].mxu1 }
 0x287   : > { %v5973_v43 = vadd.f32 %v5972_v29, %v5971_v60 }
 0x288   : > { %v10825_v38 = vadd.f32 %v5917_v0, %v5837_v5  ;;  %v5918_v52 = vpop.f32.mrb[182].mxu0 }
 0x289   : > { %v10827_v57 = vadd.f32 %v5973_v43, %v3781_v51  ;;  %v5974_v30 = vpop.f32.mrb[182].mxu1  ;;  %v5919_v53 = vpop.f32.mrb[183].mxu0 }
 0x28a   : > { %v5920_v54 = vadd.f32 %v5919_v53, %v5918_v52  ;;  %v5975_v9 = vpop.f32.mrb[183].mxu1 }
 0x28b   : > { %v5976_v55 = vadd.f32 %v5975_v9, %v5974_v30 }
 0x28c   : > { %v10829_v48 = vadd.f32 %v5920_v54, %v5840_v11  ;;  %v5921_v36 = vpop.f32.mrb[184].mxu0 }
 0x28d   : > { %v10831_v27 = vadd.f32 %v5976_v55, %v3786_v2  ;;  %v5977_v44 = vpop.f32.mrb[184].mxu1  ;;  %v5922_v8 = vpop.f32.mrb[185].mxu0 }
 0x28e   : > { %v5923_v62 = vadd.f32 %v5922_v8, %v5921_v36  ;;  %v5978_v24 = vpop.f32.mrb[185].mxu1 }
 0x28f   : > { %v5979_v61 = vadd.f32 %v5978_v24, %v5977_v44 }
 0x290   : > { %v10833_v5 = vadd.f32 %v5923_v62, %v5843_v16  ;;  %v5924_v59 = vpop.f32.mrb[186].mxu0 }
 0x291   : > { %v10835_v51 = vadd.f32 %v5979_v61, %v3791_v15  ;;  %v5980_v39 = vpop.f32.mrb[186].mxu1  ;;  %v5925_v23 = vpop.f32.mrb[187].mxu0 }
 0x292   : > { %v5926_v40 = vadd.f32 %v5925_v23, %v5924_v59  ;;  %v5981_v56 = vpop.f32.mrb[187].mxu1 }
 0x293   : > { %v5982_v45 = vadd.f32 %v5981_v56, %v5980_v39 }
 0x294   : > { %v10837_v11 = vadd.f32 %v5926_v40, %v5846_v50  ;;  %v5927_v46 = vpop.f32.mrb[188].mxu0 }
 0x295   : > { %v10840_v2 = vadd.f32 %v5982_v45, %v10807_v17  ;;  %v5983_v19 = vpop.f32.mrb[188].mxu1  ;;  %v5928_v21 = vpop.f32.mrb[189].mxu0 }
 0x296   : > { %v5929_v12 = vadd.f32 %v5928_v21, %v5927_v46  ;;  %v5984_v22 = vpop.f32.mrb[189].mxu1 }
 0x297   : > { %v5985_v16 = vadd.f32 %v5984_v22, %v5983_v19 }
 0x298   : > { %v10843_v60 = vadd.f32 %v5929_v12, %v10809_v25  ;;  %v5930_v15 = vpop.f32.mrb[190].mxu0 }
 0x299   : > { %v10846_v18 = vadd.f32 %v5985_v16, %v10811_v10  ;;  %v5986_v0 = vpop.f32.mrb[190].mxu1  ;;  %v5931_v29 = vpop.f32.mrb[191].mxu0 }
 0x29a   : > { %v5932_v50 = vadd.f32 %v5931_v29, %v5930_v15  ;;  %v5987_v43 = vpop.f32.mrb[191].mxu1 }
 0x29b   : > { %v5988_v52 = vadd.f32 %v5987_v43, %v5986_v0 }
 0x29c   : > { %v10849_v17 = vadd.f32 %v5932_v50, %v10813_v49  ;;  %v6045_v30 = vpop.f32.mrb[192].mxu0 }
 0x29d   : > { %v10852_v53 = vadd.f32 %v5988_v52, %v10815_v35  ;;  %v5989_v54 = vpop.f32.mrb[192].mxu1  ;;  %v6046_v9 = vpop.f32.mrb[193].mxu0 }
 0x29e   : > { %v5990_v25 = vpop.f32.mrb[193].mxu1  ;;  %v6047_v55 = vadd.f32 %v6046_v9, %v6045_v30 }
 0x29f   : > { %v5991_v36 = vadd.f32 %v5990_v25, %v5989_v54 }
 0x2a0   : > { %v6048_v44 = vpop.f32.mrb[194].mxu0  ;;  %v10855_v10 = vadd.f32 %v6047_v55, %v10819_v6 }
 0x2a1   : > { %v10858_v8 = vadd.f32 %v5991_v36, %v10817_v63  ;;  %v5992_v62 = vpop.f32.mrb[194].mxu1  ;;  %v6049_v24 = vpop.f32.mrb[195].mxu0 }
 0x2a2   : > { %v5993_v49 = vpop.f32.mrb[195].mxu1  ;;  %v6050_v61 = vadd.f32 %v6049_v24, %v6048_v44 }
 0x2a3   : > { %v5994_v59 = vadd.f32 %v5993_v49, %v5992_v62 }
 0x2a4   : > { %v6051_v39 = vpop.f32.mrb[196].mxu0  ;;  %v4066_v35 = vadd.f32 %v6050_v61, %v10823_v26 }
 0x2a5   : > { %v10862_v23 = vadd.f32 %v5994_v59, %v10821_v37  ;;  %v5995_v40 = vpop.f32.mrb[196].mxu1  ;;  %v6052_v56 = vpop.f32.mrb[197].mxu0 }
 0x2a6   : > { %v5996_v45 = vpop.f32.mrb[197].mxu1  ;;  %v6053_v46 = vadd.f32 %v6052_v56, %v6051_v39 }
 0x2a7   : > { %v5997_v6 = vadd.f32 %v5996_v45, %v5995_v40 }
 0x2a8   : > { %v6054_v19 = vpop.f32.mrb[198].mxu0  ;;  %v10865_v63 = vadd.f32 %v6053_v46, %v10827_v57 }
 0x2a9   : > { %v10868_v21 = vadd.f32 %v5997_v6, %v10825_v38  ;;  %v5998_v12 = vpop.f32.mrb[198].mxu1  ;;  %v6055_v22 = vpop.f32.mrb[199].mxu0 }
 0x2aa   : > { %v5999_v16 = vpop.f32.mrb[199].mxu1  ;;  %v6056_v15 = vadd.f32 %v6055_v22, %v6054_v19 }
 0x2ab   : > { %v6000_v26 = vadd.f32 %v5999_v16, %v5998_v12 }
 0x2ac   : > { %v6057_v0 = vpop.f32.mrb[200].mxu0  ;;  %v4076_v37 = vadd.f32 %v6056_v15, %v10831_v27  ;;  %v11506_v27 = vld [vmem:[#allocation9_spill] sm:$0xff]  ;;  %v7225_v15 = vld [vmem:[%s11229_s10] sm:$0xf] }
 0x2ad   : > { %v10872_v29 = vadd.f32 %v6000_v26, %v10829_v48  ;;  %v6001_v50 = vpop.f32.mrb[200].mxu1  ;;  %v6058_v43 = vpop.f32.mrb[201].mxu0  ;;  %v3191_v62 = vsub.s32 2, %v11506_v27  ;;  %v4286_v6 = vsub.s32 3, %v11506_v27 }
 0x2ae   : > { %v6002_v52 = vpop.f32.mrb[201].mxu1  ;;  %v6059_v30 = vadd.f32 %v6058_v43, %v6057_v0 }
 0x2af   : > { %v6003_v57 = vadd.f32 %v6002_v52, %v6001_v50  ;;  %v10902_v26 = vrot.slane %v7225_v15, %v3191_v62 }
 0x2b0   : > { %v6060_v54 = vpop.f32.mrb[202].mxu0  ;;  %v10875_v38 = vadd.f32 %v6059_v30, %v10835_v51 }
 0x2b1   : > { %v10878_v9 = vadd.f32 %v6003_v57, %v10833_v5  ;;  %v6004_v25 = vpop.f32.mrb[202].mxu1  ;;  %v6061_v55 = vpop.f32.mrb[203].mxu0  ;;  %v7224_v5 = vld [vmem:[%s11228_s9] sm:$0xf] }
 0x2b2   : > { %v6005_v36 = vpop.f32.mrb[203].mxu1  ;;  %v6062_v44 = vadd.f32 %v6061_v55, %v6060_v54  ;;  %v10890_v56 = vrot.slane %v7224_v5, %v3191_v62  ;;  %v10906_v43 = vrot.slane %v7224_v5, %v4286_v6  ;;  %v10918_v62 = vstv %s5026_s30  ;;  %s11126_s30 = scalar_lea.vmem %s11232_s13, %s5024_s20 }
 0x2b3   : > { %v6006_v48 = vadd.f32 %v6005_v36, %v6004_v25  ;;  %v10912_v25 = vrot.slane %v7225_v15, %v4286_v6  ;;  %v10926_v5 = vstv %s5027_s25 }
 0x2b4   : > { %v6063_v24 = vpop.f32.mrb[204].mxu0  ;;  %v10882_v49 = vadd.f32 %v6062_v44, %v10840_v2  ;;  %v3193_v0 = vmul.f32 %v10890_v56, %v10729_v3  ;;  %v3194_v44 = vmul.f32 %v10890_v56, %v10718_v47  ;;  %v3195_v6 = vmul.f32 %v10890_v56, %v10753_v31 }
 0x2b5   : > { %v10885_v61 = vadd.f32 %v6006_v48, %v10837_v11  ;;  %v6007_v59 = vpop.f32.mrb[204].mxu1  ;;  %v6064_v51 = vpop.f32.mrb[205].mxu0 }
 0x2b6   : > { %v6008_v39 = vpop.f32.mrb[205].mxu1  ;;  %v6065_v40 = vadd.f32 %v6064_v51, %v6063_v24  ;;  %v3213_v3 = vadd.f32 %v10902_v26, %v3193_v0 }
 0x2b7   : > { %v6009_v45 = vadd.f32 %v6008_v39, %v6007_v59 }
 0x2b8   : > { %v6066_v46 = vpop.f32.mrb[206].mxu0  ;;  %v10894_v2 = vadd.f32 %v6065_v40, %v10846_v18  ;;  %vm3230_vm3 = vcmp.ge.f32.partialorder %v3213_v3, 0.0 }
 0x2b9   : > { %v10897_v11 = vadd.f32 %v6009_v45, %v10843_v60  ;;  %v6010_v19 = vpop.f32.mrb[206].mxu1  ;;  %v6067_v12 = vpop.f32.mrb[207].mxu0  ;;  %v3247_v45 = vmul.f32 %v10918_v62, %v3213_v3 }
 0x2ba   : > { %v6011_v22 = vpop.f32.mrb[207].mxu1  ;;  %v6068_v16 = vadd.f32 %v6067_v12, %v6066_v46 }
 0x2bb   : > { %v6012_v50 = vadd.f32 %v6011_v22, %v6010_v19 }
 0x2bc   : > { %v6069_v18 = vpop.f32.mrb[208].mxu0  ;;  %v4096_v60 = vadd.f32 %v6068_v16, %v10852_v53 }
 0x2bd   : > { %v10910_v52 = vadd.f32 %v6012_v50, %v10849_v17  ;;  %v6487_v30 = vpop.f32.mrb[208].mxu1  ;;  %v6070_v57 = vpop.f32.mrb[209].mxu0 }
 0x2be   : > { %v4211_v54 = vadd.f32 %v6487_v30, %v4066_v35  ;;  %v6071_v55 = vadd.f32 %v6070_v57, %v6069_v18  ;;  %v4205_v36 = vpop.f32.mrb[209].mxu1 }
 0x2bf   : > { %v4206_v27 = vadd.f32 %v4205_v36, %v10855_v10  ;;  %v3214_v10 = vadd.f32 %v10902_v26, %v3194_v44  ;;  %v3215_v36 = vadd.f32 %v10902_v26, %v3195_v6 }
 0x2c0   : > { %v4289_v53 = vmul.f32 %v10906_v43, %v4211_v54  ;;  %v6072_v17 = vpop.f32.mrb[210].mxu0  ;;  %v10922_v48 = vadd.f32 %v6071_v55, %v10858_v8 }
 0x2c1   : > { %v4288_v35 = vmul.f32 %v10906_v43, %v4206_v27  ;;  %v6490_v24 = vpop.f32.mrb[210].mxu1  ;;  %v6073_v59 = vpop.f32.mrb[211].mxu0  ;;  %v3248_v55 = vmul.f32 %v10918_v62, %v3214_v10  ;;  %v3263_v27 = vsel %vm3230_vm3, %v3213_v3, %v3247_v45  ;;  %vm3231_vm6 = vcmp.ge.f32.partialorder %v3214_v10, 0.0 }
 0x2c2   : > { %v4309_v51 = vadd.f32 %v10912_v25, %v4289_v53  ;;  %v4221_v39 = vadd.f32 %v6490_v24, %v4076_v37  ;;  %v6074_v47 = vadd.f32 %v6073_v59, %v6072_v17  ;;  %v4215_v40 = vpop.f32.mrb[211].mxu1  ;;  %v3197_v45 = vmul.f32 %v10890_v56, %v10773_v33 }
 0x2c3   : > { %v4308_v46 = vadd.f32 %v10912_v25, %v4288_v35  ;;  %v4216_v8 = vadd.f32 %v4215_v40, %v10865_v63  ;;  %v3196_v63 = vmul.f32 %v10890_v56, %v10744_v14  ;;  %v3264_v40 = vsel %vm3231_vm6, %v3214_v10, %v3248_v55 }
 0x2c4   : > { %v4291_v19 = vmul.f32 %v10906_v43, %v4221_v39  ;;  %v6075_v12 = vpop.f32.mrb[212].mxu0  ;;  %v4106_v37 = vadd.f32 %v6074_v47, %v10862_v23  ;;  %v4343_v50 = vmul.f32 %v10926_v5, %v4309_v51  ;;  %vm4326_vm5 = vcmp.ge.f32.partialorder %v4309_v51, 0.0 }
 0x2c5   : > { %v4290_v22 = vmul.f32 %v10906_v43, %v4216_v8  ;;  %v6493_v16 = vpop.f32.mrb[212].mxu1  ;;  %v6076_v15 = vpop.f32.mrb[213].mxu0  ;;  %vm4325_vm4 = vcmp.ge.f32.partialorder %v4308_v46, 0.0  ;;  %v4342_v0 = vmul.f32 %v10926_v5, %v4308_v46  ;;  %v3216_v3 = vadd.f32 %v10902_v26, %v3196_v63 }
 0x2c6   : > { %v4231_v31 = vadd.f32 %v6493_v16, %v10882_v49  ;;  %v6077_v18 = vadd.f32 %v6076_v15, %v6075_v12  ;;  %v4225_v30 = vpop.f32.mrb[213].mxu1  ;;  %v4311_v49 = vadd.f32 %v10912_v25, %v4291_v19  ;;  %vm3232_vm8 = vcmp.ge.f32.partialorder %v3215_v36, 0.0 }
 0x2c7   : > { %v4310_v57 = vadd.f32 %v10912_v25, %v4290_v22  ;;  %v4226_v23 = vadd.f32 %v4225_v30, %v10875_v38  ;;  %v4358_v54 = vsel %vm4325_vm4, %v4308_v46, %v4342_v0  ;;  %v4359_v38 = vsel %vm4326_vm5, %v4309_v51, %v4343_v50 }
 0x2c8   : > { %4647 = vmatprep.mubr.f32.mxu1 %v4358_v54  ;;  %v6078_v44 = vpop.f32.mrb[214].mxu0  ;;  %v4111_v14 = vadd.f32 %v6077_v18, %v10868_v21  ;;  %v3249_v51 = vmul.f32 %v10918_v62, %v3215_v36  ;;  %vm4328_vm9 = vcmp.ge.f32.partialorder %v4311_v49, 0.0  ;;  %v3250_v0 = vmul.f32 %v10918_v62, %v3216_v3 }
 0x2c9   : > { %v4292_v53 = vmul.f32 %v10906_v43, %v4226_v23  ;;  %v6496_v17 = vpop.f32.mrb[214].mxu1  ;;  %4648 = vmatmul.mubr.f32.vlgmr.msra.gmra.mrb[224].mxu1 %v3263_v27  ;;  %v6079_v35 = vpop.f32.mrb[215].mxu0  ;;  %v4344_v24 = vmul.f32 %v10926_v5, %v4310_v57  ;;  %vm4327_vm7 = vcmp.ge.f32.partialorder %v4310_v57, 0.0  ;;  %v3217_v50 = vadd.f32 %v10902_v26, %v3197_v45 }
 0x2ca   : > { %v4241_v59 = vadd.f32 %v6496_v17, %v4096_v60  ;;  %v6080_v39 = vadd.f32 %v6079_v35, %v6078_v44  ;;  %v4235_v47 = vpop.f32.mrb[215].mxu1  ;;  %4652 = vmatprep.mubr.f32.mxu1 %v4359_v38  ;;  %v4293_v60 = vmul.f32 %v10906_v43, %v4231_v31  ;;  %v3265_v31 = vsel %vm3232_vm8, %v3215_v36, %v3249_v51 }
 0x2cb   : > { %v4236_v21 = vadd.f32 %v4235_v47, %v10894_v2  ;;  %v4312_v6 = vadd.f32 %v10912_v25, %v4292_v53  ;;  %v4360_v22 = vsel %vm4327_vm7, %v4310_v57, %v4344_v24  ;;  %v4345_v2 = vmul.f32 %v10926_v5, %v4311_v49 }
 0x2cc   : > { %v6081_v46 = vpop.f32.mrb[216].mxu0  ;;  %v4116_v8 = vadd.f32 %v6080_v39, %v10872_v29  ;;  %v3198_v29 = vmul.f32 %v10890_v56, %v10764_v4  ;;  %vm3233_vm10 = vcmp.ge.f32.partialorder %v3216_v3, 0.0  ;;  %v4313_v18 = vadd.f32 %v10912_v25, %v4293_v60 }
 0x2cd   : > { %v6499_v19 = vpop.f32.mrb[216].mxu1  ;;  %4653 = vmatmul.mubr.f32.gmra.mrb[226].mxu1 %v3264_v40  ;;  %v6082_v12 = vpop.f32.mrb[217].mxu0  ;;  %v4294_v30 = vmul.f32 %v10906_v43, %v4236_v21  ;;  %v4361_v4 = vsel %vm4328_vm9, %v4311_v49, %v4345_v2  ;;  %vm4329_vm11 = vcmp.ge.f32.partialorder %v4312_v6, 0.0  ;;  %v3199_v53 = vmul.f32 %v10890_v56, %v10779_v28 }
 0x2ce   : > { %v10962_v10 = vadd.f32 %v6499_v19, %v4106_v37  ;;  %v6083_v16 = vadd.f32 %v6082_v12, %v6081_v46  ;;  %v4245_v33 = vpop.f32.mrb[217].mxu1  ;;  %4657 = vmatprep.mubr.f32.mxu1 %v4360_v22  ;;  %v3218_v36 = vadd.f32 %v10902_v26, %v3198_v29  ;;  %vm3234_vm12 = vcmp.ge.f32.partialorder %v3217_v50, 0.0 }
 0x2cf   : > { %v4246_v15 = vadd.f32 %v4245_v33, %v10922_v48  ;;  %v4346_v48 = vmul.f32 %v10926_v5, %v4312_v6  ;;  %v3251_v35 = vmul.f32 %v10918_v62, %v3217_v50  ;;  %v4295_v38 = vmul.f32 %v10906_v43, %v4241_v59 }
 0x2d0   : > { %v6084_v63 = vpop.f32.mrb[218].mxu0  ;;  %v4121_v37 = vadd.f32 %v6083_v16, %v10878_v9  ;;  %v3266_v9 = vsel %vm3233_vm10, %v3216_v3, %v3250_v0  ;;  %v4314_v24 = vadd.f32 %v10912_v25, %v4294_v30  ;;  %v4347_v21 = vmul.f32 %v10926_v5, %v4313_v18 }
 0x2d1   : > { %v6502_v57 = vpop.f32.mrb[218].mxu1  ;;  %4658 = vmatmul.mubr.f32.gmra.mrb[228].mxu1 %v3265_v31  ;;  %v6085_v23 = vpop.f32.mrb[219].mxu0  ;;  %vm4330_vm13 = vcmp.ge.f32.partialorder %v4313_v18, 0.0  ;;  %v3252_v59 = vmul.f32 %v10918_v62, %v3218_v36  ;;  %v3219_v46 = vadd.f32 %v10902_v26, %v3199_v53  ;;  %v3267_v51 = vsel %vm3234_vm12, %v3217_v50, %v3251_v35 }
 0x2d2   : > { %v10974_v54 = vadd.f32 %v6502_v57, %v4116_v8  ;;  %v6086_v55 = vadd.f32 %v6085_v23, %v6084_v63  ;;  %v4255_v44 = vpop.f32.mrb[219].mxu1  ;;  %4662 = vmatprep.mubr.f32.mxu1 %v4361_v4  ;;  %vm3235_vm14 = vcmp.ge.f32.partialorder %v3218_v36, 0.0  ;;  %v4296_v19 = vmul.f32 %v10906_v43, %v4246_v15 }
 0x2d3   : > { %v10977_v27 = vadd.f32 %v4255_v44, %v4111_v14  ;;  %v4362_v14 = vsel %vm4329_vm11, %v4312_v6, %v4346_v48  ;;  %v4315_v6 = vadd.f32 %v10912_v25, %v4295_v38  ;;  %v4348_v2 = vmul.f32 %v10926_v5, %v4314_v24 }
 0x2d4   : > { %v6087_v17 = vpop.f32.mrb[220].mxu0  ;;  %v4126_v49 = vadd.f32 %v6086_v55, %v10885_v61  ;;  %v3200_v61 = vmul.f32 %v10890_v56, %v10776_v58  ;;  %v4363_v58 = vsel %vm4330_vm13, %v4313_v18, %v4347_v21  ;;  %vm4331_vm15 = vcmp.ge.f32.partialorder %v4314_v24, 0.0 }
 0x2d5   : > { %v6505_v39 = vpop.f32.mrb[220].mxu1  ;;  %4663 = vmatmul.mubr.f32.gmra.mrb[230].mxu1 %v3266_v9  ;;  %v6088_v47 = vpop.f32.mrb[221].mxu0  ;;  %v3201_v50 = vmul.f32 %v10890_v56, %v10785_v1  ;;  %vm3236_vm0 = vcmp.ge.f32.partialorder %v3219_v46, 0.0  ;;  %v3253_v31 = vmul.f32 %v10918_v62, %v3219_v46  ;;  %v4316_v18 = vadd.f32 %v10912_v25, %v4296_v19 }
 0x2d6   : > { %v10987_v3 = vadd.f32 %v6505_v39, %v4126_v49  ;;  %v6089_v40 = vadd.f32 %v6088_v47, %v6087_v17  ;;  %v4265_v28 = vpop.f32.mrb[221].mxu1  ;;  %4667 = vmatprep.mubr.f32.mxu1 %v4362_v14  ;;  %v3220_v29 = vadd.f32 %v10902_v26, %v3200_v61  ;;  %v4364_v57 = vsel %vm4331_vm15, %v4314_v24, %v4348_v2 }
 0x2d7   : > { %v10991_v45 = vadd.f32 %v4265_v28, %v4121_v37  ;;  %v4297_v37 = vmul.f32 %v10906_v43, %v10962_v10  ;;  %v4349_v23 = vmul.f32 %v10926_v5, %v4315_v6  ;;  %vm4332_vm1 = vcmp.ge.f32.partialorder %v4315_v6, 0.0 }
 0x2d8   : > { %v6090_v8 = vpop.f32.mrb[222].mxu0  ;;  %v4131_v60 = vadd.f32 %v6089_v40, %v10897_v11  ;;  %v3268_v11 = vsel %vm3235_vm14, %v3218_v36, %v3252_v59  ;;  %v3202_v1 = vmul.f32 %v10890_v56, %v10782_v41  ;;  %v3269_v10 = vsel %vm3236_vm0, %v3219_v46, %v3253_v31 }
 0x2d9   : > { %v6508_v12 = vpop.f32.mrb[222].mxu1  ;;  %4668 = vmatmul.mubr.f32.gmra.mrb[232].mxu1 %v3267_v51  ;;  %v6091_v22 = vpop.f32.mrb[223].mxu0  ;;  %vm3237_vm2 = vcmp.ge.f32.partialorder %v3220_v29, 0.0  ;;  %v3254_v44 = vmul.f32 %v10918_v62, %v3220_v29  ;;  %v4317_v36 = vadd.f32 %v10912_v25, %v4297_v37  ;;  %v4298_v9 = vmul.f32 %v10906_v43, %v10977_v27 }
 0x2da   : > { %v6092_v16 = vadd.f32 %v6091_v22, %v6090_v8  ;;  %v4275_v33 = vpop.f32.mrb[223].mxu1  ;;  %4672 = vmatprep.mubr.f32.mxu1 %v4363_v58  ;;  %v4365_v17 = vsel %vm4332_vm1, %v4315_v6, %v4349_v23  ;;  %v4350_v49 = vmul.f32 %v10926_v5, %v4316_v18  ;;  %vm4333_vm3 = vcmp.ge.f32.partialorder %v4316_v18, 0.0 }
 0x2db   : > { %v11001_v0 = vadd.f32 %v4275_v33, %v4131_v60  ;;  %v3222_v41 = vadd.f32 %v10902_v26, %v3202_v1  ;;  %v3203_v38 = vmul.f32 %v10890_v56, %v10791_v32  ;;  %v3270_v39 = vsel %vm3237_vm2, %v3220_v29, %v3254_v44 }
 0x2dc   : > { %v4136_v15 = vadd.f32 %v6092_v16, %v10910_v52  ;;  %v6157_v63 = vpop.f32.mrb[224].mxu0  ;;  %v3221_v52 = vadd.f32 %v10902_v26, %v3201_v50  ;;  %v4299_v27 = vmul.f32 %v10906_v43, %v10974_v54  ;;  %v4318_v14 = vadd.f32 %v10912_v25, %v4298_v9 }
 0x2dd   : > { %4673 = vmatmul.mubr.f32.gmra.mrb[234].mxu1 %v3268_v11  ;;  %v6158_v30 = vpop.f32.mrb[225].mxu0  ;;  %v4366_v40 = vsel %vm4333_vm3, %v4316_v18, %v4350_v49  ;;  %v4351_v28 = vmul.f32 %v10926_v5, %v4317_v36  ;;  %vm4334_vm5 = vcmp.ge.f32.partialorder %v4317_v36, 0.0  ;;  %v3204_v32 = vmul.f32 %v10890_v56, %v10788_v34 }
 0x2de   : > { %v11011_v4 = vadd.f32 %v6508_v12, %v4136_v15  ;;  %v11013_v48 = vadd.f32 %v6158_v30, %v6157_v63  ;;  %4677 = vmatprep.mubr.f32.mxu1 %v4364_v57  ;;  %vm3238_vm4 = vcmp.ge.f32.partialorder %v3221_v52, 0.0  ;;  %v3255_v47 = vmul.f32 %v10918_v62, %v3221_v52 }
 0x2df   : > { %v3223_v59 = vadd.f32 %v10902_v26, %v3203_v38  ;;  %vm3239_vm6 = vcmp.ge.f32.partialorder %v3222_v41, 0.0  ;;  %v3256_v54 = vmul.f32 %v10918_v62, %v3222_v41  ;;  %v4319_v51 = vadd.f32 %v10912_v25, %v4299_v27 }
 0x2e0   : > { %v6160_v55 = vpop.f32.mrb[226].mxu0  ;;  %v3271_v8 = vsel %vm3238_vm4, %v3221_v52, %v3255_v47  ;;  %v4300_v60 = vmul.f32 %v10906_v43, %v10991_v45  ;;  %v4367_v19 = vsel %vm4334_vm5, %v4317_v36, %v4351_v28  ;;  %v4352_v12 = vmul.f32 %v10926_v5, %v4318_v14 }
 0x2e1   : > { %4678 = vmatmul.mubr.f32.gmra.mrb[236].mxu1 %v3269_v10  ;;  %v6161_v53 = vpop.f32.mrb[227].mxu0  ;;  %vm4335_vm7 = vcmp.ge.f32.partialorder %v4318_v14, 0.0  ;;  %v3224_v34 = vadd.f32 %v10902_v26, %v3204_v32  ;;  %v3205_v58 = vmul.f32 %v10890_v56, %v10797_v7  ;;  %v3272_v16 = vsel %vm3239_vm6, %v3222_v41, %v3256_v54 }
 0x2e2   : > { %v11023_v35 = vadd.f32 %v6161_v53, %v6160_v55  ;;  %4682 = vmatprep.mubr.f32.mxu1 %v4365_v17  ;;  %vm3240_vm8 = vcmp.ge.f32.partialorder %v3223_v59, 0.0  ;;  %v3257_v33 = vmul.f32 %v10918_v62, %v3223_v59  ;;  %v4301_v45 = vmul.f32 %v10906_v43, %v10987_v3 }
 0x2e3   : > { %v4320_v29 = vadd.f32 %v10912_v25, %v4300_v60  ;;  %v4368_v50 = vsel %vm4335_vm7, %v4318_v14, %v4352_v12  ;;  %v4353_v15 = vmul.f32 %v10926_v5, %v4319_v51  ;;  %vm4336_vm9 = vcmp.ge.f32.partialorder %v4319_v51, 0.0 }
 0x2e4   : > { %v6163_v24 = vpop.f32.mrb[228].mxu0  ;;  %v3206_v7 = vmul.f32 %v10890_v56, %v10794_v13  ;;  %v3225_v31 = vadd.f32 %v10902_v26, %v3205_v58  ;;  %v3273_v18 = vsel %vm3240_vm8, %v3223_v59, %v3257_v33  ;;  %vm3241_vm10 = vcmp.ge.f32.partialorder %v3224_v34, 0.0 }
 0x2e5   : > { %4683 = vmatmul.mubr.f32.gmra.mrb[238].mxu1 %v3270_v39  ;;  %v6164_v21 = vpop.f32.mrb[229].mxu0  ;;  %v3258_v3 = vmul.f32 %v10918_v62, %v3224_v34  ;;  %v4321_v30 = vadd.f32 %v10912_v25, %v4301_v45  ;;  %v4302_v57 = vmul.f32 %v10906_v43, %v11001_v0  ;;  %v4369_v1 = vsel %vm4336_vm9, %v4319_v51, %v4353_v15 }
 0x2e6   : > { %v11033_v61 = vadd.f32 %v6164_v21, %v6163_v24  ;;  %4687 = vmatprep.mubr.f32.mxu1 %v4366_v40  ;;  %v4354_v52 = vmul.f32 %v10926_v5, %v4320_v29  ;;  %vm4337_vm11 = vcmp.ge.f32.partialorder %v4320_v29, 0.0  ;;  %v3226_v13 = vadd.f32 %v10902_v26, %v3206_v7 }
 0x2e7   : > { %v3207_v10 = vmul.f32 %v10890_v56, %v10803_v42  ;;  %v3274_v36 = vsel %vm3241_vm10, %v3224_v34, %v3258_v3  ;;  %vm3242_vm12 = vcmp.ge.f32.partialorder %v3225_v31, 0.0  ;;  %v3259_v9 = vmul.f32 %v10918_v62, %v3225_v31 }
 0x2e8   : > { %v6166_v46 = vpop.f32.mrb[230].mxu0  ;;  %v4303_v0 = vmul.f32 %v10906_v43, %v11011_v4  ;;  %v4322_v53 = vadd.f32 %v10912_v25, %v4302_v57  ;;  %v4370_v49 = vsel %vm4337_vm11, %v4320_v29, %v4354_v52  ;;  %v4355_v41 = vmul.f32 %v10926_v5, %v4321_v30  ;;  %v11113_v52 = vld [vmem:[%s11230_s11] ss:$0 sm:$0xff] }
 0x2e9   : > { %4688 = vmatmul.mubr.f32.gmra.mrb[240].mxu1 %v3271_v8  ;;  %v6167_v6 = vpop.f32.mrb[231].mxu0  ;;  %vm4338_vm13 = vcmp.ge.f32.partialorder %v4321_v30, 0.0  ;;  %v3208_v42 = vmul.f32 %v10890_v56, %v10800_v20  ;;  %v3227_v24 = vadd.f32 %v10902_v26, %v3207_v10  ;;  %v3275_v47 = vsel %vm3242_vm12, %v3225_v31, %v3259_v9 }
 0x2ea   : > { %v11043_v22 = vadd.f32 %v6167_v6, %v6166_v46  ;;  %4692 = vmatprep.mubr.f32.mxu1 %v4367_v19  ;;  %v3260_v43 = vmul.f32 %v10918_v62, %v3226_v13  ;;  %v4371_v27 = vsel %vm4338_vm13, %v4321_v30, %v4355_v41  ;;  %vm3243_vm14 = vcmp.ge.f32.partialorder %v3226_v13, 0.0 }
 0x2eb   : > { %v4356_v14 = vmul.f32 %v10926_v5, %v4322_v53  ;;  %v4323_v21 = vadd.f32 %v10912_v25, %v4303_v0  ;;  %vm4339_vm15 = vcmp.ge.f32.partialorder %v4322_v53, 0.0  ;;  %v3228_v20 = vadd.f32 %v10902_v26, %v3208_v42 }
 0x2ec   : > { %v6169_v2 = vpop.f32.mrb[232].mxu0  ;;  %v3276_v28 = vsel %vm3243_vm14, %v3226_v13, %v3260_v43  ;;  %v3261_v32 = vmul.f32 %v10918_v62, %v3227_v24  ;;  %vm3244_vm0 = vcmp.ge.f32.partialorder %v3227_v24, 0.0 }
 0x2ed   : > { %4693 = vmatmul.mubr.f32.gmra.mrb[242].mxu1 %v3272_v16  ;;  %v6170_v11 = vpop.f32.mrb[233].mxu0  ;;  %v4372_v46 = vsel %vm4339_vm15, %v4322_v53, %v4356_v14  ;;  %v4357_v8 = vmul.f32 %v10926_v5, %v4323_v21  ;;  %vm4340_vm1 = vcmp.ge.f32.partialorder %v4323_v21, 0.0  ;;  %v3262_v60 = vmul.f32 %v10918_v62, %v3228_v20 }
 0x2ee   : > { %v11053_v63 = vadd.f32 %v6170_v11, %v6169_v2  ;;  %4697 = vmatprep.mubr.f32.mxu1 %v4368_v50  ;;  %v3277_v51 = vsel %vm3244_vm0, %v3227_v24, %v3261_v32  ;;  %vm3245_vm2 = vcmp.ge.f32.partialorder %v3228_v20, 0.0  ;;  %v11119_v53 = vstv %s5030_s23 }
 0x2ef   : > { %v4373_v6 = vsel %vm4340_vm1, %v4323_v21, %v4357_v8  ;;  %v3278_v34 = vsel %vm3245_vm2, %v3228_v20, %v3262_v60 }
 0x2f0   : > { %v6172_v37 = vpop.f32.mrb[234].mxu0 }
 0x2f1   : > { %4698 = vmatmul.mubr.f32.gmra.mrb[244].mxu1 %v3273_v18  ;;  %v6173_v23 = vpop.f32.mrb[235].mxu0 }
 0x2f2   : > { %v11063_v55 = vadd.f32 %v6173_v23, %v6172_v37  ;;  %4702 = vmatprep.mubr.f32.mxu1 %v4369_v1 }
 0x2f4   : > { %v6175_v44 = vpop.f32.mrb[236].mxu0 }
 0x2f5   : > { %4703 = vmatmul.mubr.f32.gmra.mrb[246].mxu1 %v3274_v36  ;;  %v6176_v17 = vpop.f32.mrb[237].mxu0 }
 0x2f6   : > { %v11073_v38 = vadd.f32 %v6176_v17, %v6175_v44  ;;  %4707 = vmatprep.mubr.f32.mxu1 %v4370_v49  ;;  %v11116_v44 = vld [vmem:[%s593_s15] ss:$0 sm:$0xff] }
 0x2f8   : > { %v6178_v39 = vpop.f32.mrb[238].mxu0 }
 0x2f9   : > { %4708 = vmatmul.mubr.f32.gmra.mrb[248].mxu1 %v3275_v47  ;;  %v6179_v4 = vpop.f32.mrb[239].mxu0 }
 0x2fa   : > { %v11081_v40 = vadd.f32 %v6179_v4, %v6178_v39  ;;  %4712 = vmatprep.mubr.f32.mxu1 %v4371_v27 }
 0x2fc   : > { %v6181_v56 = vpop.f32.mrb[240].mxu0 }
 0x2fd   : > { %4713 = vmatmul.mubr.f32.gmra.mrb[250].mxu1 %v3276_v28  ;;  %v6182_v59 = vpop.f32.mrb[241].mxu0 }
 0x2fe   : > { %v11086_v54 = vadd.f32 %v6182_v59, %v6181_v56  ;;  %4717 = vmatprep.mubr.f32.mxu1 %v4372_v46 }
 0x300   : > { %v6184_v25 = vpop.f32.mrb[242].mxu0 }
 0x301   : > { %4718 = vmatmul.mubr.f32.gmra.mrb[252].mxu1 %v3277_v51  ;;  %v6185_v26 = vpop.f32.mrb[243].mxu0 }
 0x302   : > { %v11089_v19 = vadd.f32 %v6185_v26, %v6184_v25  ;;  %4722 = vmatprep.mubr.f32.mxu1 %v4373_v6 }
 0x304   : > { %v6187_v12 = vpop.f32.mrb[244].mxu0 }
 0x305   : > { %4723 = vmatmul.mubr.f32.gmra.mrb[254].mxu1 %v3278_v34  ;;  %v6188_v58 = vpop.f32.mrb[245].mxu0 }
 0x306   : > { %v11091_v5 = vadd.f32 %v6188_v58, %v6187_v12 }
 0x308   : > { %v6190_v2 = vpop.f32.mrb[246].mxu0 }
 0x309   : > { %v6191_v16 = vpop.f32.mrb[247].mxu0 }
 0x30a   : > { %v11093_v33 = vadd.f32 %v6191_v16, %v6190_v2 }
 0x30c   : > { %v6193_v62 = vpop.f32.mrb[248].mxu0 }
 0x30d   : > { %v6194_v45 = vpop.f32.mrb[249].mxu0 }
 0x30e   : > { %v11095_v29 = vadd.f32 %v6194_v45, %v6193_v62 }
 0x310   : > { %v6196_v11 = vpop.f32.mrb[250].mxu0 }
 0x311   : > { %v6197_v50 = vpop.f32.mrb[251].mxu0 }
 0x312   : > { %v11097_v15 = vadd.f32 %v6197_v50, %v6196_v11 }
 0x314   : > { %v6199_v7 = vpop.f32.mrb[252].mxu0 }
 0x315   : > { %v6200_v31 = vpop.f32.mrb[253].mxu0 }
 0x316   : > { %v11099_v37 = vadd.f32 %v6200_v31, %v6199_v7 }
 0x318   : > { %v6202_v18 = vpop.f32.mrb[254].mxu0 }
 0x319   : > { %v6203_v3 = vpop.f32.mrb[255].mxu0 }
 0x31a   : > { %v11101_v30 = vadd.f32 %v6203_v3, %v6202_v18 }
 0x39c   : > { %v6237_v57 = vpop.f32.mrb[224].mxu1 }
 0x39d   : > { %v6238_v23 = vpop.f32.mrb[225].mxu1 }
 0x39e   : > { %v6239_v1 = vadd.f32 %v6238_v23, %v6237_v57 }
 0x3a0   : > { %v4650_v13 = vadd.f32 %v6239_v1, %v11013_v48  ;;  %v6240_v10 = vpop.f32.mrb[226].mxu1 }
 0x3a1   : > { %v6241_v36 = vpop.f32.mrb[227].mxu1 }
 0x3a2   : > { %v4735_v9 = vmul.f32 %v11113_v52, %v4650_v13  ;;  %v6242_v0 = vadd.f32 %v6241_v36, %v6240_v10 }
 0x3a4   : > { %v4758_v17 = vadd.f32 %v11116_v44, %v4735_v9  ;;  %v4655_v49 = vadd.f32 %v6242_v0, %v11023_v35  ;;  %v6243_v41 = vpop.f32.mrb[228].mxu1 }
 0x3a5   : > { %v6244_v42 = vpop.f32.mrb[229].mxu1 }
 0x3a6   : > { %vm4775_vm3 = vcmp.ge.f32.partialorder %v4758_v17, 0.0  ;;  %v4792_v48 = vmul.f32 %v11119_v53, %v4758_v17  ;;  %v4736_v24 = vmul.f32 %v11113_v52, %v4655_v49  ;;  %v6245_v39 = vadd.f32 %v6244_v42, %v6243_v41 }
 0x3a8   : > { %v4808_v47 = vsel %vm4775_vm3, %v4758_v17, %v4792_v48  ;;  %v4759_v43 = vadd.f32 %v11116_v44, %v4736_v24  ;;  %v4660_v35 = vadd.f32 %v6245_v39, %v11033_v61  ;;  %v6246_v4 = vpop.f32.mrb[230].mxu1 }
 0x3a9   : > { %4824 = vst [vmem:[%s11126_s30] sm:$0xff] %v4808_v47  ;;  %v6247_v27 = vpop.f32.mrb[231].mxu1 }
 0x3aa   : > { %vm4776_vm4 = vcmp.ge.f32.partialorder %v4759_v43, 0.0  ;;  %v4793_v14 = vmul.f32 %v11119_v53, %v4759_v43  ;;  %v4737_v21 = vmul.f32 %v11113_v52, %v4660_v35  ;;  %v6248_v20 = vadd.f32 %v6247_v27, %v6246_v4 }
 0x3ac   : > { %v4809_v56 = vsel %vm4776_vm4, %v4759_v43, %v4793_v14  ;;  %v4760_v28 = vadd.f32 %v11116_v44, %v4737_v21  ;;  %v4665_v32 = vadd.f32 %v6248_v20, %v11043_v22  ;;  %v6249_v59 = vpop.f32.mrb[232].mxu1 }
 0x3ad   : > { %4825 = vst [vmem:[%s11126_s30 + $0x8] sm:$0xff] %v4809_v56  ;;  %v6250_v46 = vpop.f32.mrb[233].mxu1 }
 0x3ae   : > { %vm4777_vm5 = vcmp.ge.f32.partialorder %v4760_v28, 0.0  ;;  %v4794_v61 = vmul.f32 %v11119_v53, %v4760_v28  ;;  %v4738_v8 = vmul.f32 %v11113_v52, %v4665_v32  ;;  %v6251_v25 = vadd.f32 %v6250_v46, %v6249_v59 }
 0x3b0   : > { %v4810_v51 = vsel %vm4777_vm5, %v4760_v28, %v4794_v61  ;;  %v4761_v60 = vadd.f32 %v11116_v44, %v4738_v8  ;;  %v4670_v26 = vadd.f32 %v6251_v25, %v11053_v63  ;;  %v6252_v6 = vpop.f32.mrb[234].mxu1 }
 0x3b1   : > { %4826 = vst [vmem:[%s11126_s30 + $0x10] sm:$0xff] %v4810_v51  ;;  %v6253_v12 = vpop.f32.mrb[235].mxu1 }
 0x3b2   : > { %vm4778_vm6 = vcmp.ge.f32.partialorder %v4761_v60, 0.0  ;;  %v4795_v22 = vmul.f32 %v11119_v53, %v4761_v60  ;;  %v4739_v34 = vmul.f32 %v11113_v52, %v4670_v26  ;;  %v6254_v58 = vadd.f32 %v6253_v12, %v6252_v6 }
 0x3b4   : > { %v4811_v2 = vsel %vm4778_vm6, %v4761_v60, %v4795_v22  ;;  %v4762_v16 = vadd.f32 %v11116_v44, %v4739_v34  ;;  %v4675_v62 = vadd.f32 %v6254_v58, %v11063_v55  ;;  %v6255_v45 = vpop.f32.mrb[236].mxu1 }
 0x3b5   : > { %4827 = vst [vmem:[%s11126_s30 + $0x18] sm:$0xff] %v4811_v2  ;;  %v6256_v11 = vpop.f32.mrb[237].mxu1 }
 0x3b6   : > { %vm4779_vm7 = vcmp.ge.f32.partialorder %v4762_v16, 0.0  ;;  %v4796_v63 = vmul.f32 %v11119_v53, %v4762_v16  ;;  %v4740_v50 = vmul.f32 %v11113_v52, %v4675_v62  ;;  %v6257_v7 = vadd.f32 %v6256_v11, %v6255_v45 }
 0x3b8   : > { %v4812_v31 = vsel %vm4779_vm7, %v4762_v16, %v4796_v63  ;;  %v4763_v18 = vadd.f32 %v11116_v44, %v4740_v50  ;;  %v4680_v3 = vadd.f32 %v6257_v7, %v11073_v38  ;;  %v6258_v57 = vpop.f32.mrb[238].mxu1 }
 0x3b9   : > { %4828 = vst [vmem:[%s11126_s30 + $0x20] sm:$0xff] %v4812_v31  ;;  %v6259_v23 = vpop.f32.mrb[239].mxu1 }
 0x3ba   : > { %vm4780_vm8 = vcmp.ge.f32.partialorder %v4763_v18, 0.0  ;;  %v4797_v55 = vmul.f32 %v11119_v53, %v4763_v18  ;;  %v4741_v1 = vmul.f32 %v11113_v52, %v4680_v3  ;;  %v6260_v13 = vadd.f32 %v6259_v23, %v6258_v57 }
 0x3bc   : > { %v4813_v10 = vsel %vm4780_vm8, %v4763_v18, %v4797_v55  ;;  %v4764_v36 = vadd.f32 %v11116_v44, %v4741_v1  ;;  %v4685_v9 = vadd.f32 %v6260_v13, %v11081_v40  ;;  %v6261_v0 = vpop.f32.mrb[240].mxu1 }
 0x3bd   : > { %4829 = vst [vmem:[%s11126_s30 + $0x28] sm:$0xff] %v4813_v10  ;;  %v6262_v17 = vpop.f32.mrb[241].mxu1 }
 0x3be   : > { %vm4781_vm9 = vcmp.ge.f32.partialorder %v4764_v36, 0.0  ;;  %v4798_v38 = vmul.f32 %v11119_v53, %v4764_v36  ;;  %v4742_v49 = vmul.f32 %v11113_v52, %v4685_v9  ;;  %v6263_v41 = vadd.f32 %v6262_v17, %v6261_v0 }
 0x3c0   : > { %v4814_v42 = vsel %vm4781_vm9, %v4764_v36, %v4798_v38  ;;  %v4765_v48 = vadd.f32 %v11116_v44, %v4742_v49  ;;  %v4690_v24 = vadd.f32 %v6263_v41, %v11086_v54  ;;  %v6264_v39 = vpop.f32.mrb[242].mxu1 }
 0x3c1   : > { %4830 = vst [vmem:[%s11126_s30 + $0x30] sm:$0xff] %v4814_v42  ;;  %v6265_v47 = vpop.f32.mrb[243].mxu1 }
 0x3c2   : > { %vm4782_vm10 = vcmp.ge.f32.partialorder %v4765_v48, 0.0  ;;  %v4799_v40 = vmul.f32 %v11119_v53, %v4765_v48  ;;  %v4743_v43 = vmul.f32 %v11113_v52, %v4690_v24  ;;  %v6266_v35 = vadd.f32 %v6265_v47, %v6264_v39 }
 0x3c4   : > { %v4815_v4 = vsel %vm4782_vm10, %v4765_v48, %v4799_v40  ;;  %v4766_v27 = vadd.f32 %v11116_v44, %v4743_v43  ;;  %v4695_v14 = vadd.f32 %v6266_v35, %v11089_v19  ;;  %v6267_v21 = vpop.f32.mrb[244].mxu1 }
 0x3c5   : > { %4831 = vst [vmem:[%s11126_s30 + $0x38] sm:$0xff] %v4815_v4  ;;  %v6268_v20 = vpop.f32.mrb[245].mxu1 }
 0x3c6   : > { %vm4783_vm11 = vcmp.ge.f32.partialorder %v4766_v27, 0.0  ;;  %v4800_v54 = vmul.f32 %v11119_v53, %v4766_v27  ;;  %v4744_v56 = vmul.f32 %v11113_v52, %v4695_v14  ;;  %v6269_v28 = vadd.f32 %v6268_v20, %v6267_v21 }
 0x3c8   : > { %v4816_v32 = vsel %vm4783_vm11, %v4766_v27, %v4800_v54  ;;  %v4767_v59 = vadd.f32 %v11116_v44, %v4744_v56  ;;  %v4700_v46 = vadd.f32 %v6269_v28, %v11091_v5  ;;  %v6270_v61 = vpop.f32.mrb[246].mxu1 }
 0x3c9   : > { %4832 = vst [vmem:[%s11126_s30 + $0x40] sm:$0xff] %v4816_v32  ;;  %v6271_v8 = vpop.f32.mrb[247].mxu1 }
 0x3ca   : > { %vm4784_vm12 = vcmp.ge.f32.partialorder %v4767_v59, 0.0  ;;  %v4801_v19 = vmul.f32 %v11119_v53, %v4767_v59  ;;  %v4745_v25 = vmul.f32 %v11113_v52, %v4700_v46  ;;  %v6272_v51 = vadd.f32 %v6271_v8, %v6270_v61 }
 0x3cc   : > { %v4817_v60 = vsel %vm4784_vm12, %v4767_v59, %v4801_v19  ;;  %v4768_v26 = vadd.f32 %v11116_v44, %v4745_v25  ;;  %v4705_v6 = vadd.f32 %v6272_v51, %v11093_v33  ;;  %v6273_v12 = vpop.f32.mrb[248].mxu1 }
 0x3cd   : > { %4833 = vst [vmem:[%s11126_s30 + $0x48] sm:$0xff] %v4817_v60  ;;  %v6274_v22 = vpop.f32.mrb[249].mxu1 }
 0x3ce   : > { %vm4785_vm13 = vcmp.ge.f32.partialorder %v4768_v26, 0.0  ;;  %v4802_v5 = vmul.f32 %v11119_v53, %v4768_v26  ;;  %v4746_v34 = vmul.f32 %v11113_v52, %v4705_v6  ;;  %v6275_v58 = vadd.f32 %v6274_v22, %v6273_v12 }
 0x3d0   : > { %v4818_v2 = vsel %vm4785_vm13, %v4768_v26, %v4802_v5  ;;  %v4769_v16 = vadd.f32 %v11116_v44, %v4746_v34  ;;  %v4710_v62 = vadd.f32 %v6275_v58, %v11095_v29  ;;  %v6276_v45 = vpop.f32.mrb[250].mxu1 }
 0x3d1   : > { %4834 = vst [vmem:[%s11126_s30 + $0x50] sm:$0xff] %v4818_v2  ;;  %v6277_v11 = vpop.f32.mrb[251].mxu1 }
 0x3d2   : > { %vm4786_vm14 = vcmp.ge.f32.partialorder %v4769_v16, 0.0  ;;  %v4803_v33 = vmul.f32 %v11119_v53, %v4769_v16  ;;  %v4747_v63 = vmul.f32 %v11113_v52, %v4710_v62  ;;  %v6278_v50 = vadd.f32 %v6277_v11, %v6276_v45 }
 0x3d4   : > { %v4819_v7 = vsel %vm4786_vm14, %v4769_v16, %v4803_v33  ;;  %v4770_v31 = vadd.f32 %v11116_v44, %v4747_v63  ;;  %v4715_v18 = vadd.f32 %v6278_v50, %v11097_v15  ;;  %v6279_v3 = vpop.f32.mrb[252].mxu1 }
 0x3d5   : > { %4835 = vst [vmem:[%s11126_s30 + $0x58] sm:$0xff] %v4819_v7  ;;  %v6280_v57 = vpop.f32.mrb[253].mxu1 }
 0x3d6   : > { %vm4787_vm15 = vcmp.ge.f32.partialorder %v4770_v31, 0.0  ;;  %v4804_v29 = vmul.f32 %v11119_v53, %v4770_v31  ;;  %v4748_v23 = vmul.f32 %v11113_v52, %v4715_v18  ;;  %v6281_v55 = vadd.f32 %v6280_v57, %v6279_v3 }
 0x3d8   : > { %v4820_v1 = vsel %vm4787_vm15, %v4770_v31, %v4804_v29  ;;  %v4771_v13 = vadd.f32 %v11116_v44, %v4748_v23  ;;  %v4720_v10 = vadd.f32 %v6281_v55, %v11099_v37  ;;  %v6282_v36 = vpop.f32.mrb[254].mxu1 }
 0x3d9   : > { %4836 = vst [vmem:[%s11126_s30 + $0x60] sm:$0xff] %v4820_v1  ;;  %v6283_v9 = vpop.f32.mrb[255].mxu1 }
 0x3da   : > { %vm4788_vm0 = vcmp.ge.f32.partialorder %v4771_v13, 0.0  ;;  %v4805_v15 = vmul.f32 %v11119_v53, %v4771_v13  ;;  %v4749_v0 = vmul.f32 %v11113_v52, %v4720_v10  ;;  %v6284_v17 = vadd.f32 %v6283_v9, %v6282_v36 }
 0x3dc   : > { %v4821_v38 = vsel %vm4788_vm0, %v4771_v13, %v4805_v15  ;;  %v4772_v49 = vadd.f32 %v11116_v44, %v4749_v0  ;;  %v4725_v41 = vadd.f32 %v6284_v17, %v11101_v30 }
 0x3dd   : > { %4837 = vst [vmem:[%s11126_s30 + $0x68] sm:$0xff] %v4821_v38 }
 0x3de   : > { %vm4789_vm1 = vcmp.ge.f32.partialorder %v4772_v49, 0.0  ;;  %v4806_v37 = vmul.f32 %v11119_v53, %v4772_v49  ;;  %v4750_v42 = vmul.f32 %v11113_v52, %v4725_v41 }
 0x3e0   : > { %v4822_v48 = vsel %vm4789_vm1, %v4772_v49, %v4806_v37  ;;  %v4773_v24 = vadd.f32 %v11116_v44, %v4750_v42 }
 0x3e1   : > { %4838 = vst [vmem:[%s11126_s30 + $0x70] sm:$0xff] %v4822_v48 }
 0x3e2   : > { %vm4790_vm2 = vcmp.ge.f32.partialorder %v4773_v24, 0.0  ;;  %v4807_v39 = vmul.f32 %v11119_v53, %v4773_v24 }
 0x3e4   : > { %v4823_v47 = vsel %vm4790_vm2, %v4773_v24, %v4807_v39 }
 0x3e5   : > { %4839 = vst [vmem:[%s11126_s30 + $0x78] sm:$0xff] %v4823_v47 }
 0x3e6 PF: > { %s24_s29 = sadd.s32 1, %s7283_s29   ;;  %s11507_s26 = sld [smem:[#allocation5_spill]] }
 0x3e7   : > { %p21_p7 = scmp.ge.s32.totalorder %s24_s29, 6   ;;  %s11508_s18 = sld [smem:[#allocation6_spill]] }
 0x3e8   : > { %s11509_s28 = sld [smem:[#allocation7_spill]]  ;;  %s11510_s25 = smov %s7275_s27 }
 0x3e9   :  { %23 = sbr.rel (!%p21_p7) target bundleno = 5 (0x5), region = 116 }
 0x3ed   : > { %s11511_s27 = smov %s11508_s18 }
 0x3f0   :  { %4872 = vsyncpa [#allocation3], 1 }
 0x3f1   :  { %4874 = vsyncpa [#allocation3 + $0x1], 1 }

</bundles_post_ra>
